<compile_context>
chip_gen: v7x
topology: tpu7x:2x2x1
jax: 0.10.0
libtpu: 0.0.40
codegen_flags: <defaults>
</compile_context>

<pallas_src>
import math
from functools import partial

import jax
import jax.numpy as jnp
from jax.experimental import pallas as pl
from jax.experimental.pallas import tpu as pltpu  # noqa: F401  (kept for completeness)

# ----------------------------- configuration --------------------------------
IMG = 16          # small img_size consistent with the module (default is 64)
PATCH = 4
IN_CH = 3
EMBED = 16
DEPTH = 3
HEADS = 4
MLP_RATIO = 4
NUM_CLASSES = 15
BATCH = 2
EPS = 1e-6        # timm ViT uses LayerNorm(eps=1e-6)

GRID_H = IMG // PATCH
GRID_W = IMG // PATCH
N_PATCH = GRID_H * GRID_W
SEQ = N_PATCH + 1               # +1 cls token
HIDDEN = EMBED * MLP_RATIO

OUT_ROWS = 8                    # sublane-dense output tile
OUT_LANES = 128                 # lane-dense output tile
W_LANES = 128                   # lane width of all packed parameter slabs
QK_SLOT = 8                     # 8-lane-aligned slot per head for q and k columns
NEG_INF = -1e30                 # additive attention mask for cross-image pairs

assert EMBED % HEADS == 0
assert EMBED // HEADS <= QK_SLOT
assert 2 * HEADS * QK_SLOT + HEADS * EMBED <= W_LANES     # q_pad | k_pad | v_fold fit 128
assert 6 * EMBED <= W_LANES                               # packed LN/bias row fits 128
assert NUM_CLASSES + 1 <= OUT_LANES


# ------------------------- in-kernel math helpers ----------------------------
def _erf_f32(x):
    # float32 rational erf (same form/coeffs as XLA's f32 erf); avoids relying
    # on an erf primitive lowering inside Mosaic.  Accurate to f32 precision.
    alpha = (-2.72614225801306e-10, 2.77068142495902e-08, -2.10102402082508e-06,
             -5.69250639462346e-05, -7.34990630326855e-04, -2.95459980854025e-03,
             -1.60960333262415e-02)
    beta = (-1.45660718464996e-05, -2.13374055278905e-04, -1.68282697438203e-03,
            -7.37332916720468e-03, -1.42647390514189e-02)
    x = jnp.clip(x, -4.0, 4.0)
    x2 = x * x
    p = jnp.full_like(x, alpha[0])
    for c in alpha[1:]:
        p = p * x2 + c
    q = jnp.full_like(x, beta[0])
    for c in beta[1:]:
        q = q * x2 + c
    return (x * p) / q


def _gelu_exact(x):
    # nn.GELU() default in PyTorch is the exact (erf) GELU.
    return 0.5 * x * (1.0 + _erf_f32(x * (1.0 / math.sqrt(2.0))))


def _layernorm(z, gamma, beta, eps):
    # gamma / beta: (1, D) rows, z: (T, D); all f32
    mu = jnp.mean(z, axis=-1, keepdims=True)
    var = jnp.mean((z - mu) ** 2, axis=-1, keepdims=True)
    return (z - mu) * jax.lax.rsqrt(var + eps) * gamma + beta


# ------------------------------ fused kernel ---------------------------------
def _fused_vit_kernel(patches_ref, tok_mask_ref, w_eh_ref, w_blk_ref, consts_ref,
                      out_ref, *, depth, heads, d_model, hidden, eps):
    D, H = d_model, hidden
    QK = QK_SLOT
    KB = heads * QK              # k-column base in the packed attention weight
    VB = 2 * KB                  # folded-v column base; also tok_bias lane offset
    T = patches_ref.shape[0]     # total tokens (B * (n_patch + 1))
    KP = patches_ref.shape[1]    # C * patch * patch
    bf16 = jnp.bfloat16

    consts = consts_ref[...]                 # (3*depth + 2, 128) f32 — all small biases/LN params
    tm = tok_mask_ref[...]                   # (T, 128) f32
    mask = tm[:, 0:T]                        # additive block-diagonal per-image mask
    tok_bias = tm[:, VB:VB + D]              # cls + pos + conv-bias rows

    # ---- patch embedding for every token row (cls rows are all-zero patches) ----
    x = jnp.dot(patches_ref[...], w_eh_ref[...][0:KP, 0:D],
                preferred_element_type=jnp.float32) + tok_bias        # (T, D) f32

    for d in range(depth):                   # DEPTH = 3, statically unrolled
        wd = w_blk_ref[d]                    # (2D + H, 128) bf16 per-block weight slab
        w_attn = wd[0:D, :]                  # [q_pad(32) | k_pad(32) | v@w_proj(64)]
        w_fc1 = wd[D:2 * D, 0:H]             # (D, H)
        w_fc2 = wd[2 * D:2 * D + H, 0:D]     # (H, D)
        r = 3 * d
        b_qk = consts[r:r + 1, :]            # (1, 128): q/k biases in padded slots, zeros for v'
        misc = consts[r + 1:r + 2, :]        # (1, 128)
        ln1_g, ln1_b = misc[:, 0:D], misc[:, D:2 * D]
        ln2_g, ln2_b = misc[:, 2 * D:3 * D], misc[:, 3 * D:4 * D]
        b_attn, b_fc2 = misc[:, 4 * D:5 * D], misc[:, 5 * D:6 * D]
        b_fc1 = consts[r + 2:r + 3, 0:H]     # (1, H)

        # ----- attention: x = x + sum_h softmax(q_h k_h^T + mask) @ (v_h w_proj_h) + b -----
        h1 = _layernorm(x, ln1_g, ln1_b, eps)
        qkv = (jnp.dot(h1.astype(bf16), w_attn, preferred_element_type=jnp.float32)
               + b_qk).astype(bf16)                                   # (T, 128)
        attn = None
        for hh in range(heads):
            q_h = qkv[:, hh * QK:(hh + 1) * QK]            # 8-lane aligned, zero-padded
            k_h = qkv[:, KB + hh * QK:KB + (hh + 1) * QK]  # zeros contribute 0 to q.k^T
            v_h = qkv[:, VB + hh * D:VB + (hh + 1) * D]    # already folded through w_proj
            s = jax.lax.dot_general(q_h, k_h, (((1,), (1,)), ((), ())),
                                    preferred_element_type=jnp.float32) + mask
            s = s - jnp.max(s, axis=-1, keepdims=True)
            e = jnp.exp(s)
            p = e * pl.reciprocal(jnp.sum(e, axis=-1, keepdims=True), approx=True)
            o = jnp.dot(p.astype(bf16), v_h, preferred_element_type=jnp.float32)  # (T, D)
            attn = o if attn is None else attn + o
        x = x + attn + b_attn

        # ----- MLP: x = x + fc2(GELU(fc1(LN2(x)))) -----
        h2 = _layernorm(x, ln2_g, ln2_b, eps)
        h2 = jnp.dot(h2.astype(bf16), w_fc1, preferred_element_type=jnp.float32) + b_fc1
        h2 = _gelu_exact(h2)
        h2 = jnp.dot(h2.astype(bf16), w_fc2, preferred_element_type=jnp.float32) + b_fc2
        x = x + h2

    # ---- final LayerNorm + fused [classifier | value | zero-pad] heads ----
    # LN is per-token, so applying it only to the rows we keep is identical to
    # timm's norm-then-pool.  Rows 0..B-1 are the cls tokens; rows B..7 are real
    # patch tokens pushed through the head "for free" and discarded by the
    # wrapper, keeping the HBM store a single dense (8, 128) tile (unmasked vst).
    rN = 3 * depth
    nrow = consts[rN:rN + 1, :]
    b_hv = consts[rN + 1:rN + 2, :]
    feats = _layernorm(x[0:out_ref.shape[0], :], nrow[:, 0:D], nrow[:, D:2 * D], eps)
    out_ref[...] = (jnp.dot(feats.astype(bf16), w_eh_ref[...][KP:KP + D, :],
                            preferred_element_type=jnp.float32) + b_hv)


# ------------------------------ parameters ----------------------------------
def init_params(key):
    keys = iter(jax.random.split(key, 8 + DEPTH * 8))

    def nrm(shape, scale=0.02):
        return (scale * jax.random.normal(next(keys), shape)).astype(jnp.float32)

    p = {
        "patch_w": nrm((EMBED, IN_CH, PATCH, PATCH)),   # Conv2d weight (D, C, p, p)
        "patch_b": nrm((EMBED,)),
        "cls": nrm((1, 1, EMBED)),
        "pos": nrm((1, SEQ, EMBED)),
        "norm_g": jnp.ones((EMBED,), jnp.float32),
        "norm_b": jnp.zeros((EMBED,), jnp.float32),
        "head_w": nrm((EMBED, NUM_CLASSES)),
        "head_b": nrm((NUM_CLASSES,)),
        "value_w": nrm((EMBED, 1)),
        "value_b": nrm((1,)),
        "blocks": [],
    }
    for _ in range(DEPTH):
        p["blocks"].append(dict(
            ln1_g=jnp.ones((EMBED,), jnp.float32), ln1_b=jnp.zeros((EMBED,), jnp.float32),
            ln2_g=jnp.ones((EMBED,), jnp.float32), ln2_b=jnp.zeros((EMBED,), jnp.float32),
            w_qkv=nrm((EMBED, 3 * EMBED)), b_qkv=nrm((3 * EMBED,)),
            w_proj=nrm((EMBED, EMBED)), b_proj=nrm((EMBED,)),
            w_fc1=nrm((EMBED, HIDDEN)), b_fc1=nrm((HIDDEN,)),
            w_fc2=nrm((HIDDEN, EMBED)), b_fc2=nrm((EMBED,)),
        ))
    return p


def pack_params(params, batch=BATCH, img=IMG):
    """Pack all parameters (and the batch-static mask / token bias) into 4 slabs."""
    D, H, hd = EMBED, HIDDEN, EMBED // HEADS
    scale = hd ** -0.5
    QK, KB, VB = QK_SLOT, HEADS * QK_SLOT, 2 * HEADS * QK_SLOT
    KP = IN_CH * PATCH * PATCH

    w_blk, const_rows = [], []
    for blk in params["blocks"]:
        w_q = blk["w_qkv"][:, 0:D] * scale        # fold 1/sqrt(hd) into q
        w_k = blk["w_qkv"][:, D:2 * D]
        w_v = blk["w_qkv"][:, 2 * D:3 * D]
        b_q = blk["b_qkv"][0:D] * scale
        b_k = blk["b_qkv"][D:2 * D]
        b_v = blk["b_qkv"][2 * D:3 * D]
        w_proj, b_proj = blk["w_proj"], blk["b_proj"]

        # packed attention weight: [q heads padded to 8 lanes | k heads padded | v@w_proj]
        w_attn = jnp.zeros((D, W_LANES), jnp.float32)
        b_qk = jnp.zeros((W_LANES,), jnp.float32)
        for h in range(HEADS):
            cq, ck = h * QK, KB + h * QK
            w_attn = w_attn.at[:, cq:cq + hd].set(w_q[:, h * hd:(h + 1) * hd])
            w_attn = w_attn.at[:, ck:ck + hd].set(w_k[:, h * hd:(h + 1) * hd])
            w_attn = w_attn.at[:, VB + h * D:VB + (h + 1) * D].set(
                w_v[:, h * hd:(h + 1) * hd] @ w_proj[h * hd:(h + 1) * hd, :])
            b_qk = b_qk.at[cq:cq + hd].set(b_q[h * hd:(h + 1) * hd])
            b_qk = b_qk.at[ck:ck + hd].set(b_k[h * hd:(h + 1) * hd])
        b_attn = b_v @ w_proj + b_proj            # folded v-bias + proj bias (uses sum(p)=1)

        slab = jnp.zeros((2 * D + H, W_LANES), jnp.float32)
        slab = slab.at[0:D, :].set(w_attn)
        slab = slab.at[D:2 * D, 0:H].set(blk["w_fc1"])
        slab = slab.at[2 * D:2 * D + H, 0:D].set(blk["w_fc2"])
        w_blk.append(slab)

        r1 = (jnp.zeros((W_LANES,), jnp.float32)
              .at[0:D].set(blk["ln1_g"]).at[D:2 * D].set(blk["ln1_b"])
              .at[2 * D:3 * D].set(blk["ln2_g"]).at[3 * D:4 * D].set(blk["ln2_b"])
              .at[4 * D:5 * D].set(b_attn).at[5 * D:6 * D].set(blk["b_fc2"]))
        r2 = jnp.zeros((W_LANES,), jnp.float32).at[0:H].set(blk["b_fc1"])
        const_rows += [b_qk, r1, r2]

    const_rows.append(jnp.zeros((W_LANES,), jnp.float32)
                      .at[0:D].set(params["norm_g"]).at[D:2 * D].set(params["norm_b"]))
    const_rows.append(jnp.zeros((W_LANES,), jnp.float32)
                      .at[0:NUM_CLASSES].set(params["head_b"])
                      .at[NUM_CLASSES].set(params["value_b"][0]))

    # patch-embed weight + fused [classifier | value] head weight -> one bf16 slab
    w_eh = jnp.zeros((KP + D, W_LANES), jnp.float32)
    w_eh = w_eh.at[0:KP, 0:D].set(params["patch_w"].reshape(D, KP).T)
    w_eh = w_eh.at[KP:KP + D, 0:NUM_CLASSES].set(params["head_w"])
    w_eh = w_eh.at[KP:KP + D, NUM_CLASSES:NUM_CLASSES + 1].set(params["value_w"])

    # tok_bias (cls + pos + conv-bias rows) and block-diagonal batch mask -> one f32 slab
    gh = gw = img // PATCH
    n_patch = gh * gw
    T = batch * (n_patch + 1)
    assert T <= VB, "tok_mask lane packing assumes total tokens <= 64; widen the slab"
    cls_row = params["cls"].reshape(1, D) + params["pos"][0, 0:1, :]
    patch_rows = params["pos"][0, 1:, :] + params["patch_b"][None, :]
    tok_bias = jnp.concatenate([jnp.tile(cls_row, (batch, 1)),
                                jnp.tile(patch_rows, (batch, 1))], axis=0)    # (T, D)
    batch_id = jnp.concatenate([jnp.arange(batch),
                                jnp.repeat(jnp.arange(batch), n_patch)])
    mask = jnp.where(batch_id[:, None] == batch_id[None, :], 0.0, NEG_INF)
    tok_mask = jnp.zeros((T, W_LANES), jnp.float32)
    tok_mask = tok_mask.at[:, 0:T].set(mask.astype(jnp.float32))
    tok_mask = tok_mask.at[:, VB:VB + D].set(tok_bias)

    return dict(w_eh=w_eh.astype(jnp.bfloat16),
                w_blk=jnp.stack(w_blk).astype(jnp.bfloat16),
                consts=jnp.stack(const_rows),          # (3*DEPTH + 2, 128) f32
                tok_mask=tok_mask)                     # (T, 128) f32


# ------------------------------- forward -------------------------------------
def vit_value_forward(packed, x):
    """Returns (logits, value) == (model.head(feat), value_head(feat))."""
    B, C, Himg, Wimg = x.shape
    gh, gw = Himg // PATCH, Wimg // PATCH
    n_patch = gh * gw
    T = B * (n_patch + 1)
    assert B <= OUT_ROWS <= T
    assert packed["tok_mask"].shape[0] == T, "packed params were built for a different batch/size"

    # patch extraction (Conv2d with k=stride=PATCH == patchify + matmul)
    patches = (x.reshape(B, C, gh, PATCH, gw, PATCH)
                .transpose(0, 2, 4, 1, 3, 5)                # (B, gh, gw, C, p, p)
                .reshape(B * n_patch, C * PATCH * PATCH))
    # Prepend B all-zero rows (one per cls token) so the in-kernel patch matmul
    # covers every token row; token layout is [cls_0..cls_{B-1}, patches_0, patches_1, ...].
    patches_pad = jnp.concatenate(
        [jnp.zeros((B, patches.shape[1]), x.dtype), patches], axis=0
    ).astype(jnp.bfloat16)                                   # (T, C*p*p)

    out = pl.pallas_call(
        partial(_fused_vit_kernel, depth=DEPTH, heads=HEADS, d_model=EMBED,
                hidden=HIDDEN, eps=EPS),
        out_shape=jax.ShapeDtypeStruct((OUT_ROWS, OUT_LANES), jnp.float32),
    )(patches_pad, packed["tok_mask"], packed["w_eh"], packed["w_blk"], packed["consts"])

    logits = out[:B, :NUM_CLASSES]
    value = out[:B, NUM_CLASSES:NUM_CLASSES + 1]
    return logits, value


# --------------------------------- main ---------------------------------------
if __name__ == "__main__":
    key = jax.random.PRNGKey(0)
    pkey, xkey = jax.random.split(key)
    params = init_params(pkey)
    packed = pack_params(params, batch=BATCH, img=IMG)     # one-time packing (outside jit)
    x = jax.random.normal(xkey, (BATCH, IN_CH, IMG, IMG), dtype=jnp.float32)

    fwd = jax.jit(vit_value_forward)
    l, v = fwd(packed, x)
    jax.block_until_ready((l, v))

    assert l.shape == (BATCH, NUM_CLASSES) and l.dtype == jnp.float32
    assert v.shape == (BATCH, 1) and v.dtype == jnp.float32
    assert bool(jnp.all(jnp.isfinite(l))) and bool(jnp.all(jnp.isfinite(v)))
    print("KERNEL_OK")
</pallas_src>

<mosaic_0001>
module attributes {stable_mosaic.version = 11 : i64} {
  func.func @_fused_vit_kernel(%arg0: memref<34x48xbf16, #tpu.memory_space<vmem>>, %arg1: memref<34x128xf32, #tpu.memory_space<vmem>>, %arg2: memref<64x128xbf16, #tpu.memory_space<vmem>>, %arg3: memref<3x96x128xbf16, #tpu.memory_space<vmem>>, %arg4: memref<11x128xf32, #tpu.memory_space<vmem>>, %arg5: memref<8x128xf32, #tpu.memory_space<vmem>>) attributes {dimension_semantics = [], scalar_prefetch = 0 : i64, scratch_operands = 0 : i64, tpu.core_type = #tpu.core_type<tc>} {
    %c0 = arith.constant 0 : index
    %c0_0 = arith.constant 0 : index
    %0 = vector.load %arg4[%c0, %c0_0] : memref<11x128xf32, #tpu.memory_space<vmem>>, vector<11x128xf32>
    %c0_1 = arith.constant 0 : index
    %c0_2 = arith.constant 0 : index
    %1 = vector.load %arg1[%c0_1, %c0_2] : memref<34x128xf32, #tpu.memory_space<vmem>>, vector<34x128xf32>
    %2 = vector.extract_strided_slice %1 {offsets = [0, 0], sizes = [34, 34], strides = [1, 1]} : vector<34x128xf32> to vector<34x34xf32>
    %3 = vector.extract_strided_slice %1 {offsets = [0, 64], sizes = [34, 16], strides = [1, 1]} : vector<34x128xf32> to vector<34x16xf32>
    %c0_3 = arith.constant 0 : index
    %c0_4 = arith.constant 0 : index
    %4 = vector.load %arg0[%c0_3, %c0_4] : memref<34x48xbf16, #tpu.memory_space<vmem>>, vector<34x48xbf16>
    %c0_5 = arith.constant 0 : index
    %c0_6 = arith.constant 0 : index
    %5 = vector.load %arg2[%c0_5, %c0_6] : memref<64x128xbf16, #tpu.memory_space<vmem>>, vector<64x128xbf16>
    %6 = vector.extract_strided_slice %5 {offsets = [0, 0], sizes = [48, 16], strides = [1, 1]} : vector<64x128xbf16> to vector<48x16xbf16>
    %cst = arith.constant dense<0.000000e+00> : vector<34x16xf32>
    %7 = tpu.matmul %4, %6, %cst {dimension_numbers = #tpu.dot_dimension_numbers<[1], [0], [0], [1], [0, 0, 1, 1], [], []>} : vector<34x48xbf16>, vector<48x16xbf16>, vector<34x16xf32> -> vector<34x16xf32>
    %8 = arith.addf %7, %3 : vector<34x16xf32>
    %c0_7 = arith.constant 0 : index
    %c0_8 = arith.constant 0 : index
    %c0_9 = arith.constant 0 : index
    %9 = vector.load %arg3[%c0_7, %c0_8, %c0_9] : memref<3x96x128xbf16, #tpu.memory_space<vmem>>, vector<1x96x128xbf16>
    %10 = vector.shape_cast %9 : vector<1x96x128xbf16> to vector<96x128xbf16>
    %11 = vector.extract_strided_slice %10 {offsets = [0, 0], sizes = [16, 128], strides = [1, 1]} : vector<96x128xbf16> to vector<16x128xbf16>
    %12 = vector.extract_strided_slice %10 {offsets = [16, 0], sizes = [16, 64], strides = [1, 1]} : vector<96x128xbf16> to vector<16x64xbf16>
    %13 = vector.extract_strided_slice %10 {offsets = [32, 0], sizes = [64, 16], strides = [1, 1]} : vector<96x128xbf16> to vector<64x16xbf16>
    %14 = vector.extract_strided_slice %0 {offsets = [0, 0], sizes = [1, 128], strides = [1, 1]} : vector<11x128xf32> to vector<1x128xf32>
    %15 = vector.extract_strided_slice %0 {offsets = [1, 0], sizes = [1, 128], strides = [1, 1]} : vector<11x128xf32> to vector<1x128xf32>
    %16 = vector.extract_strided_slice %15 {offsets = [0, 0], sizes = [1, 16], strides = [1, 1]} : vector<1x128xf32> to vector<1x16xf32>
    %17 = vector.extract_strided_slice %15 {offsets = [0, 16], sizes = [1, 16], strides = [1, 1]} : vector<1x128xf32> to vector<1x16xf32>
    %18 = vector.extract_strided_slice %15 {offsets = [0, 32], sizes = [1, 16], strides = [1, 1]} : vector<1x128xf32> to vector<1x16xf32>
    %19 = vector.extract_strided_slice %15 {offsets = [0, 48], sizes = [1, 16], strides = [1, 1]} : vector<1x128xf32> to vector<1x16xf32>
    %20 = vector.extract_strided_slice %15 {offsets = [0, 64], sizes = [1, 16], strides = [1, 1]} : vector<1x128xf32> to vector<1x16xf32>
    %21 = vector.extract_strided_slice %15 {offsets = [0, 80], sizes = [1, 16], strides = [1, 1]} : vector<1x128xf32> to vector<1x16xf32>
    %22 = vector.extract_strided_slice %0 {offsets = [2, 0], sizes = [1, 64], strides = [1, 1]} : vector<11x128xf32> to vector<1x64xf32>
    %cst_10 = arith.constant dense<0.000000e+00> : vector<34xf32>
    %23 = vector.multi_reduction <add>, %8, %cst_10 [1] : vector<34x16xf32> to vector<34xf32>
    %24 = vector.shape_cast %23 : vector<34xf32> to vector<34x1xf32>
    %cst_11 = arith.constant 1.600000e+01 : f32
    %25 = vector.broadcast %cst_11 : f32 to vector<34x1xf32>
    %26 = arith.divf %24, %25 : vector<34x1xf32>
    %27 = vector.broadcast %26 : vector<34x1xf32> to vector<34x16xf32>
    %28 = arith.subf %8, %27 : vector<34x16xf32>
    %29 = arith.mulf %28, %28 : vector<34x16xf32>
    %cst_12 = arith.constant dense<0.000000e+00> : vector<34xf32>
    %30 = vector.multi_reduction <add>, %29, %cst_12 [1] : vector<34x16xf32> to vector<34xf32>
    %31 = vector.shape_cast %30 : vector<34xf32> to vector<34x1xf32>
    %cst_13 = arith.constant 1.600000e+01 : f32
    %32 = vector.broadcast %cst_13 : f32 to vector<34x1xf32>
    %33 = arith.divf %31, %32 : vector<34x1xf32>
    %34 = vector.broadcast %26 : vector<34x1xf32> to vector<34x16xf32>
    %35 = arith.subf %8, %34 : vector<34x16xf32>
    %cst_14 = arith.constant 9.99999997E-7 : f32
    %36 = vector.broadcast %cst_14 : f32 to vector<34x1xf32>
    %37 = arith.addf %33, %36 : vector<34x1xf32>
    %38 = math.rsqrt %37 : vector<34x1xf32>
    %39 = vector.broadcast %38 : vector<34x1xf32> to vector<34x16xf32>
    %40 = arith.mulf %35, %39 : vector<34x16xf32>
    %41 = vector.broadcast %16 : vector<1x16xf32> to vector<34x16xf32>
    %42 = arith.mulf %40, %41 : vector<34x16xf32>
    %43 = vector.broadcast %17 : vector<1x16xf32> to vector<34x16xf32>
    %44 = arith.addf %42, %43 : vector<34x16xf32>
    %45 = arith.truncf %44 : vector<34x16xf32> to vector<34x16xbf16>
    %cst_15 = arith.constant dense<0.000000e+00> : vector<34x128xf32>
    %46 = tpu.matmul %45, %11, %cst_15 {dimension_numbers = #tpu.dot_dimension_numbers<[1], [0], [0], [1], [0, 0, 1, 1], [], []>} : vector<34x16xbf16>, vector<16x128xbf16>, vector<34x128xf32> -> vector<34x128xf32>
    %47 = vector.broadcast %14 : vector<1x128xf32> to vector<34x128xf32>
    %48 = arith.addf %46, %47 : vector<34x128xf32>
    %49 = arith.truncf %48 : vector<34x128xf32> to vector<34x128xbf16>
    %50 = vector.extract_strided_slice %49 {offsets = [0, 0], sizes = [34, 8], strides = [1, 1]} : vector<34x128xbf16> to vector<34x8xbf16>
    %51 = vector.extract_strided_slice %49 {offsets = [0, 32], sizes = [34, 8], strides = [1, 1]} : vector<34x128xbf16> to vector<34x8xbf16>
    %52 = vector.extract_strided_slice %49 {offsets = [0, 64], sizes = [34, 16], strides = [1, 1]} : vector<34x128xbf16> to vector<34x16xbf16>
    %cst_16 = arith.constant dense<0.000000e+00> : vector<34x34xf32>
    %53 = tpu.matmul %50, %51, %cst_16 {dimension_numbers = #tpu.dot_dimension_numbers<[1], [1], [0], [0], [0, 0, 1, 0], [], []>} : vector<34x8xbf16>, vector<34x8xbf16>, vector<34x34xf32> -> vector<34x34xf32>
    %54 = arith.addf %53, %2 : vector<34x34xf32>
    %cst_17 = arith.constant dense<0xFF800000> : vector<34xf32>
    %55 = vector.multi_reduction <maximumf>, %54, %cst_17 [1] : vector<34x34xf32> to vector<34xf32>
    %56 = vector.shape_cast %55 : vector<34xf32> to vector<34x1xf32>
    %57 = vector.broadcast %56 : vector<34x1xf32> to vector<34x34xf32>
    %58 = arith.subf %54, %57 : vector<34x34xf32>
    %59 = math.exp %58 : vector<34x34xf32>
    %cst_18 = arith.constant dense<0.000000e+00> : vector<34xf32>
    %60 = vector.multi_reduction <add>, %59, %cst_18 [1] : vector<34x34xf32> to vector<34xf32>
    %61 = vector.shape_cast %60 : vector<34xf32> to vector<34x1xf32>
    %62 = tpu.reciprocal %61 {approx = true} : vector<34x1xf32> -> vector<34x1xf32>
    %63 = vector.broadcast %62 : vector<34x1xf32> to vector<34x34xf32>
    %64 = arith.mulf %59, %63 : vector<34x34xf32>
    %65 = arith.truncf %64 : vector<34x34xf32> to vector<34x34xbf16>
    %cst_19 = arith.constant dense<0.000000e+00> : vector<34x16xf32>
    %66 = tpu.matmul %65, %52, %cst_19 {dimension_numbers = #tpu.dot_dimension_numbers<[1], [0], [0], [1], [0, 0, 1, 1], [], []>} : vector<34x34xbf16>, vector<34x16xbf16>, vector<34x16xf32> -> vector<34x16xf32>
    %67 = vector.extract_strided_slice %49 {offsets = [0, 8], sizes = [34, 8], strides = [1, 1]} : vector<34x128xbf16> to vector<34x8xbf16>
    %68 = vector.extract_strided_slice %49 {offsets = [0, 40], sizes = [34, 8], strides = [1, 1]} : vector<34x128xbf16> to vector<34x8xbf16>
    %69 = vector.extract_strided_slice %49 {offsets = [0, 80], sizes = [34, 16], strides = [1, 1]} : vector<34x128xbf16> to vector<34x16xbf16>
    %cst_20 = arith.constant dense<0.000000e+00> : vector<34x34xf32>
    %70 = tpu.matmul %67, %68, %cst_20 {dimension_numbers = #tpu.dot_dimension_numbers<[1], [1], [0], [0], [0, 0, 1, 0], [], []>} : vector<34x8xbf16>, vector<34x8xbf16>, vector<34x34xf32> -> vector<34x34xf32>
    %71 = arith.addf %70, %2 : vector<34x34xf32>
    %cst_21 = arith.constant dense<0xFF800000> : vector<34xf32>
    %72 = vector.multi_reduction <maximumf>, %71, %cst_21 [1] : vector<34x34xf32> to vector<34xf32>
    %73 = vector.shape_cast %72 : vector<34xf32> to vector<34x1xf32>
    %74 = vector.broadcast %73 : vector<34x1xf32> to vector<34x34xf32>
    %75 = arith.subf %71, %74 : vector<34x34xf32>
    %76 = math.exp %75 : vector<34x34xf32>
    %cst_22 = arith.constant dense<0.000000e+00> : vector<34xf32>
    %77 = vector.multi_reduction <add>, %76, %cst_22 [1] : vector<34x34xf32> to vector<34xf32>
    %78 = vector.shape_cast %77 : vector<34xf32> to vector<34x1xf32>
    %79 = tpu.reciprocal %78 {approx = true} : vector<34x1xf32> -> vector<34x1xf32>
    %80 = vector.broadcast %79 : vector<34x1xf32> to vector<34x34xf32>
    %81 = arith.mulf %76, %80 : vector<34x34xf32>
    %82 = arith.truncf %81 : vector<34x34xf32> to vector<34x34xbf16>
    %cst_23 = arith.constant dense<0.000000e+00> : vector<34x16xf32>
    %83 = tpu.matmul %82, %69, %cst_23 {dimension_numbers = #tpu.dot_dimension_numbers<[1], [0], [0], [1], [0, 0, 1, 1], [], []>} : vector<34x34xbf16>, vector<34x16xbf16>, vector<34x16xf32> -> vector<34x16xf32>
    %84 = arith.addf %66, %83 : vector<34x16xf32>
    %85 = vector.extract_strided_slice %49 {offsets = [0, 16], sizes = [34, 8], strides = [1, 1]} : vector<34x128xbf16> to vector<34x8xbf16>
    %86 = vector.extract_strided_slice %49 {offsets = [0, 48], sizes = [34, 8], strides = [1, 1]} : vector<34x128xbf16> to vector<34x8xbf16>
    %87 = vector.extract_strided_slice %49 {offsets = [0, 96], sizes = [34, 16], strides = [1, 1]} : vector<34x128xbf16> to vector<34x16xbf16>
    %cst_24 = arith.constant dense<0.000000e+00> : vector<34x34xf32>
    %88 = tpu.matmul %85, %86, %cst_24 {dimension_numbers = #tpu.dot_dimension_numbers<[1], [1], [0], [0], [0, 0, 1, 0], [], []>} : vector<34x8xbf16>, vector<34x8xbf16>, vector<34x34xf32> -> vector<34x34xf32>
    %89 = arith.addf %88, %2 : vector<34x34xf32>
    %cst_25 = arith.constant dense<0xFF800000> : vector<34xf32>
    %90 = vector.multi_reduction <maximumf>, %89, %cst_25 [1] : vector<34x34xf32> to vector<34xf32>
    %91 = vector.shape_cast %90 : vector<34xf32> to vector<34x1xf32>
    %92 = vector.broadcast %91 : vector<34x1xf32> to vector<34x34xf32>
    %93 = arith.subf %89, %92 : vector<34x34xf32>
    %94 = math.exp %93 : vector<34x34xf32>
    %cst_26 = arith.constant dense<0.000000e+00> : vector<34xf32>
    %95 = vector.multi_reduction <add>, %94, %cst_26 [1] : vector<34x34xf32> to vector<34xf32>
    %96 = vector.shape_cast %95 : vector<34xf32> to vector<34x1xf32>
    %97 = tpu.reciprocal %96 {approx = true} : vector<34x1xf32> -> vector<34x1xf32>
    %98 = vector.broadcast %97 : vector<34x1xf32> to vector<34x34xf32>
    %99 = arith.mulf %94, %98 : vector<34x34xf32>
    %100 = arith.truncf %99 : vector<34x34xf32> to vector<34x34xbf16>
    %cst_27 = arith.constant dense<0.000000e+00> : vector<34x16xf32>
    %101 = tpu.matmul %100, %87, %cst_27 {dimension_numbers = #tpu.dot_dimension_numbers<[1], [0], [0], [1], [0, 0, 1, 1], [], []>} : vector<34x34xbf16>, vector<34x16xbf16>, vector<34x16xf32> -> vector<34x16xf32>
    %102 = arith.addf %84, %101 : vector<34x16xf32>
    %103 = vector.extract_strided_slice %49 {offsets = [0, 24], sizes = [34, 8], strides = [1, 1]} : vector<34x128xbf16> to vector<34x8xbf16>
    %104 = vector.extract_strided_slice %49 {offsets = [0, 56], sizes = [34, 8], strides = [1, 1]} : vector<34x128xbf16> to vector<34x8xbf16>
    %105 = vector.extract_strided_slice %49 {offsets = [0, 112], sizes = [34, 16], strides = [1, 1]} : vector<34x128xbf16> to vector<34x16xbf16>
    %cst_28 = arith.constant dense<0.000000e+00> : vector<34x34xf32>
    %106 = tpu.matmul %103, %104, %cst_28 {dimension_numbers = #tpu.dot_dimension_numbers<[1], [1], [0], [0], [0, 0, 1, 0], [], []>} : vector<34x8xbf16>, vector<34x8xbf16>, vector<34x34xf32> -> vector<34x34xf32>
    %107 = arith.addf %106, %2 : vector<34x34xf32>
    %cst_29 = arith.constant dense<0xFF800000> : vector<34xf32>
    %108 = vector.multi_reduction <maximumf>, %107, %cst_29 [1] : vector<34x34xf32> to vector<34xf32>
    %109 = vector.shape_cast %108 : vector<34xf32> to vector<34x1xf32>
    %110 = vector.broadcast %109 : vector<34x1xf32> to vector<34x34xf32>
    %111 = arith.subf %107, %110 : vector<34x34xf32>
    %112 = math.exp %111 : vector<34x34xf32>
    %cst_30 = arith.constant dense<0.000000e+00> : vector<34xf32>
    %113 = vector.multi_reduction <add>, %112, %cst_30 [1] : vector<34x34xf32> to vector<34xf32>
    %114 = vector.shape_cast %113 : vector<34xf32> to vector<34x1xf32>
    %115 = tpu.reciprocal %114 {approx = true} : vector<34x1xf32> -> vector<34x1xf32>
    %116 = vector.broadcast %115 : vector<34x1xf32> to vector<34x34xf32>
    %117 = arith.mulf %112, %116 : vector<34x34xf32>
    %118 = arith.truncf %117 : vector<34x34xf32> to vector<34x34xbf16>
    %cst_31 = arith.constant dense<0.000000e+00> : vector<34x16xf32>
    %119 = tpu.matmul %118, %105, %cst_31 {dimension_numbers = #tpu.dot_dimension_numbers<[1], [0], [0], [1], [0, 0, 1, 1], [], []>} : vector<34x34xbf16>, vector<34x16xbf16>, vector<34x16xf32> -> vector<34x16xf32>
    %120 = arith.addf %102, %119 : vector<34x16xf32>
    %121 = arith.addf %8, %120 : vector<34x16xf32>
    %122 = vector.broadcast %20 : vector<1x16xf32> to vector<34x16xf32>
    %123 = arith.addf %121, %122 : vector<34x16xf32>
    %cst_32 = arith.constant dense<0.000000e+00> : vector<34xf32>
    %124 = vector.multi_reduction <add>, %123, %cst_32 [1] : vector<34x16xf32> to vector<34xf32>
    %125 = vector.shape_cast %124 : vector<34xf32> to vector<34x1xf32>
    %cst_33 = arith.constant 1.600000e+01 : f32
    %126 = vector.broadcast %cst_33 : f32 to vector<34x1xf32>
    %127 = arith.divf %125, %126 : vector<34x1xf32>
    %128 = vector.broadcast %127 : vector<34x1xf32> to vector<34x16xf32>
    %129 = arith.subf %123, %128 : vector<34x16xf32>
    %130 = arith.mulf %129, %129 : vector<34x16xf32>
    %cst_34 = arith.constant dense<0.000000e+00> : vector<34xf32>
    %131 = vector.multi_reduction <add>, %130, %cst_34 [1] : vector<34x16xf32> to vector<34xf32>
    %132 = vector.shape_cast %131 : vector<34xf32> to vector<34x1xf32>
    %cst_35 = arith.constant 1.600000e+01 : f32
    %133 = vector.broadcast %cst_35 : f32 to vector<34x1xf32>
    %134 = arith.divf %132, %133 : vector<34x1xf32>
    %135 = vector.broadcast %127 : vector<34x1xf32> to vector<34x16xf32>
    %136 = arith.subf %123, %135 : vector<34x16xf32>
    %cst_36 = arith.constant 9.99999997E-7 : f32
    %137 = vector.broadcast %cst_36 : f32 to vector<34x1xf32>
    %138 = arith.addf %134, %137 : vector<34x1xf32>
    %139 = math.rsqrt %138 : vector<34x1xf32>
    %140 = vector.broadcast %139 : vector<34x1xf32> to vector<34x16xf32>
    %141 = arith.mulf %136, %140 : vector<34x16xf32>
    %142 = vector.broadcast %18 : vector<1x16xf32> to vector<34x16xf32>
    %143 = arith.mulf %141, %142 : vector<34x16xf32>
    %144 = vector.broadcast %19 : vector<1x16xf32> to vector<34x16xf32>
    %145 = arith.addf %143, %144 : vector<34x16xf32>
    %146 = arith.truncf %145 : vector<34x16xf32> to vector<34x16xbf16>
    %cst_37 = arith.constant dense<0.000000e+00> : vector<34x64xf32>
    %147 = tpu.matmul %146, %12, %cst_37 {dimension_numbers = #tpu.dot_dimension_numbers<[1], [0], [0], [1], [0, 0, 1, 1], [], []>} : vector<34x16xbf16>, vector<16x64xbf16>, vector<34x64xf32> -> vector<34x64xf32>
    %148 = vector.broadcast %22 : vector<1x64xf32> to vector<34x64xf32>
    %149 = arith.addf %147, %148 : vector<34x64xf32>
    %cst_38 = arith.constant 5.000000e-01 : f32
    %150 = vector.broadcast %cst_38 : f32 to vector<34x64xf32>
    %151 = arith.mulf %150, %149 : vector<34x64xf32>
    %cst_39 = arith.constant 0.707106769 : f32
    %152 = vector.broadcast %cst_39 : f32 to vector<34x64xf32>
    %153 = arith.mulf %149, %152 : vector<34x64xf32>
    %cst_40 = arith.constant -4.000000e+00 : f32
    %cst_41 = arith.constant 4.000000e+00 : f32
    %154 = vector.broadcast %cst_40 : f32 to vector<34x64xf32>
    %155 = arith.maximumf %154, %153 : vector<34x64xf32>
    %156 = vector.broadcast %cst_41 : f32 to vector<34x64xf32>
    %157 = arith.minimumf %156, %155 : vector<34x64xf32>
    %158 = arith.mulf %157, %157 : vector<34x64xf32>
    %cst_42 = arith.constant -2.72614237E-10 : f32
    %159 = vector.broadcast %cst_42 : f32 to vector<34x64xf32>
    %160 = arith.mulf %159, %158 : vector<34x64xf32>
    %cst_43 = arith.constant 2.77068146E-8 : f32
    %161 = vector.broadcast %cst_43 : f32 to vector<34x64xf32>
    %162 = arith.addf %160, %161 : vector<34x64xf32>
    %163 = arith.mulf %162, %158 : vector<34x64xf32>
    %cst_44 = arith.constant -2.10102394E-6 : f32
    %164 = vector.broadcast %cst_44 : f32 to vector<34x64xf32>
    %165 = arith.addf %163, %164 : vector<34x64xf32>
    %166 = arith.mulf %165, %158 : vector<34x64xf32>
    %cst_45 = arith.constant -5.69250624E-5 : f32
    %167 = vector.broadcast %cst_45 : f32 to vector<34x64xf32>
    %168 = arith.addf %166, %167 : vector<34x64xf32>
    %169 = arith.mulf %168, %158 : vector<34x64xf32>
    %cst_46 = arith.constant -7.34990637E-4 : f32
    %170 = vector.broadcast %cst_46 : f32 to vector<34x64xf32>
    %171 = arith.addf %169, %170 : vector<34x64xf32>
    %172 = arith.mulf %171, %158 : vector<34x64xf32>
    %cst_47 = arith.constant -2.954600e-03 : f32
    %173 = vector.broadcast %cst_47 : f32 to vector<34x64xf32>
    %174 = arith.addf %172, %173 : vector<34x64xf32>
    %175 = arith.mulf %174, %158 : vector<34x64xf32>
    %cst_48 = arith.constant -0.0160960332 : f32
    %176 = vector.broadcast %cst_48 : f32 to vector<34x64xf32>
    %177 = arith.addf %175, %176 : vector<34x64xf32>
    %cst_49 = arith.constant -1.45660715E-5 : f32
    %178 = vector.broadcast %cst_49 : f32 to vector<34x64xf32>
    %179 = arith.mulf %178, %158 : vector<34x64xf32>
    %cst_50 = arith.constant -2.13374049E-4 : f32
    %180 = vector.broadcast %cst_50 : f32 to vector<34x64xf32>
    %181 = arith.addf %179, %180 : vector<34x64xf32>
    %182 = arith.mulf %181, %158 : vector<34x64xf32>
    %cst_51 = arith.constant -0.00168282702 : f32
    %183 = vector.broadcast %cst_51 : f32 to vector<34x64xf32>
    %184 = arith.addf %182, %183 : vector<34x64xf32>
    %185 = arith.mulf %184, %158 : vector<34x64xf32>
    %cst_52 = arith.constant -0.00737332925 : f32
    %186 = vector.broadcast %cst_52 : f32 to vector<34x64xf32>
    %187 = arith.addf %185, %186 : vector<34x64xf32>
    %188 = arith.mulf %187, %158 : vector<34x64xf32>
    %cst_53 = arith.constant -0.0142647391 : f32
    %189 = vector.broadcast %cst_53 : f32 to vector<34x64xf32>
    %190 = arith.addf %188, %189 : vector<34x64xf32>
    %191 = arith.mulf %157, %177 : vector<34x64xf32>
    %192 = arith.divf %191, %190 : vector<34x64xf32>
    %cst_54 = arith.constant 1.000000e+00 : f32
    %193 = vector.broadcast %cst_54 : f32 to vector<34x64xf32>
    %194 = arith.addf %193, %192 : vector<34x64xf32>
    %195 = arith.mulf %151, %194 : vector<34x64xf32>
    %196 = arith.truncf %195 : vector<34x64xf32> to vector<34x64xbf16>
    %cst_55 = arith.constant dense<0.000000e+00> : vector<34x16xf32>
    %197 = tpu.matmul %196, %13, %cst_55 {dimension_numbers = #tpu.dot_dimension_numbers<[1], [0], [0], [1], [0, 0, 1, 1], [], []>} : vector<34x64xbf16>, vector<64x16xbf16>, vector<34x16xf32> -> vector<34x16xf32>
    %198 = vector.broadcast %21 : vector<1x16xf32> to vector<34x16xf32>
    %199 = arith.addf %197, %198 : vector<34x16xf32>
    %200 = arith.addf %123, %199 : vector<34x16xf32>
    %c1 = arith.constant 1 : index
    %c0_56 = arith.constant 0 : index
    %c0_57 = arith.constant 0 : index
    %201 = vector.load %arg3[%c1, %c0_56, %c0_57] : memref<3x96x128xbf16, #tpu.memory_space<vmem>>, vector<1x96x128xbf16>
    %202 = vector.shape_cast %201 : vector<1x96x128xbf16> to vector<96x128xbf16>
    %203 = vector.extract_strided_slice %202 {offsets = [0, 0], sizes = [16, 128], strides = [1, 1]} : vector<96x128xbf16> to vector<16x128xbf16>
    %204 = vector.extract_strided_slice %202 {offsets = [16, 0], sizes = [16, 64], strides = [1, 1]} : vector<96x128xbf16> to vector<16x64xbf16>
    %205 = vector.extract_strided_slice %202 {offsets = [32, 0], sizes = [64, 16], strides = [1, 1]} : vector<96x128xbf16> to vector<64x16xbf16>
    %206 = vector.extract_strided_slice %0 {offsets = [3, 0], sizes = [1, 128], strides = [1, 1]} : vector<11x128xf32> to vector<1x128xf32>
    %207 = vector.extract_strided_slice %0 {offsets = [4, 0], sizes = [1, 128], strides = [1, 1]} : vector<11x128xf32> to vector<1x128xf32>
    %208 = vector.extract_strided_slice %207 {offsets = [0, 0], sizes = [1, 16], strides = [1, 1]} : vector<1x128xf32> to vector<1x16xf32>
    %209 = vector.extract_strided_slice %207 {offsets = [0, 16], sizes = [1, 16], strides = [1, 1]} : vector<1x128xf32> to vector<1x16xf32>
    %210 = vector.extract_strided_slice %207 {offsets = [0, 32], sizes = [1, 16], strides = [1, 1]} : vector<1x128xf32> to vector<1x16xf32>
    %211 = vector.extract_strided_slice %207 {offsets = [0, 48], sizes = [1, 16], strides = [1, 1]} : vector<1x128xf32> to vector<1x16xf32>
    %212 = vector.extract_strided_slice %207 {offsets = [0, 64], sizes = [1, 16], strides = [1, 1]} : vector<1x128xf32> to vector<1x16xf32>
    %213 = vector.extract_strided_slice %207 {offsets = [0, 80], sizes = [1, 16], strides = [1, 1]} : vector<1x128xf32> to vector<1x16xf32>
    %214 = vector.extract_strided_slice %0 {offsets = [5, 0], sizes = [1, 64], strides = [1, 1]} : vector<11x128xf32> to vector<1x64xf32>
    %cst_58 = arith.constant dense<0.000000e+00> : vector<34xf32>
    %215 = vector.multi_reduction <add>, %200, %cst_58 [1] : vector<34x16xf32> to vector<34xf32>
    %216 = vector.shape_cast %215 : vector<34xf32> to vector<34x1xf32>
    %cst_59 = arith.constant 1.600000e+01 : f32
    %217 = vector.broadcast %cst_59 : f32 to vector<34x1xf32>
    %218 = arith.divf %216, %217 : vector<34x1xf32>
    %219 = vector.broadcast %218 : vector<34x1xf32> to vector<34x16xf32>
    %220 = arith.subf %200, %219 : vector<34x16xf32>
    %221 = arith.mulf %220, %220 : vector<34x16xf32>
    %cst_60 = arith.constant dense<0.000000e+00> : vector<34xf32>
    %222 = vector.multi_reduction <add>, %221, %cst_60 [1] : vector<34x16xf32> to vector<34xf32>
    %223 = vector.shape_cast %222 : vector<34xf32> to vector<34x1xf32>
    %cst_61 = arith.constant 1.600000e+01 : f32
    %224 = vector.broadcast %cst_61 : f32 to vector<34x1xf32>
    %225 = arith.divf %223, %224 : vector<34x1xf32>
    %226 = vector.broadcast %218 : vector<34x1xf32> to vector<34x16xf32>
    %227 = arith.subf %200, %226 : vector<34x16xf32>
    %cst_62 = arith.constant 9.99999997E-7 : f32
    %228 = vector.broadcast %cst_62 : f32 to vector<34x1xf32>
    %229 = arith.addf %225, %228 : vector<34x1xf32>
    %230 = math.rsqrt %229 : vector<34x1xf32>
    %231 = vector.broadcast %230 : vector<34x1xf32> to vector<34x16xf32>
    %232 = arith.mulf %227, %231 : vector<34x16xf32>
    %233 = vector.broadcast %208 : vector<1x16xf32> to vector<34x16xf32>
    %234 = arith.mulf %232, %233 : vector<34x16xf32>
    %235 = vector.broadcast %209 : vector<1x16xf32> to vector<34x16xf32>
    %236 = arith.addf %234, %235 : vector<34x16xf32>
    %237 = arith.truncf %236 : vector<34x16xf32> to vector<34x16xbf16>
    %cst_63 = arith.constant dense<0.000000e+00> : vector<34x128xf32>
    %238 = tpu.matmul %237, %203, %cst_63 {dimension_numbers = #tpu.dot_dimension_numbers<[1], [0], [0], [1], [0, 0, 1, 1], [], []>} : vector<34x16xbf16>, vector<16x128xbf16>, vector<34x128xf32> -> vector<34x128xf32>
    %239 = vector.broadcast %206 : vector<1x128xf32> to vector<34x128xf32>
    %240 = arith.addf %238, %239 : vector<34x128xf32>
    %241 = arith.truncf %240 : vector<34x128xf32> to vector<34x128xbf16>
    %242 = vector.extract_strided_slice %241 {offsets = [0, 0], sizes = [34, 8], strides = [1, 1]} : vector<34x128xbf16> to vector<34x8xbf16>
    %243 = vector.extract_strided_slice %241 {offsets = [0, 32], sizes = [34, 8], strides = [1, 1]} : vector<34x128xbf16> to vector<34x8xbf16>
    %244 = vector.extract_strided_slice %241 {offsets = [0, 64], sizes = [34, 16], strides = [1, 1]} : vector<34x128xbf16> to vector<34x16xbf16>
    %cst_64 = arith.constant dense<0.000000e+00> : vector<34x34xf32>
    %245 = tpu.matmul %242, %243, %cst_64 {dimension_numbers = #tpu.dot_dimension_numbers<[1], [1], [0], [0], [0, 0, 1, 0], [], []>} : vector<34x8xbf16>, vector<34x8xbf16>, vector<34x34xf32> -> vector<34x34xf32>
    %246 = arith.addf %245, %2 : vector<34x34xf32>
    %cst_65 = arith.constant dense<0xFF800000> : vector<34xf32>
    %247 = vector.multi_reduction <maximumf>, %246, %cst_65 [1] : vector<34x34xf32> to vector<34xf32>
    %248 = vector.shape_cast %247 : vector<34xf32> to vector<34x1xf32>
    %249 = vector.broadcast %248 : vector<34x1xf32> to vector<34x34xf32>
    %250 = arith.subf %246, %249 : vector<34x34xf32>
    %251 = math.exp %250 : vector<34x34xf32>
    %cst_66 = arith.constant dense<0.000000e+00> : vector<34xf32>
    %252 = vector.multi_reduction <add>, %251, %cst_66 [1] : vector<34x34xf32> to vector<34xf32>
    %253 = vector.shape_cast %252 : vector<34xf32> to vector<34x1xf32>
    %254 = tpu.reciprocal %253 {approx = true} : vector<34x1xf32> -> vector<34x1xf32>
    %255 = vector.broadcast %254 : vector<34x1xf32> to vector<34x34xf32>
    %256 = arith.mulf %251, %255 : vector<34x34xf32>
    %257 = arith.truncf %256 : vector<34x34xf32> to vector<34x34xbf16>
    %cst_67 = arith.constant dense<0.000000e+00> : vector<34x16xf32>
    %258 = tpu.matmul %257, %244, %cst_67 {dimension_numbers = #tpu.dot_dimension_numbers<[1], [0], [0], [1], [0, 0, 1, 1], [], []>} : vector<34x34xbf16>, vector<34x16xbf16>, vector<34x16xf32> -> vector<34x16xf32>
    %259 = vector.extract_strided_slice %241 {offsets = [0, 8], sizes = [34, 8], strides = [1, 1]} : vector<34x128xbf16> to vector<34x8xbf16>
    %260 = vector.extract_strided_slice %241 {offsets = [0, 40], sizes = [34, 8], strides = [1, 1]} : vector<34x128xbf16> to vector<34x8xbf16>
    %261 = vector.extract_strided_slice %241 {offsets = [0, 80], sizes = [34, 16], strides = [1, 1]} : vector<34x128xbf16> to vector<34x16xbf16>
    %cst_68 = arith.constant dense<0.000000e+00> : vector<34x34xf32>
    %262 = tpu.matmul %259, %260, %cst_68 {dimension_numbers = #tpu.dot_dimension_numbers<[1], [1], [0], [0], [0, 0, 1, 0], [], []>} : vector<34x8xbf16>, vector<34x8xbf16>, vector<34x34xf32> -> vector<34x34xf32>
    %263 = arith.addf %262, %2 : vector<34x34xf32>
    %cst_69 = arith.constant dense<0xFF800000> : vector<34xf32>
    %264 = vector.multi_reduction <maximumf>, %263, %cst_69 [1] : vector<34x34xf32> to vector<34xf32>
    %265 = vector.shape_cast %264 : vector<34xf32> to vector<34x1xf32>
    %266 = vector.broadcast %265 : vector<34x1xf32> to vector<34x34xf32>
    %267 = arith.subf %263, %266 : vector<34x34xf32>
    %268 = math.exp %267 : vector<34x34xf32>
    %cst_70 = arith.constant dense<0.000000e+00> : vector<34xf32>
    %269 = vector.multi_reduction <add>, %268, %cst_70 [1] : vector<34x34xf32> to vector<34xf32>
    %270 = vector.shape_cast %269 : vector<34xf32> to vector<34x1xf32>
    %271 = tpu.reciprocal %270 {approx = true} : vector<34x1xf32> -> vector<34x1xf32>
    %272 = vector.broadcast %271 : vector<34x1xf32> to vector<34x34xf32>
    %273 = arith.mulf %268, %272 : vector<34x34xf32>
    %274 = arith.truncf %273 : vector<34x34xf32> to vector<34x34xbf16>
    %cst_71 = arith.constant dense<0.000000e+00> : vector<34x16xf32>
    %275 = tpu.matmul %274, %261, %cst_71 {dimension_numbers = #tpu.dot_dimension_numbers<[1], [0], [0], [1], [0, 0, 1, 1], [], []>} : vector<34x34xbf16>, vector<34x16xbf16>, vector<34x16xf32> -> vector<34x16xf32>
    %276 = arith.addf %258, %275 : vector<34x16xf32>
    %277 = vector.extract_strided_slice %241 {offsets = [0, 16], sizes = [34, 8], strides = [1, 1]} : vector<34x128xbf16> to vector<34x8xbf16>
    %278 = vector.extract_strided_slice %241 {offsets = [0, 48], sizes = [34, 8], strides = [1, 1]} : vector<34x128xbf16> to vector<34x8xbf16>
    %279 = vector.extract_strided_slice %241 {offsets = [0, 96], sizes = [34, 16], strides = [1, 1]} : vector<34x128xbf16> to vector<34x16xbf16>
    %cst_72 = arith.constant dense<0.000000e+00> : vector<34x34xf32>
    %280 = tpu.matmul %277, %278, %cst_72 {dimension_numbers = #tpu.dot_dimension_numbers<[1], [1], [0], [0], [0, 0, 1, 0], [], []>} : vector<34x8xbf16>, vector<34x8xbf16>, vector<34x34xf32> -> vector<34x34xf32>
    %281 = arith.addf %280, %2 : vector<34x34xf32>
    %cst_73 = arith.constant dense<0xFF800000> : vector<34xf32>
    %282 = vector.multi_reduction <maximumf>, %281, %cst_73 [1] : vector<34x34xf32> to vector<34xf32>
    %283 = vector.shape_cast %282 : vector<34xf32> to vector<34x1xf32>
    %284 = vector.broadcast %283 : vector<34x1xf32> to vector<34x34xf32>
    %285 = arith.subf %281, %284 : vector<34x34xf32>
    %286 = math.exp %285 : vector<34x34xf32>
    %cst_74 = arith.constant dense<0.000000e+00> : vector<34xf32>
    %287 = vector.multi_reduction <add>, %286, %cst_74 [1] : vector<34x34xf32> to vector<34xf32>
    %288 = vector.shape_cast %287 : vector<34xf32> to vector<34x1xf32>
    %289 = tpu.reciprocal %288 {approx = true} : vector<34x1xf32> -> vector<34x1xf32>
    %290 = vector.broadcast %289 : vector<34x1xf32> to vector<34x34xf32>
    %291 = arith.mulf %286, %290 : vector<34x34xf32>
    %292 = arith.truncf %291 : vector<34x34xf32> to vector<34x34xbf16>
    %cst_75 = arith.constant dense<0.000000e+00> : vector<34x16xf32>
    %293 = tpu.matmul %292, %279, %cst_75 {dimension_numbers = #tpu.dot_dimension_numbers<[1], [0], [0], [1], [0, 0, 1, 1], [], []>} : vector<34x34xbf16>, vector<34x16xbf16>, vector<34x16xf32> -> vector<34x16xf32>
    %294 = arith.addf %276, %293 : vector<34x16xf32>
    %295 = vector.extract_strided_slice %241 {offsets = [0, 24], sizes = [34, 8], strides = [1, 1]} : vector<34x128xbf16> to vector<34x8xbf16>
    %296 = vector.extract_strided_slice %241 {offsets = [0, 56], sizes = [34, 8], strides = [1, 1]} : vector<34x128xbf16> to vector<34x8xbf16>
    %297 = vector.extract_strided_slice %241 {offsets = [0, 112], sizes = [34, 16], strides = [1, 1]} : vector<34x128xbf16> to vector<34x16xbf16>
    %cst_76 = arith.constant dense<0.000000e+00> : vector<34x34xf32>
    %298 = tpu.matmul %295, %296, %cst_76 {dimension_numbers = #tpu.dot_dimension_numbers<[1], [1], [0], [0], [0, 0, 1, 0], [], []>} : vector<34x8xbf16>, vector<34x8xbf16>, vector<34x34xf32> -> vector<34x34xf32>
    %299 = arith.addf %298, %2 : vector<34x34xf32>
    %cst_77 = arith.constant dense<0xFF800000> : vector<34xf32>
    %300 = vector.multi_reduction <maximumf>, %299, %cst_77 [1] : vector<34x34xf32> to vector<34xf32>
    %301 = vector.shape_cast %300 : vector<34xf32> to vector<34x1xf32>
    %302 = vector.broadcast %301 : vector<34x1xf32> to vector<34x34xf32>
    %303 = arith.subf %299, %302 : vector<34x34xf32>
    %304 = math.exp %303 : vector<34x34xf32>
    %cst_78 = arith.constant dense<0.000000e+00> : vector<34xf32>
    %305 = vector.multi_reduction <add>, %304, %cst_78 [1] : vector<34x34xf32> to vector<34xf32>
    %306 = vector.shape_cast %305 : vector<34xf32> to vector<34x1xf32>
    %307 = tpu.reciprocal %306 {approx = true} : vector<34x1xf32> -> vector<34x1xf32>
    %308 = vector.broadcast %307 : vector<34x1xf32> to vector<34x34xf32>
    %309 = arith.mulf %304, %308 : vector<34x34xf32>
    %310 = arith.truncf %309 : vector<34x34xf32> to vector<34x34xbf16>
    %cst_79 = arith.constant dense<0.000000e+00> : vector<34x16xf32>
    %311 = tpu.matmul %310, %297, %cst_79 {dimension_numbers = #tpu.dot_dimension_numbers<[1], [0], [0], [1], [0, 0, 1, 1], [], []>} : vector<34x34xbf16>, vector<34x16xbf16>, vector<34x16xf32> -> vector<34x16xf32>
    %312 = arith.addf %294, %311 : vector<34x16xf32>
    %313 = arith.addf %200, %312 : vector<34x16xf32>
    %314 = vector.broadcast %212 : vector<1x16xf32> to vector<34x16xf32>
    %315 = arith.addf %313, %314 : vector<34x16xf32>
    %cst_80 = arith.constant dense<0.000000e+00> : vector<34xf32>
    %316 = vector.multi_reduction <add>, %315, %cst_80 [1] : vector<34x16xf32> to vector<34xf32>
    %317 = vector.shape_cast %316 : vector<34xf32> to vector<34x1xf32>
    %cst_81 = arith.constant 1.600000e+01 : f32
    %318 = vector.broadcast %cst_81 : f32 to vector<34x1xf32>
    %319 = arith.divf %317, %318 : vector<34x1xf32>
    %320 = vector.broadcast %319 : vector<34x1xf32> to vector<34x16xf32>
    %321 = arith.subf %315, %320 : vector<34x16xf32>
    %322 = arith.mulf %321, %321 : vector<34x16xf32>
    %cst_82 = arith.constant dense<0.000000e+00> : vector<34xf32>
    %323 = vector.multi_reduction <add>, %322, %cst_82 [1] : vector<34x16xf32> to vector<34xf32>
    %324 = vector.shape_cast %323 : vector<34xf32> to vector<34x1xf32>
    %cst_83 = arith.constant 1.600000e+01 : f32
    %325 = vector.broadcast %cst_83 : f32 to vector<34x1xf32>
    %326 = arith.divf %324, %325 : vector<34x1xf32>
    %327 = vector.broadcast %319 : vector<34x1xf32> to vector<34x16xf32>
    %328 = arith.subf %315, %327 : vector<34x16xf32>
    %cst_84 = arith.constant 9.99999997E-7 : f32
    %329 = vector.broadcast %cst_84 : f32 to vector<34x1xf32>
    %330 = arith.addf %326, %329 : vector<34x1xf32>
    %331 = math.rsqrt %330 : vector<34x1xf32>
    %332 = vector.broadcast %331 : vector<34x1xf32> to vector<34x16xf32>
    %333 = arith.mulf %328, %332 : vector<34x16xf32>
    %334 = vector.broadcast %210 : vector<1x16xf32> to vector<34x16xf32>
    %335 = arith.mulf %333, %334 : vector<34x16xf32>
    %336 = vector.broadcast %211 : vector<1x16xf32> to vector<34x16xf32>
    %337 = arith.addf %335, %336 : vector<34x16xf32>
    %338 = arith.truncf %337 : vector<34x16xf32> to vector<34x16xbf16>
    %cst_85 = arith.constant dense<0.000000e+00> : vector<34x64xf32>
    %339 = tpu.matmul %338, %204, %cst_85 {dimension_numbers = #tpu.dot_dimension_numbers<[1], [0], [0], [1], [0, 0, 1, 1], [], []>} : vector<34x16xbf16>, vector<16x64xbf16>, vector<34x64xf32> -> vector<34x64xf32>
    %340 = vector.broadcast %214 : vector<1x64xf32> to vector<34x64xf32>
    %341 = arith.addf %339, %340 : vector<34x64xf32>
    %cst_86 = arith.constant 5.000000e-01 : f32
    %342 = vector.broadcast %cst_86 : f32 to vector<34x64xf32>
    %343 = arith.mulf %342, %341 : vector<34x64xf32>
    %cst_87 = arith.constant 0.707106769 : f32
    %344 = vector.broadcast %cst_87 : f32 to vector<34x64xf32>
    %345 = arith.mulf %341, %344 : vector<34x64xf32>
    %cst_88 = arith.constant -4.000000e+00 : f32
    %cst_89 = arith.constant 4.000000e+00 : f32
    %346 = vector.broadcast %cst_88 : f32 to vector<34x64xf32>
    %347 = arith.maximumf %346, %345 : vector<34x64xf32>
    %348 = vector.broadcast %cst_89 : f32 to vector<34x64xf32>
    %349 = arith.minimumf %348, %347 : vector<34x64xf32>
    %350 = arith.mulf %349, %349 : vector<34x64xf32>
    %cst_90 = arith.constant -2.72614237E-10 : f32
    %351 = vector.broadcast %cst_90 : f32 to vector<34x64xf32>
    %352 = arith.mulf %351, %350 : vector<34x64xf32>
    %cst_91 = arith.constant 2.77068146E-8 : f32
    %353 = vector.broadcast %cst_91 : f32 to vector<34x64xf32>
    %354 = arith.addf %352, %353 : vector<34x64xf32>
    %355 = arith.mulf %354, %350 : vector<34x64xf32>
    %cst_92 = arith.constant -2.10102394E-6 : f32
    %356 = vector.broadcast %cst_92 : f32 to vector<34x64xf32>
    %357 = arith.addf %355, %356 : vector<34x64xf32>
    %358 = arith.mulf %357, %350 : vector<34x64xf32>
    %cst_93 = arith.constant -5.69250624E-5 : f32
    %359 = vector.broadcast %cst_93 : f32 to vector<34x64xf32>
    %360 = arith.addf %358, %359 : vector<34x64xf32>
    %361 = arith.mulf %360, %350 : vector<34x64xf32>
    %cst_94 = arith.constant -7.34990637E-4 : f32
    %362 = vector.broadcast %cst_94 : f32 to vector<34x64xf32>
    %363 = arith.addf %361, %362 : vector<34x64xf32>
    %364 = arith.mulf %363, %350 : vector<34x64xf32>
    %cst_95 = arith.constant -2.954600e-03 : f32
    %365 = vector.broadcast %cst_95 : f32 to vector<34x64xf32>
    %366 = arith.addf %364, %365 : vector<34x64xf32>
    %367 = arith.mulf %366, %350 : vector<34x64xf32>
    %cst_96 = arith.constant -0.0160960332 : f32
    %368 = vector.broadcast %cst_96 : f32 to vector<34x64xf32>
    %369 = arith.addf %367, %368 : vector<34x64xf32>
    %cst_97 = arith.constant -1.45660715E-5 : f32
    %370 = vector.broadcast %cst_97 : f32 to vector<34x64xf32>
    %371 = arith.mulf %370, %350 : vector<34x64xf32>
    %cst_98 = arith.constant -2.13374049E-4 : f32
    %372 = vector.broadcast %cst_98 : f32 to vector<34x64xf32>
    %373 = arith.addf %371, %372 : vector<34x64xf32>
    %374 = arith.mulf %373, %350 : vector<34x64xf32>
    %cst_99 = arith.constant -0.00168282702 : f32
    %375 = vector.broadcast %cst_99 : f32 to vector<34x64xf32>
    %376 = arith.addf %374, %375 : vector<34x64xf32>
    %377 = arith.mulf %376, %350 : vector<34x64xf32>
    %cst_100 = arith.constant -0.00737332925 : f32
    %378 = vector.broadcast %cst_100 : f32 to vector<34x64xf32>
    %379 = arith.addf %377, %378 : vector<34x64xf32>
    %380 = arith.mulf %379, %350 : vector<34x64xf32>
    %cst_101 = arith.constant -0.0142647391 : f32
    %381 = vector.broadcast %cst_101 : f32 to vector<34x64xf32>
    %382 = arith.addf %380, %381 : vector<34x64xf32>
    %383 = arith.mulf %349, %369 : vector<34x64xf32>
    %384 = arith.divf %383, %382 : vector<34x64xf32>
    %cst_102 = arith.constant 1.000000e+00 : f32
    %385 = vector.broadcast %cst_102 : f32 to vector<34x64xf32>
    %386 = arith.addf %385, %384 : vector<34x64xf32>
    %387 = arith.mulf %343, %386 : vector<34x64xf32>
    %388 = arith.truncf %387 : vector<34x64xf32> to vector<34x64xbf16>
    %cst_103 = arith.constant dense<0.000000e+00> : vector<34x16xf32>
    %389 = tpu.matmul %388, %205, %cst_103 {dimension_numbers = #tpu.dot_dimension_numbers<[1], [0], [0], [1], [0, 0, 1, 1], [], []>} : vector<34x64xbf16>, vector<64x16xbf16>, vector<34x16xf32> -> vector<34x16xf32>
    %390 = vector.broadcast %213 : vector<1x16xf32> to vector<34x16xf32>
    %391 = arith.addf %389, %390 : vector<34x16xf32>
    %392 = arith.addf %315, %391 : vector<34x16xf32>
    %c2 = arith.constant 2 : index
    %c0_104 = arith.constant 0 : index
    %c0_105 = arith.constant 0 : index
    %393 = vector.load %arg3[%c2, %c0_104, %c0_105] : memref<3x96x128xbf16, #tpu.memory_space<vmem>>, vector<1x96x128xbf16>
    %394 = vector.shape_cast %393 : vector<1x96x128xbf16> to vector<96x128xbf16>
    %395 = vector.extract_strided_slice %394 {offsets = [0, 0], sizes = [16, 128], strides = [1, 1]} : vector<96x128xbf16> to vector<16x128xbf16>
    %396 = vector.extract_strided_slice %394 {offsets = [16, 0], sizes = [16, 64], strides = [1, 1]} : vector<96x128xbf16> to vector<16x64xbf16>
    %397 = vector.extract_strided_slice %394 {offsets = [32, 0], sizes = [64, 16], strides = [1, 1]} : vector<96x128xbf16> to vector<64x16xbf16>
    %398 = vector.extract_strided_slice %0 {offsets = [6, 0], sizes = [1, 128], strides = [1, 1]} : vector<11x128xf32> to vector<1x128xf32>
    %399 = vector.extract_strided_slice %0 {offsets = [7, 0], sizes = [1, 128], strides = [1, 1]} : vector<11x128xf32> to vector<1x128xf32>
    %400 = vector.extract_strided_slice %399 {offsets = [0, 0], sizes = [1, 16], strides = [1, 1]} : vector<1x128xf32> to vector<1x16xf32>
    %401 = vector.extract_strided_slice %399 {offsets = [0, 16], sizes = [1, 16], strides = [1, 1]} : vector<1x128xf32> to vector<1x16xf32>
    %402 = vector.extract_strided_slice %399 {offsets = [0, 32], sizes = [1, 16], strides = [1, 1]} : vector<1x128xf32> to vector<1x16xf32>
    %403 = vector.extract_strided_slice %399 {offsets = [0, 48], sizes = [1, 16], strides = [1, 1]} : vector<1x128xf32> to vector<1x16xf32>
    %404 = vector.extract_strided_slice %399 {offsets = [0, 64], sizes = [1, 16], strides = [1, 1]} : vector<1x128xf32> to vector<1x16xf32>
    %405 = vector.extract_strided_slice %399 {offsets = [0, 80], sizes = [1, 16], strides = [1, 1]} : vector<1x128xf32> to vector<1x16xf32>
    %406 = vector.extract_strided_slice %0 {offsets = [8, 0], sizes = [1, 64], strides = [1, 1]} : vector<11x128xf32> to vector<1x64xf32>
    %cst_106 = arith.constant dense<0.000000e+00> : vector<34xf32>
    %407 = vector.multi_reduction <add>, %392, %cst_106 [1] : vector<34x16xf32> to vector<34xf32>
    %408 = vector.shape_cast %407 : vector<34xf32> to vector<34x1xf32>
    %cst_107 = arith.constant 1.600000e+01 : f32
    %409 = vector.broadcast %cst_107 : f32 to vector<34x1xf32>
    %410 = arith.divf %408, %409 : vector<34x1xf32>
    %411 = vector.broadcast %410 : vector<34x1xf32> to vector<34x16xf32>
    %412 = arith.subf %392, %411 : vector<34x16xf32>
    %413 = arith.mulf %412, %412 : vector<34x16xf32>
    %cst_108 = arith.constant dense<0.000000e+00> : vector<34xf32>
    %414 = vector.multi_reduction <add>, %413, %cst_108 [1] : vector<34x16xf32> to vector<34xf32>
    %415 = vector.shape_cast %414 : vector<34xf32> to vector<34x1xf32>
    %cst_109 = arith.constant 1.600000e+01 : f32
    %416 = vector.broadcast %cst_109 : f32 to vector<34x1xf32>
    %417 = arith.divf %415, %416 : vector<34x1xf32>
    %418 = vector.broadcast %410 : vector<34x1xf32> to vector<34x16xf32>
    %419 = arith.subf %392, %418 : vector<34x16xf32>
    %cst_110 = arith.constant 9.99999997E-7 : f32
    %420 = vector.broadcast %cst_110 : f32 to vector<34x1xf32>
    %421 = arith.addf %417, %420 : vector<34x1xf32>
    %422 = math.rsqrt %421 : vector<34x1xf32>
    %423 = vector.broadcast %422 : vector<34x1xf32> to vector<34x16xf32>
    %424 = arith.mulf %419, %423 : vector<34x16xf32>
    %425 = vector.broadcast %400 : vector<1x16xf32> to vector<34x16xf32>
    %426 = arith.mulf %424, %425 : vector<34x16xf32>
    %427 = vector.broadcast %401 : vector<1x16xf32> to vector<34x16xf32>
    %428 = arith.addf %426, %427 : vector<34x16xf32>
    %429 = arith.truncf %428 : vector<34x16xf32> to vector<34x16xbf16>
    %cst_111 = arith.constant dense<0.000000e+00> : vector<34x128xf32>
    %430 = tpu.matmul %429, %395, %cst_111 {dimension_numbers = #tpu.dot_dimension_numbers<[1], [0], [0], [1], [0, 0, 1, 1], [], []>} : vector<34x16xbf16>, vector<16x128xbf16>, vector<34x128xf32> -> vector<34x128xf32>
    %431 = vector.broadcast %398 : vector<1x128xf32> to vector<34x128xf32>
    %432 = arith.addf %430, %431 : vector<34x128xf32>
    %433 = arith.truncf %432 : vector<34x128xf32> to vector<34x128xbf16>
    %434 = vector.extract_strided_slice %433 {offsets = [0, 0], sizes = [34, 8], strides = [1, 1]} : vector<34x128xbf16> to vector<34x8xbf16>
    %435 = vector.extract_strided_slice %433 {offsets = [0, 32], sizes = [34, 8], strides = [1, 1]} : vector<34x128xbf16> to vector<34x8xbf16>
    %436 = vector.extract_strided_slice %433 {offsets = [0, 64], sizes = [34, 16], strides = [1, 1]} : vector<34x128xbf16> to vector<34x16xbf16>
    %cst_112 = arith.constant dense<0.000000e+00> : vector<34x34xf32>
    %437 = tpu.matmul %434, %435, %cst_112 {dimension_numbers = #tpu.dot_dimension_numbers<[1], [1], [0], [0], [0, 0, 1, 0], [], []>} : vector<34x8xbf16>, vector<34x8xbf16>, vector<34x34xf32> -> vector<34x34xf32>
    %438 = arith.addf %437, %2 : vector<34x34xf32>
    %cst_113 = arith.constant dense<0xFF800000> : vector<34xf32>
    %439 = vector.multi_reduction <maximumf>, %438, %cst_113 [1] : vector<34x34xf32> to vector<34xf32>
    %440 = vector.shape_cast %439 : vector<34xf32> to vector<34x1xf32>
    %441 = vector.broadcast %440 : vector<34x1xf32> to vector<34x34xf32>
    %442 = arith.subf %438, %441 : vector<34x34xf32>
    %443 = math.exp %442 : vector<34x34xf32>
    %cst_114 = arith.constant dense<0.000000e+00> : vector<34xf32>
    %444 = vector.multi_reduction <add>, %443, %cst_114 [1] : vector<34x34xf32> to vector<34xf32>
    %445 = vector.shape_cast %444 : vector<34xf32> to vector<34x1xf32>
    %446 = tpu.reciprocal %445 {approx = true} : vector<34x1xf32> -> vector<34x1xf32>
    %447 = vector.broadcast %446 : vector<34x1xf32> to vector<34x34xf32>
    %448 = arith.mulf %443, %447 : vector<34x34xf32>
    %449 = arith.truncf %448 : vector<34x34xf32> to vector<34x34xbf16>
    %cst_115 = arith.constant dense<0.000000e+00> : vector<34x16xf32>
    %450 = tpu.matmul %449, %436, %cst_115 {dimension_numbers = #tpu.dot_dimension_numbers<[1], [0], [0], [1], [0, 0, 1, 1], [], []>} : vector<34x34xbf16>, vector<34x16xbf16>, vector<34x16xf32> -> vector<34x16xf32>
    %451 = vector.extract_strided_slice %433 {offsets = [0, 8], sizes = [34, 8], strides = [1, 1]} : vector<34x128xbf16> to vector<34x8xbf16>
    %452 = vector.extract_strided_slice %433 {offsets = [0, 40], sizes = [34, 8], strides = [1, 1]} : vector<34x128xbf16> to vector<34x8xbf16>
    %453 = vector.extract_strided_slice %433 {offsets = [0, 80], sizes = [34, 16], strides = [1, 1]} : vector<34x128xbf16> to vector<34x16xbf16>
    %cst_116 = arith.constant dense<0.000000e+00> : vector<34x34xf32>
    %454 = tpu.matmul %451, %452, %cst_116 {dimension_numbers = #tpu.dot_dimension_numbers<[1], [1], [0], [0], [0, 0, 1, 0], [], []>} : vector<34x8xbf16>, vector<34x8xbf16>, vector<34x34xf32> -> vector<34x34xf32>
    %455 = arith.addf %454, %2 : vector<34x34xf32>
    %cst_117 = arith.constant dense<0xFF800000> : vector<34xf32>
    %456 = vector.multi_reduction <maximumf>, %455, %cst_117 [1] : vector<34x34xf32> to vector<34xf32>
    %457 = vector.shape_cast %456 : vector<34xf32> to vector<34x1xf32>
    %458 = vector.broadcast %457 : vector<34x1xf32> to vector<34x34xf32>
    %459 = arith.subf %455, %458 : vector<34x34xf32>
    %460 = math.exp %459 : vector<34x34xf32>
    %cst_118 = arith.constant dense<0.000000e+00> : vector<34xf32>
    %461 = vector.multi_reduction <add>, %460, %cst_118 [1] : vector<34x34xf32> to vector<34xf32>
    %462 = vector.shape_cast %461 : vector<34xf32> to vector<34x1xf32>
    %463 = tpu.reciprocal %462 {approx = true} : vector<34x1xf32> -> vector<34x1xf32>
    %464 = vector.broadcast %463 : vector<34x1xf32> to vector<34x34xf32>
    %465 = arith.mulf %460, %464 : vector<34x34xf32>
    %466 = arith.truncf %465 : vector<34x34xf32> to vector<34x34xbf16>
    %cst_119 = arith.constant dense<0.000000e+00> : vector<34x16xf32>
    %467 = tpu.matmul %466, %453, %cst_119 {dimension_numbers = #tpu.dot_dimension_numbers<[1], [0], [0], [1], [0, 0, 1, 1], [], []>} : vector<34x34xbf16>, vector<34x16xbf16>, vector<34x16xf32> -> vector<34x16xf32>
    %468 = arith.addf %450, %467 : vector<34x16xf32>
    %469 = vector.extract_strided_slice %433 {offsets = [0, 16], sizes = [34, 8], strides = [1, 1]} : vector<34x128xbf16> to vector<34x8xbf16>
    %470 = vector.extract_strided_slice %433 {offsets = [0, 48], sizes = [34, 8], strides = [1, 1]} : vector<34x128xbf16> to vector<34x8xbf16>
    %471 = vector.extract_strided_slice %433 {offsets = [0, 96], sizes = [34, 16], strides = [1, 1]} : vector<34x128xbf16> to vector<34x16xbf16>
    %cst_120 = arith.constant dense<0.000000e+00> : vector<34x34xf32>
    %472 = tpu.matmul %469, %470, %cst_120 {dimension_numbers = #tpu.dot_dimension_numbers<[1], [1], [0], [0], [0, 0, 1, 0], [], []>} : vector<34x8xbf16>, vector<34x8xbf16>, vector<34x34xf32> -> vector<34x34xf32>
    %473 = arith.addf %472, %2 : vector<34x34xf32>
    %cst_121 = arith.constant dense<0xFF800000> : vector<34xf32>
    %474 = vector.multi_reduction <maximumf>, %473, %cst_121 [1] : vector<34x34xf32> to vector<34xf32>
    %475 = vector.shape_cast %474 : vector<34xf32> to vector<34x1xf32>
    %476 = vector.broadcast %475 : vector<34x1xf32> to vector<34x34xf32>
    %477 = arith.subf %473, %476 : vector<34x34xf32>
    %478 = math.exp %477 : vector<34x34xf32>
    %cst_122 = arith.constant dense<0.000000e+00> : vector<34xf32>
    %479 = vector.multi_reduction <add>, %478, %cst_122 [1] : vector<34x34xf32> to vector<34xf32>
    %480 = vector.shape_cast %479 : vector<34xf32> to vector<34x1xf32>
    %481 = tpu.reciprocal %480 {approx = true} : vector<34x1xf32> -> vector<34x1xf32>
    %482 = vector.broadcast %481 : vector<34x1xf32> to vector<34x34xf32>
    %483 = arith.mulf %478, %482 : vector<34x34xf32>
    %484 = arith.truncf %483 : vector<34x34xf32> to vector<34x34xbf16>
    %cst_123 = arith.constant dense<0.000000e+00> : vector<34x16xf32>
    %485 = tpu.matmul %484, %471, %cst_123 {dimension_numbers = #tpu.dot_dimension_numbers<[1], [0], [0], [1], [0, 0, 1, 1], [], []>} : vector<34x34xbf16>, vector<34x16xbf16>, vector<34x16xf32> -> vector<34x16xf32>
    %486 = arith.addf %468, %485 : vector<34x16xf32>
    %487 = vector.extract_strided_slice %433 {offsets = [0, 24], sizes = [34, 8], strides = [1, 1]} : vector<34x128xbf16> to vector<34x8xbf16>
    %488 = vector.extract_strided_slice %433 {offsets = [0, 56], sizes = [34, 8], strides = [1, 1]} : vector<34x128xbf16> to vector<34x8xbf16>
    %489 = vector.extract_strided_slice %433 {offsets = [0, 112], sizes = [34, 16], strides = [1, 1]} : vector<34x128xbf16> to vector<34x16xbf16>
    %cst_124 = arith.constant dense<0.000000e+00> : vector<34x34xf32>
    %490 = tpu.matmul %487, %488, %cst_124 {dimension_numbers = #tpu.dot_dimension_numbers<[1], [1], [0], [0], [0, 0, 1, 0], [], []>} : vector<34x8xbf16>, vector<34x8xbf16>, vector<34x34xf32> -> vector<34x34xf32>
    %491 = arith.addf %490, %2 : vector<34x34xf32>
    %cst_125 = arith.constant dense<0xFF800000> : vector<34xf32>
    %492 = vector.multi_reduction <maximumf>, %491, %cst_125 [1] : vector<34x34xf32> to vector<34xf32>
    %493 = vector.shape_cast %492 : vector<34xf32> to vector<34x1xf32>
    %494 = vector.broadcast %493 : vector<34x1xf32> to vector<34x34xf32>
    %495 = arith.subf %491, %494 : vector<34x34xf32>
    %496 = math.exp %495 : vector<34x34xf32>
    %cst_126 = arith.constant dense<0.000000e+00> : vector<34xf32>
    %497 = vector.multi_reduction <add>, %496, %cst_126 [1] : vector<34x34xf32> to vector<34xf32>
    %498 = vector.shape_cast %497 : vector<34xf32> to vector<34x1xf32>
    %499 = tpu.reciprocal %498 {approx = true} : vector<34x1xf32> -> vector<34x1xf32>
    %500 = vector.broadcast %499 : vector<34x1xf32> to vector<34x34xf32>
    %501 = arith.mulf %496, %500 : vector<34x34xf32>
    %502 = arith.truncf %501 : vector<34x34xf32> to vector<34x34xbf16>
    %cst_127 = arith.constant dense<0.000000e+00> : vector<34x16xf32>
    %503 = tpu.matmul %502, %489, %cst_127 {dimension_numbers = #tpu.dot_dimension_numbers<[1], [0], [0], [1], [0, 0, 1, 1], [], []>} : vector<34x34xbf16>, vector<34x16xbf16>, vector<34x16xf32> -> vector<34x16xf32>
    %504 = arith.addf %486, %503 : vector<34x16xf32>
    %505 = arith.addf %392, %504 : vector<34x16xf32>
    %506 = vector.broadcast %404 : vector<1x16xf32> to vector<34x16xf32>
    %507 = arith.addf %505, %506 : vector<34x16xf32>
    %cst_128 = arith.constant dense<0.000000e+00> : vector<34xf32>
    %508 = vector.multi_reduction <add>, %507, %cst_128 [1] : vector<34x16xf32> to vector<34xf32>
    %509 = vector.shape_cast %508 : vector<34xf32> to vector<34x1xf32>
    %cst_129 = arith.constant 1.600000e+01 : f32
    %510 = vector.broadcast %cst_129 : f32 to vector<34x1xf32>
    %511 = arith.divf %509, %510 : vector<34x1xf32>
    %512 = vector.broadcast %511 : vector<34x1xf32> to vector<34x16xf32>
    %513 = arith.subf %507, %512 : vector<34x16xf32>
    %514 = arith.mulf %513, %513 : vector<34x16xf32>
    %cst_130 = arith.constant dense<0.000000e+00> : vector<34xf32>
    %515 = vector.multi_reduction <add>, %514, %cst_130 [1] : vector<34x16xf32> to vector<34xf32>
    %516 = vector.shape_cast %515 : vector<34xf32> to vector<34x1xf32>
    %cst_131 = arith.constant 1.600000e+01 : f32
    %517 = vector.broadcast %cst_131 : f32 to vector<34x1xf32>
    %518 = arith.divf %516, %517 : vector<34x1xf32>
    %519 = vector.broadcast %511 : vector<34x1xf32> to vector<34x16xf32>
    %520 = arith.subf %507, %519 : vector<34x16xf32>
    %cst_132 = arith.constant 9.99999997E-7 : f32
    %521 = vector.broadcast %cst_132 : f32 to vector<34x1xf32>
    %522 = arith.addf %518, %521 : vector<34x1xf32>
    %523 = math.rsqrt %522 : vector<34x1xf32>
    %524 = vector.broadcast %523 : vector<34x1xf32> to vector<34x16xf32>
    %525 = arith.mulf %520, %524 : vector<34x16xf32>
    %526 = vector.broadcast %402 : vector<1x16xf32> to vector<34x16xf32>
    %527 = arith.mulf %525, %526 : vector<34x16xf32>
    %528 = vector.broadcast %403 : vector<1x16xf32> to vector<34x16xf32>
    %529 = arith.addf %527, %528 : vector<34x16xf32>
    %530 = arith.truncf %529 : vector<34x16xf32> to vector<34x16xbf16>
    %cst_133 = arith.constant dense<0.000000e+00> : vector<34x64xf32>
    %531 = tpu.matmul %530, %396, %cst_133 {dimension_numbers = #tpu.dot_dimension_numbers<[1], [0], [0], [1], [0, 0, 1, 1], [], []>} : vector<34x16xbf16>, vector<16x64xbf16>, vector<34x64xf32> -> vector<34x64xf32>
    %532 = vector.broadcast %406 : vector<1x64xf32> to vector<34x64xf32>
    %533 = arith.addf %531, %532 : vector<34x64xf32>
    %cst_134 = arith.constant 5.000000e-01 : f32
    %534 = vector.broadcast %cst_134 : f32 to vector<34x64xf32>
    %535 = arith.mulf %534, %533 : vector<34x64xf32>
    %cst_135 = arith.constant 0.707106769 : f32
    %536 = vector.broadcast %cst_135 : f32 to vector<34x64xf32>
    %537 = arith.mulf %533, %536 : vector<34x64xf32>
    %cst_136 = arith.constant -4.000000e+00 : f32
    %cst_137 = arith.constant 4.000000e+00 : f32
    %538 = vector.broadcast %cst_136 : f32 to vector<34x64xf32>
    %539 = arith.maximumf %538, %537 : vector<34x64xf32>
    %540 = vector.broadcast %cst_137 : f32 to vector<34x64xf32>
    %541 = arith.minimumf %540, %539 : vector<34x64xf32>
    %542 = arith.mulf %541, %541 : vector<34x64xf32>
    %cst_138 = arith.constant -2.72614237E-10 : f32
    %543 = vector.broadcast %cst_138 : f32 to vector<34x64xf32>
    %544 = arith.mulf %543, %542 : vector<34x64xf32>
    %cst_139 = arith.constant 2.77068146E-8 : f32
    %545 = vector.broadcast %cst_139 : f32 to vector<34x64xf32>
    %546 = arith.addf %544, %545 : vector<34x64xf32>
    %547 = arith.mulf %546, %542 : vector<34x64xf32>
    %cst_140 = arith.constant -2.10102394E-6 : f32
    %548 = vector.broadcast %cst_140 : f32 to vector<34x64xf32>
    %549 = arith.addf %547, %548 : vector<34x64xf32>
    %550 = arith.mulf %549, %542 : vector<34x64xf32>
    %cst_141 = arith.constant -5.69250624E-5 : f32
    %551 = vector.broadcast %cst_141 : f32 to vector<34x64xf32>
    %552 = arith.addf %550, %551 : vector<34x64xf32>
    %553 = arith.mulf %552, %542 : vector<34x64xf32>
    %cst_142 = arith.constant -7.34990637E-4 : f32
    %554 = vector.broadcast %cst_142 : f32 to vector<34x64xf32>
    %555 = arith.addf %553, %554 : vector<34x64xf32>
    %556 = arith.mulf %555, %542 : vector<34x64xf32>
    %cst_143 = arith.constant -2.954600e-03 : f32
    %557 = vector.broadcast %cst_143 : f32 to vector<34x64xf32>
    %558 = arith.addf %556, %557 : vector<34x64xf32>
    %559 = arith.mulf %558, %542 : vector<34x64xf32>
    %cst_144 = arith.constant -0.0160960332 : f32
    %560 = vector.broadcast %cst_144 : f32 to vector<34x64xf32>
    %561 = arith.addf %559, %560 : vector<34x64xf32>
    %cst_145 = arith.constant -1.45660715E-5 : f32
    %562 = vector.broadcast %cst_145 : f32 to vector<34x64xf32>
    %563 = arith.mulf %562, %542 : vector<34x64xf32>
    %cst_146 = arith.constant -2.13374049E-4 : f32
    %564 = vector.broadcast %cst_146 : f32 to vector<34x64xf32>
    %565 = arith.addf %563, %564 : vector<34x64xf32>
    %566 = arith.mulf %565, %542 : vector<34x64xf32>
    %cst_147 = arith.constant -0.00168282702 : f32
    %567 = vector.broadcast %cst_147 : f32 to vector<34x64xf32>
    %568 = arith.addf %566, %567 : vector<34x64xf32>
    %569 = arith.mulf %568, %542 : vector<34x64xf32>
    %cst_148 = arith.constant -0.00737332925 : f32
    %570 = vector.broadcast %cst_148 : f32 to vector<34x64xf32>
    %571 = arith.addf %569, %570 : vector<34x64xf32>
    %572 = arith.mulf %571, %542 : vector<34x64xf32>
    %cst_149 = arith.constant -0.0142647391 : f32
    %573 = vector.broadcast %cst_149 : f32 to vector<34x64xf32>
    %574 = arith.addf %572, %573 : vector<34x64xf32>
    %575 = arith.mulf %541, %561 : vector<34x64xf32>
    %576 = arith.divf %575, %574 : vector<34x64xf32>
    %cst_150 = arith.constant 1.000000e+00 : f32
    %577 = vector.broadcast %cst_150 : f32 to vector<34x64xf32>
    %578 = arith.addf %577, %576 : vector<34x64xf32>
    %579 = arith.mulf %535, %578 : vector<34x64xf32>
    %580 = arith.truncf %579 : vector<34x64xf32> to vector<34x64xbf16>
    %cst_151 = arith.constant dense<0.000000e+00> : vector<34x16xf32>
    %581 = tpu.matmul %580, %397, %cst_151 {dimension_numbers = #tpu.dot_dimension_numbers<[1], [0], [0], [1], [0, 0, 1, 1], [], []>} : vector<34x64xbf16>, vector<64x16xbf16>, vector<34x16xf32> -> vector<34x16xf32>
    %582 = vector.broadcast %405 : vector<1x16xf32> to vector<34x16xf32>
    %583 = arith.addf %581, %582 : vector<34x16xf32>
    %584 = arith.addf %507, %583 : vector<34x16xf32>
    %585 = vector.extract_strided_slice %0 {offsets = [9, 0], sizes = [1, 128], strides = [1, 1]} : vector<11x128xf32> to vector<1x128xf32>
    %586 = vector.extract_strided_slice %0 {offsets = [10, 0], sizes = [1, 128], strides = [1, 1]} : vector<11x128xf32> to vector<1x128xf32>
    %587 = vector.extract_strided_slice %584 {offsets = [0, 0], sizes = [8, 16], strides = [1, 1]} : vector<34x16xf32> to vector<8x16xf32>
    %588 = vector.extract_strided_slice %585 {offsets = [0, 0], sizes = [1, 16], strides = [1, 1]} : vector<1x128xf32> to vector<1x16xf32>
    %589 = vector.extract_strided_slice %585 {offsets = [0, 16], sizes = [1, 16], strides = [1, 1]} : vector<1x128xf32> to vector<1x16xf32>
    %cst_152 = arith.constant dense<0.000000e+00> : vector<8xf32>
    %590 = vector.multi_reduction <add>, %587, %cst_152 [1] : vector<8x16xf32> to vector<8xf32>
    %591 = vector.shape_cast %590 : vector<8xf32> to vector<8x1xf32>
    %cst_153 = arith.constant 1.600000e+01 : f32
    %592 = vector.broadcast %cst_153 : f32 to vector<8x1xf32>
    %593 = arith.divf %591, %592 : vector<8x1xf32>
    %594 = vector.broadcast %593 : vector<8x1xf32> to vector<8x16xf32>
    %595 = arith.subf %587, %594 : vector<8x16xf32>
    %596 = arith.mulf %595, %595 : vector<8x16xf32>
    %cst_154 = arith.constant dense<0.000000e+00> : vector<8xf32>
    %597 = vector.multi_reduction <add>, %596, %cst_154 [1] : vector<8x16xf32> to vector<8xf32>
    %598 = vector.shape_cast %597 : vector<8xf32> to vector<8x1xf32>
    %cst_155 = arith.constant 1.600000e+01 : f32
    %599 = vector.broadcast %cst_155 : f32 to vector<8x1xf32>
    %600 = arith.divf %598, %599 : vector<8x1xf32>
    %601 = vector.broadcast %593 : vector<8x1xf32> to vector<8x16xf32>
    %602 = arith.subf %587, %601 : vector<8x16xf32>
    %cst_156 = arith.constant 9.99999997E-7 : f32
    %603 = vector.broadcast %cst_156 : f32 to vector<8x1xf32>
    %604 = arith.addf %600, %603 : vector<8x1xf32>
    %605 = math.rsqrt %604 : vector<8x1xf32>
    %606 = vector.broadcast %605 : vector<8x1xf32> to vector<8x16xf32>
    %607 = arith.mulf %602, %606 : vector<8x16xf32>
    %608 = vector.broadcast %588 : vector<1x16xf32> to vector<8x16xf32>
    %609 = arith.mulf %607, %608 : vector<8x16xf32>
    %610 = vector.broadcast %589 : vector<1x16xf32> to vector<8x16xf32>
    %611 = arith.addf %609, %610 : vector<8x16xf32>
    %612 = arith.truncf %611 : vector<8x16xf32> to vector<8x16xbf16>
    %c0_157 = arith.constant 0 : index
    %c0_158 = arith.constant 0 : index
    %613 = vector.load %arg2[%c0_157, %c0_158] : memref<64x128xbf16, #tpu.memory_space<vmem>>, vector<64x128xbf16>
    %614 = vector.extract_strided_slice %613 {offsets = [48, 0], sizes = [16, 128], strides = [1, 1]} : vector<64x128xbf16> to vector<16x128xbf16>
    %cst_159 = arith.constant dense<0.000000e+00> : vector<8x128xf32>
    %615 = tpu.matmul %612, %614, %cst_159 {dimension_numbers = #tpu.dot_dimension_numbers<[1], [0], [0], [1], [0, 0, 1, 1], [], []>} : vector<8x16xbf16>, vector<16x128xbf16>, vector<8x128xf32> -> vector<8x128xf32>
    %616 = vector.broadcast %586 : vector<1x128xf32> to vector<8x128xf32>
    %617 = arith.addf %615, %616 : vector<8x128xf32>
    %c0_160 = arith.constant 0 : index
    %c0_161 = arith.constant 0 : index
    %618 = vector.load %arg5[%c0_160, %c0_161] : memref<8x128xf32, #tpu.memory_space<vmem>>, vector<8x128xf32>
    tpu.vector_store %arg5[%c0_160, %c0_161], %617 {strides = array<i32>} : memref<8x128xf32, #tpu.memory_space<vmem>>, vector<8x128xf32>,
    return
  }
}

</mosaic_0001>

<bundles_post_ra>
// kernel: vit_value_forward.1
= control target key start
LH: loop header
LB: loop body
LE: loop exit
PB: predicated region body
PF: predicated region fallthrough
CT: control target
= control target key end

     0   :  { %v6048_v0 = vmov 0.0   ;;  %vm6049_vm0 = vmmov 0   ;;  %s6050_s26 = smov 64   ;;  %vm92_vm1 = vcmask 392192   ;;  %vm170_vm2 = vcmask 130048   ;;  %s6051_s17 = smov 112   ;;  %s8058_s2 = inlined_call_operand.vmem [shape: bf16[64,128], index: 2, kind: input, shape index: {}]   ;;  %s8059_s0 = inlined_call_operand.vmem [shape: bf16[34,48], index: 0, kind: input, shape index: {}]   ;;  %s8060_s1 = inlined_call_operand.vmem [shape: f32[34,128], index: 1, kind: input, shape index: {}]   ;;  %s8061_s4 = inlined_call_operand.vmem [shape: f32[11,128], index: 4, kind: input, shape index: {}]   ;;  %s8062_s3 = inlined_call_operand.vmem [shape: bf16[3,96,128], index: 3, kind: input, shape index: {}]   ;;  %s8063_s5 = inlined_call_operand.vmem [shape: f32[8,128], index: 5, kind: output, shape index: {}]  }
   0x1   :  { %5061 = vmatprep.subr.bf16.mxu0 %v6048_v0  ;;  %v5674_v1 = vld [vmem:[%s8058_s2] sm:$0xff]   ;;  %5067 = vmatprep.mubr.msk.bf16.mxu0 %vm6049_vm0, %v6048_v0  ;;  %v5675_v2 = vld [vmem:[%s8058_s2 + $0x8] sm:$0xff]   ;;  %v5676_v4 = vld [vmem:[%s8058_s2 + $0x10] sm:$0xff]   ;;  %vm183_vm3 = vcmask 123904   ;;  %s6052_s20 = smov 88   ;;  %s6053_s21 = smov 120  }
   0x2   :  { %5079 = vmatprep.subr.bf16.mxu1 %v6048_v0  ;;  %5081 = vmatprep.mubr.msk.bf16.mxu1 %vm6049_vm0, %v6048_v0  ;;  %v6107_v3 = vld [vmem:[%s8060_s1] sm:$0xff]  ;;  %v6117_v5 = vld [vmem:[%s8060_s1 + $0x10] sm:$0xff]  ;;  %v6123_v6 = vld [vmem:[%s8060_s1 + $0x8] sm:$0xff]  ;;  %vm346_vm4 = vcmask 64512   ;;  %vm421_vm5 = vcmask 277504   ;;  %s6054_s22 = smov 96  }
   0x3   :  { %5062 = vmatpush3.bf16.msra.mxu0 %v5674_v1  ;;  %77 = vrot.lane.b32.xlu0 %v6107_v3, %s6050_s26  ;;  %v6130_v7 = vld [vmem:[%s8060_s1 + $0x18] sm:$0xff]  ;;  %v5677_v8 = vld [vmem:[%s8059_s0] sm:$0xff]   ;;  %v5678_v10 = vld [vmem:[%s8059_s0 + $0x8] sm:$0xff]   ;;  %v238_v1 = vlaneseq  ;;  %vm434_vm6 = vcmask 271360   ;;  %s6055_s23 = smov 48   ;;  %s6056_s24 = smov 80  }
   0x4   :  { %5063 = vmatprep.subr.bf16.mxu0 %v6048_v0  ;;  %81 = vrot.lane.b32.xlu1 %v6117_v5, %s6050_s26  ;;  %v6142_v9 = vld [vmem:[%s8060_s1 + $0x20] sm:$0x3]  ;;  %v5679_v11 = vld [vmem:[%s8059_s0 + $0x10] ss:$0 sps:$4 sm:$0x11]   ;;  %s6057_s25 = smov 104  }
   0x5   :  { %s6058_s27 = smov 72   ;;  %vm642_vm7 = vcmask 1040384   ;;  %s6059_s13 = smov 32   ;;  %vm1580_vm8 = vcmask 523264  }
   0x6   :  { %s6060_s14 = smov 16  }
   0x7   :  { %5064 = vmatpush3.bf16.msra.mxu0 %v5675_v2  ;;  %79 = vrot.lane.b32.xlu0 %v6123_v6, %s6050_s26  ;;  %v6189_v2 = vshrl.u32 %v238_v1, 7 }
   0x8   :  { %5065 = vmatprep.subr.bf16.mxu0 %v6048_v0  ;;  %83 = vrot.lane.b32.xlu1 %v6130_v7, %s6050_s26 }
   0xb   :  { %5066 = vmatpush3.bf16.msra.mxu0 %v5676_v4  ;;  %85 = vrot.lane.b32.xlu0 %v6142_v9, %s6050_s26  ;;  %v240_v4 = vsub.s32 1, %v6189_v2 }
   0xc   :  { %5111 = vmatprep.subr.bf16.mxu0 %v6048_v0 }
   0xe   :  { %5068 = vmatmul.mubr.msk.bf16.vlgmr.msra.gmra.mrb[0].mxu0 %vm92_vm1, %v5677_v8  ;;  %v21_v8 = vld [vmem:[%s8061_s4] sm:$0xff] }
   0xf   :  { %5071 = vmatprep.mubr.msk.bf16.mxu0 %vm6049_vm0, %v6048_v0 }
  0x16   :  { %5072 = vmatmul.mubr.msk.bf16.gmra.mrb[4].mxu0 %vm92_vm1, %v5678_v10  ;;  %v6197_v10 = vrot.slane %v21_v8, %v240_v4 }
  0x17   :  { %5075 = vmatprep.mubr.msk.bf16.mxu0 %vm6049_vm0, %v6048_v0 }
  0x1e   :  { %5076 = vmatmul.mubr.msk.bf16.gmra.mrb[8].mxu0 %vm92_vm1, %v5679_v11  ;;  %v5680_v11 = vld [vmem:[%s8062_s3] sm:$0xff]  }
  0x1f   :  { %5117 = vmatprep.mubr.msk.bf16.mxu0 %vm6049_vm0, %v6048_v0  ;;  %5080 = vmatpush3.bf16.msra.mxu1 %v5680_v11 }
  0x20   :  { %5093 = vmatprep.subr.bf16.mxu1 %v6048_v0 }
  0x75   :  { %v78_v12 = vpop.permute.xlu0 %77 }
  0x76   :  { %v82_v18 = vpop.permute.xlu1 %81 }
  0x79   :  { %v80_v14 = vpop.permute.xlu0 %79 }
  0x7a   :  { %v84_v24 = vpop.permute.xlu1 %83 }
  0x7d   :  { %v86_v32 = vpop.permute.xlu0 %85 }
  0xe1   :  { %v136_v13 = vpop.f32.mrb[0].mxu0 }
  0xe2   :  { %v6159_v15 = vadd.f32 %v136_v13, %v78_v12  ;;  %v5069_v16 = vpop.f32.mrb[1].mxu0 }
  0xe3   :  { %v139_v17 = vpop.f32.mrb[2].mxu0 }
  0xe4   :  { %v6161_v19 = vadd.f32 %v139_v17, %v80_v14  ;;  %v5070_v20 = vpop.f32.mrb[3].mxu0  ;;  %v171_v21 = vsel %vm170_vm2, %v6159_v15, 0.0 }
  0xe5   :  { %172 = vadd.xlane.f32.xlu1 %v171_v21 }
  0xe6   :  { %v174_v22 = vsel %vm170_vm2, %v6161_v19, 0.0 }
  0xe7   :  { %175 = vadd.xlane.f32.xlu0 %v174_v22 }
  0xe9   :  { %v144_v23 = vpop.f32.mrb[4].mxu0 }
  0xea   :  { %v6167_v25 = vadd.f32 %v144_v23, %v82_v18  ;;  %v5073_v26 = vpop.f32.mrb[5].mxu0 }
  0xeb   :  { %v147_v27 = vpop.f32.mrb[6].mxu0 }
  0xec   :  { %v6169_v28 = vadd.f32 %v147_v27, %v84_v24  ;;  %v5074_v29 = vpop.f32.mrb[7].mxu0  ;;  %v177_v30 = vsel %vm170_vm2, %v6167_v25, 0.0 }
  0xed   :  { %178 = vadd.xlane.f32.xlu0 %v177_v30 }
  0xee   :  { %v180_v31 = vsel %vm170_vm2, %v6169_v28, 0.0 }
  0xef   :  { %181 = vadd.xlane.f32.xlu1 %v180_v31 }
  0xf1   :  { %v152_v33 = vpop.f32.mrb[8].mxu0 }
  0xf2   :  { %v6175_v34 = vadd.f32 %v152_v33, %v86_v32  ;;  %v5077_v35 = vpop.f32.mrb[9].mxu0 }
  0xf3   :  { %v155_v36 = vpop.f32.mrb[10].mxu0 }
  0xf4   :  { %v184_v37 = vsel %vm183_vm3, %v6175_v34, 0.0  ;;  %v5078_v38 = vpop.f32.mrb[11].mxu0 }
  0xf5   :  { %185 = vadd.xlane.f32.xlu0 %v184_v37 }
 0x172   :  { %v173_v39 = vpop.xlane.xlu1 %172 }
 0x173   :  { %v188_v40 = vmul.f32 0.0625, %v173_v39 }
 0x174   :  { %v176_v41 = vpop.xlane.xlu0 %175 }
 0x175   :  { %v193_v42 = vsub.f32 %v6159_v15, %v188_v40  ;;  %v189_v43 = vmul.f32 0.0625, %v176_v41 }
 0x177   :  { %v194_v44 = vsub.f32 %v6161_v19, %v189_v43  ;;  %v198_v45 = vmul.f32 %v193_v42, %v193_v42 }
 0x179   :  { %v203_v46 = vsel %vm170_vm2, %v198_v45, 0.0  ;;  %v199_v47 = vmul.f32 %v194_v44, %v194_v44 }
 0x17a   :  { %v179_v48 = vpop.xlane.xlu0 %178  ;;  %204 = vadd.xlane.f32.xlu1 %v203_v46 }
 0x17b   :  { %v190_v49 = vmul.f32 0.0625, %v179_v48  ;;  %v206_v50 = vsel %vm170_vm2, %v199_v47, 0.0 }
 0x17c   :  { %v182_v51 = vpop.xlane.xlu1 %181  ;;  %207 = vadd.xlane.f32.xlu0 %v206_v50 }
 0x17d   :  { %v195_v52 = vsub.f32 %v6167_v25, %v190_v49  ;;  %v191_v53 = vmul.f32 0.0625, %v182_v51 }
 0x17f   :  { %v196_v54 = vsub.f32 %v6169_v28, %v191_v53  ;;  %v200_v55 = vmul.f32 %v195_v52, %v195_v52 }
 0x181   :  { %v209_v56 = vsel %vm170_vm2, %v200_v55, 0.0  ;;  %v201_v57 = vmul.f32 %v196_v54, %v196_v54 }
 0x182   :  { %210 = vadd.xlane.f32.xlu1 %v209_v56  ;;  %v186_v58 = vpop.xlane.xlu0 %185  ;;  %v261_v56 = vsub.s32 0, %v6189_v2 }
 0x183   :  { %v192_v59 = vmul.f32 0.0625, %v186_v58  ;;  %v212_v60 = vsel %vm170_vm2, %v201_v57, 0.0 }
 0x184   :  { %213 = vadd.xlane.f32.xlu0 %v212_v60  ;;  %v262_v57 = vrot.slane %v21_v8, %v261_v56 }
 0x185   :  { %v197_v61 = vsub.f32 %v6175_v34, %v192_v59 }
 0x187   :  { %v202_v62 = vmul.f32 %v197_v61, %v197_v61 }
 0x189   :  { %v215_v63 = vsel %vm183_vm3, %v202_v62, 0.0 }
 0x18a   :  { %216 = vadd.xlane.f32.xlu1 %v215_v63 }
 0x19a   :  { %248 = vrot.lane.b32.xlu0 %v6197_v10, %s6051_s17 }
 0x207   :  { %v205_v12 = vpop.xlane.xlu1 %204 }
 0x208   :  { %v218_v13 = vmul.f32 0.0625, %v205_v12 }
 0x209   :  { %v208_v14 = vpop.xlane.xlu0 %207 }
 0x20a   :  { %v223_v16 = vadd.f32 1e-06, %v218_v13  ;;  %v219_v17 = vmul.f32 0.0625, %v208_v14 }
 0x20c   :  { %5699 = vrsqrt.f32 %v223_v16  ;;  %v224_v18 = vadd.f32 1e-06, %v219_v17 }
 0x20e   :  { %5701 = vrsqrt.f32 %v224_v18 }
 0x20f   :  { %v211_v20 = vpop.xlane.xlu1 %210 }
 0x210   :  { %v220_v21 = vmul.f32 0.0625, %v211_v20 }
 0x211   :  { %v214_v22 = vpop.xlane.xlu0 %213 }
 0x212   :  { %v225_v23 = vadd.f32 1e-06, %v220_v21  ;;  %v221_v24 = vmul.f32 0.0625, %v214_v22 }
 0x214   :  { %5703 = vrsqrt.f32 %v225_v23  ;;  %v226_v26 = vadd.f32 1e-06, %v221_v24 }
 0x215   :  { %v249_v37 = vpop.permute.xlu0 %248 }
 0x216   :  { %v5700_v27 = vpop.eup %5699  ;;  %5705 = vrsqrt.f32 %v226_v26 }
 0x217   :  { %v217_v29 = vpop.xlane.xlu1 %216  ;;  %v233_v30 = vmul.f32 %v5700_v27, %v193_v42 }
 0x218   :  { %v5702_v31 = vpop.eup %5701  ;;  %v222_v32 = vmul.f32 0.0625, %v217_v29 }
 0x219   :  { %v234_v33 = vmul.f32 %v5702_v31, %v194_v44  ;;  %v242_v35 = vmul.f32 %v6197_v10, %v233_v30 }
 0x21a   :  { %v227_v36 = vadd.f32 1e-06, %v222_v32 }
 0x21b   :  { %v243_v38 = vmul.f32 %v6197_v10, %v234_v33  ;;  %v251_v39 = vadd.f32 %v249_v37, %v242_v35 }
 0x21c   :  { %5707 = vrsqrt.f32 %v227_v36 }
 0x21d   :  { %v252_v40 = vadd.f32 %v249_v37, %v243_v38 }
 0x21e   :  { %v5704_v41 = vpop.eup %5703 }
 0x21f   :  { %v256_v43 = vpack.c.bf16 %v252_v40, %v251_v39  ;;  %v235_v45 = vmul.f32 %v5704_v41, %v195_v52 }
 0x220   :  { %v5706_v46 = vpop.eup %5705 }
 0x221   :  { %5082 = vmatmul.mubr.msk.bf16.vlgmr.msra.gmra.mrb[0].mxu1 %vm170_vm2, %v256_v43  ;;  %v236_v47 = vmul.f32 %v5706_v46, %v196_v54  ;;  %v244_v42 = vmul.f32 %v6197_v10, %v235_v45 }
 0x222   :  { %5085 = vmatprep.mubr.msk.bf16.mxu1 %vm6049_vm0, %v6048_v0 }
 0x223   :  { %v245_v44 = vmul.f32 %v6197_v10, %v236_v47  ;;  %v253_v48 = vadd.f32 %v249_v37, %v244_v42 }
 0x225   :  { %v254_v49 = vadd.f32 %v249_v37, %v245_v44 }
 0x226   :  { %v5708_v50 = vpop.eup %5707 }
 0x227   :  { %v257_v51 = vpack.c.bf16 %v254_v49, %v253_v48  ;;  %v237_v53 = vmul.f32 %v5708_v50, %v197_v61 }
 0x229   :  { %5086 = vmatmul.mubr.msk.bf16.gmra.mrb[4].mxu1 %vm170_vm2, %v257_v51  ;;  %v246_v52 = vmul.f32 %v6197_v10, %v237_v53 }
 0x22a   :  { %5089 = vmatprep.mubr.msk.bf16.mxu1 %vm6049_vm0, %v6048_v0 }
 0x22b   :  { %v255_v54 = vadd.f32 %v249_v37, %v246_v52 }
 0x22d   :  { %v258_v55 = vpack.c.bf16 %v255_v54, %v255_v54 }
 0x231   :  { %5090 = vmatmul.mubr.msk.bf16.gmra.mrb[8].mxu1 %vm170_vm2, %v258_v55 }
 0x232   :  { %5099 = vmatprep.mubr.msk.bf16.mxu1 %vm6049_vm0, %v6048_v0 }
 0x2f4   :  { %v312_v58 = vpop.f32.mrb[0].mxu1 }
 0x2f5   :  { %v5083_v59 = vpop.f32.mrb[1].mxu1  ;;  %v313_v61 = vadd.f32 %v312_v58, %v262_v57 }
 0x2f6   :  { %v315_v60 = vpop.f32.mrb[2].mxu1 }
 0x2f7   :  { %v316_v62 = vadd.f32 %v315_v60, %v262_v57  ;;  %v5084_v63 = vpop.f32.mrb[3].mxu1 }
 0x2f9   :  { %v6222_v1 = vpack.c.bf16 %v316_v62, %v313_v61 }
 0x2fb   :  { %487 = vrot.lane.b32.xlu1 %v6222_v1, %s6052_s20 }
 0x2fc   :  { %v320_v11 = vpop.f32.mrb[4].mxu1 }
 0x2fd   :  { %v5087_v12 = vpop.f32.mrb[5].mxu1  ;;  %v321_v14 = vadd.f32 %v320_v11, %v262_v57 }
 0x2fe   :  { %v323_v13 = vpop.f32.mrb[6].mxu1 }
 0x2ff   :  { %v324_v16 = vadd.f32 %v323_v13, %v262_v57  ;;  %v5088_v17 = vpop.f32.mrb[7].mxu1 }
 0x301   :  { %v6226_v18 = vpack.c.bf16 %v324_v16, %v321_v14 }
 0x303   :  { %489 = vrot.lane.b32.xlu1 %v6226_v18, %s6052_s20 }
 0x304   :  { %v328_v8 = vpop.f32.mrb[8].mxu1 }
 0x305   :  { %v329_v20 = vadd.f32 %v328_v8, %v262_v57  ;;  %v5091_v21 = vpop.f32.mrb[9].mxu1 }
 0x306   :  { %v331_v22 = vpop.f32.mrb[10].mxu1 }
 0x307   :  { %v6230_v23 = vpack.c.bf16 %v329_v20, %v329_v20  ;;  %481 = vrot.lane.b32.xlu1 %v6222_v1, %s6053_s21  ;;  %v5092_v24 = vpop.f32.mrb[11].mxu1 }
 0x309   :  { %491 = vrot.lane.b32.xlu0 %v6230_v23, %s6052_s20 }
 0x30b   :  { %485 = vrot.lane.b32.xlu1 %v6230_v23, %s6053_s21 }
 0x30d   :  { %483 = vrot.lane.b32.xlu0 %v6226_v18, %s6053_s21 }
 0x36d   :  { %v488_v26 = vpop.permute.xlu1 %487 }
 0x36e   :  { %v503_v27 = vsel %vm346_vm4, %v488_v26, 0 }
 0x36f   :  { %5112 = vmatpush3.bf16.xpose.msra.mxu0 %v503_v27 }
 0x370   :  { %5113 = vmatprep.subr.bf16.mxu0 %v6048_v0 }
 0x375   :  { %v490_v29 = vpop.permute.xlu1 %489 }
 0x376   :  { %v506_v30 = vsel %vm346_vm4, %v490_v29, 0 }
 0x377   :  { %5114 = vmatpush3.bf16.xpose.msra.mxu0 %v506_v30 }
 0x378   :  { %5115 = vmatprep.subr.bf16.mxu0 %v6048_v0 }
 0x379   :  { %v482_v33 = vpop.permute.xlu1 %481 }
 0x37b   :  { %v492_v31 = vpop.permute.xlu0 %491 }
 0x37c   :  { %v509_v32 = vsel %vm346_vm4, %v492_v31, 0 }
 0x37d   :  { %v486_v36 = vpop.permute.xlu1 %485 }
 0x37f   :  { %5116 = vmatpush3.bf16.xpose.msra.mxu0 %v509_v32  ;;  %v484_v35 = vpop.permute.xlu0 %483 }
 0x380   :  { %5147 = vmatprep.subr.bf16.mxu0 %v6048_v0 }
 0x386   :  { %5118 = vmatmul.mubr.msk.bf16.vlgmr.msra.gmra.mrb[12].mxu0 %vm346_vm4, %v482_v33 }
 0x387   :  { %5121 = vmatprep.mubr.msk.bf16.mxu0 %vm6049_vm0, %v6048_v0 }
 0x38e   :  { %5122 = vmatmul.mubr.msk.bf16.gmra.mrb[16].mxu0 %vm346_vm4, %v484_v35 }
 0x38f   :  { %5125 = vmatprep.mubr.msk.bf16.mxu0 %vm6049_vm0, %v6048_v0 }
 0x396   :  { %5126 = vmatmul.mubr.msk.bf16.gmra.mrb[20].mxu0 %vm346_vm4, %v486_v36 }
 0x397   :  { %5153 = vmatprep.mubr.msk.bf16.mxu0 %vm6049_vm0, %v6048_v0 }
 0x459   :  { %v545_v37 = vpop.f32.mrb[12].mxu0 }
 0x45a   :  { %v546_v38 = vadd.f32 %v545_v37, %v6107_v3  ;;  %v5119_v39 = vpop.f32.mrb[13].mxu0 }
 0x45b   :  { %v548_v40 = vpop.f32.mrb[14].mxu0 }
 0x45c   :  { %v549_v41 = vadd.f32 %v548_v40, %v6123_v6  ;;  %v5120_v43 = vpop.f32.mrb[15].mxu0  ;;  %v567_v45 = vsel %vm421_vm5, %v546_v38, -inf }
 0x45d   :  { %568 = vmax.xlane.f32.xlu0 %v567_v45 }
 0x45e   :  { %v570_v46 = vsel %vm421_vm5, %v549_v41, -inf }
 0x45f   :  { %571 = vmax.xlane.f32.xlu1 %v570_v46 }
 0x461   :  { %v553_v47 = vpop.f32.mrb[16].mxu0 }
 0x462   :  { %v554_v42 = vadd.f32 %v553_v47, %v6117_v5  ;;  %v5123_v44 = vpop.f32.mrb[17].mxu0 }
 0x463   :  { %v556_v48 = vpop.f32.mrb[18].mxu0 }
 0x464   :  { %v557_v49 = vadd.f32 %v556_v48, %v6130_v7  ;;  %v5124_v50 = vpop.f32.mrb[19].mxu0  ;;  %v573_v51 = vsel %vm421_vm5, %v554_v42, -inf }
 0x465   :  { %574 = vmax.xlane.f32.xlu0 %v573_v51 }
 0x466   :  { %v576_v53 = vsel %vm421_vm5, %v557_v49, -inf }
 0x469   :  { %577 = vmax.xlane.f32.xlu0 %v576_v53  ;;  %v561_v52 = vpop.f32.mrb[20].mxu0 }
 0x46a   :  { %v5127_v54 = vpop.f32.mrb[21].mxu0  ;;  %v562_v58 = vadd.f32 %v561_v52, %v6142_v9 }
 0x46b   :  { %v564_v55 = vpop.f32.mrb[22].mxu0 }
 0x46c   :  { %v5128_v57 = vpop.f32.mrb[23].mxu0  ;;  %v579_v59 = vsel %vm434_vm6, %v562_v58, -inf }
 0x470   :  { %342 = vrot.lane.b32.xlu1 %v6226_v18, %s6054_s22 }
 0x47f   :  { %340 = vrot.lane.b32.xlu0 %v6222_v1, %s6054_s22 }
 0x494   :  { %580 = vmax.xlane.f32.xlu1 %v579_v59 }
 0x4a5   :  { %344 = vrot.lane.b32.xlu1 %v6230_v23, %s6054_s22 }
 0x4a9   :  { %625 = vrot.lane.b32.xlu1 %v6222_v1, %s6055_s23 }
 0x4ea   :  { %v569_v60 = vpop.xlane.xlu0 %568 }
 0x4eb   :  { %v582_v61 = vsub.f32 %v546_v38, %v569_v60 }
 0x4ec   :  { %v572_v62 = vpop.xlane.xlu1 %571 }
 0x4ed   :  { %v587_v63 = vmul.f32 1.442695, %v582_v61  ;;  %v583_v11 = vsub.f32 %v549_v41, %v572_v62 }
 0x4ef   :  { %5709 = vpow2.f32 %v587_v63  ;;  %v589_v12 = vmul.f32 1.442695, %v583_v11 }
 0x4f0   :  { %v343_v30 = vpop.permute.xlu1 %342 }
 0x4f1   :  { %5711 = vpow2.f32 %v589_v12  ;;  %v360_v33 = vsel %vm346_vm4, %v343_v30, 0 }
 0x4f2   :  { %v575_v13 = vpop.xlane.xlu0 %574 }
 0x4f3   :  { %v584_v14 = vsub.f32 %v554_v42, %v575_v13 }
 0x4f5   :  { %v591_v16 = vmul.f32 1.442695, %v584_v14 }
 0x4f6   :  { %v578_v17 = vpop.xlane.xlu0 %577 }
 0x4f7   :  { %5713 = vpow2.f32 %v591_v16  ;;  %v585_v8 = vsub.f32 %v557_v49, %v578_v17 }
 0x4f9   :  { %v6273_v20 = vpop.eup %5709  ;;  %v593_v21 = vmul.f32 1.442695, %v585_v8 }
 0x4fa   :  { %v341_v22 = vpop.permute.xlu0 %340  ;;  %v597_v24 = vsel %vm421_vm5, %v6273_v20, 0.0 }
 0x4fb   :  { %v6277_v26 = vpop.eup %5711  ;;  %5715 = vpow2.f32 %v593_v21  ;;  %v357_v27 = vsel %vm346_vm4, %v341_v22, 0  ;;  %598 = vadd.xlane.f32.xlu0 %v597_v24 }
 0x4fc   :  { %5094 = vmatpush3.bf16.xpose.msra.mxu1 %v357_v27  ;;  %v600_v29 = vsel %vm421_vm5, %v6277_v26, 0.0 }
 0x4fd   :  { %601 = vadd.xlane.f32.xlu1 %v600_v29  ;;  %5095 = vmatprep.subr.bf16.mxu1 %v6048_v0 }
 0x501   :  { %v6283_v31 = vpop.eup %5713 }
 0x502   :  { %v603_v32 = vsel %vm421_vm5, %v6283_v31, 0.0 }
 0x503   :  { %604 = vadd.xlane.f32.xlu0 %v603_v32 }
 0x504   :  { %5096 = vmatpush3.bf16.xpose.msra.mxu1 %v360_v33 }
 0x505   :  { %v6288_v35 = vpop.eup %5715  ;;  %5097 = vmatprep.subr.bf16.mxu1 %v6048_v0 }
 0x506   :  { %v606_v36 = vsel %vm421_vm5, %v6288_v35, 0.0 }
 0x507   :  { %607 = vadd.xlane.f32.xlu0 %v606_v36 }
 0x50e   :  { %629 = vrot.lane.b32.xlu1 %v6230_v23, %s6055_s23 }
 0x512   :  { %784 = vrot.lane.b32.xlu1 %v6222_v1, %s6056_s24 }
 0x516   :  { %786 = vrot.lane.b32.xlu1 %v6226_v18, %s6056_s24 }
 0x51a   :  { %778 = vrot.lane.b32.xlu1 %v6222_v1, %s6051_s17 }
 0x51d   :  { %627 = vrot.lane.b32.xlu0 %v6226_v18, %s6055_s23 }
 0x51e   :  { %780 = vrot.lane.b32.xlu1 %v6226_v18, %s6051_s17 }
 0x521   :  { %v581_v37 = vpop.xlane.xlu1 %580 }
 0x522   :  { %782 = vrot.lane.b32.xlu1 %v6230_v23, %s6051_s17  ;;  %v586_v39 = vsub.f32 %v562_v58, %v581_v37 }
 0x524   :  { %v595_v41 = vmul.f32 1.442695, %v586_v39 }
 0x525   :  { %v345_v38 = vpop.permute.xlu1 %344 }
 0x526   :  { %v363_v40 = vsel %vm346_vm4, %v345_v38, 0  ;;  %1003 = vrot.lane.b32.xlu1 %v6222_v1, %s6057_s25  ;;  %5717 = vpow2.f32 %v595_v41 }
 0x527   :  { %5098 = vmatpush3.bf16.xpose.msra.mxu1 %v363_v40 }
 0x528   :  { %5129 = vmatprep.subr.bf16.mxu1 %v6048_v0 }
 0x529   :  { %v626_v43 = vpop.permute.xlu1 %625 }
 0x52a   :  { %1007 = vrot.lane.b32.xlu1 %v6230_v23, %s6057_s25 }
 0x52e   :  { %5100 = vmatmul.mubr.msk.bf16.vlgmr.msra.gmra.mrb[12].mxu1 %vm346_vm4, %v6222_v1 }
 0x52f   :  { %5130 = vmatpush3.bf16.msra.mxu1 %v626_v43  ;;  %5103 = vmatprep.mubr.msk.bf16.mxu1 %vm6049_vm0, %v6048_v0 }
 0x530   :  { %5131 = vmatprep.subr.bf16.mxu1 %v6048_v0  ;;  %v5718_v45 = vpop.eup %5717 }
 0x531   :  { %v609_v46 = vsel %vm434_vm6, %v5718_v45, 0.0 }
 0x536   :  { %5104 = vmatmul.mubr.msk.bf16.gmra.mrb[16].mxu1 %vm346_vm4, %v6226_v18 }
 0x537   :  { %5107 = vmatprep.mubr.msk.bf16.mxu1 %vm6049_vm0, %v6048_v0 }
 0x53c   :  { %610 = vadd.xlane.f32.xlu0 %v609_v46 }
 0x53e   :  { %5108 = vmatmul.mubr.msk.bf16.gmra.mrb[20].mxu1 %vm346_vm4, %v6230_v23 }
 0x53f   :  { %5135 = vmatprep.mubr.msk.bf16.mxu1 %vm6049_vm0, %v6048_v0 }
 0x552   :  { %788 = vrot.lane.b32.xlu0 %v6230_v23, %s6056_s24 }
 0x556   :  { %1009 = vrot.lane.b32.xlu0 %v6222_v1, %s6058_s27 }
 0x55a   :  { %1011 = vrot.lane.b32.xlu0 %v6226_v18, %s6058_s27 }
 0x55e   :  { %1013 = vrot.lane.b32.xlu0 %v6230_v23, %s6058_s27 }
 0x562   :  { %1005 = vrot.lane.b32.xlu0 %v6226_v18, %s6057_s25 }
 0x588   :  { %v599_v42 = vpop.xlane.xlu0 %598 }
 0x58a   :  { %v602_v47 = vpop.xlane.xlu1 %601 }
 0x58b   :  { %5719 = vrcp.f32 %v602_v47 }
 0x58c   :  { %5721 = vrcp.f32 %v599_v42 }
 0x58e   :  { %v630_v53 = vpop.permute.xlu1 %629 }
 0x58f   :  { %v644_v55 = vsel %vm642_vm7, %v630_v53, 0 }
 0x590   :  { %v605_v44 = vpop.xlane.xlu0 %604 }
 0x592   :  { %v785_v60 = vpop.permute.xlu1 %784 }
 0x593   :  { %v800_v63 = vsel %vm346_vm4, %v785_v60, 0 }
 0x594   :  { %v608_v48 = vpop.xlane.xlu0 %607 }
 0x595   :  { %5723 = vrcp.f32 %v608_v48  ;;  %v5720_v49 = vpop.eup %5719 }
 0x596   :  { %5725 = vrcp.f32 %v605_v44  ;;  %v5722_v51 = vpop.eup %5721  ;;  %v618_v52 = vmul.f32 %v5720_v49, %v6277_v26  ;;  %v787_v12 = vpop.permute.xlu1 %786 }
 0x597   :  { %v617_v54 = vmul.f32 %v5722_v51, %v6273_v20  ;;  %v803_v13 = vsel %vm346_vm4, %v787_v12, 0 }
 0x598   :  { %v628_v50 = vpop.permute.xlu0 %627 }
 0x599   :  { %5132 = vmatpush3.bf16.msra.mxu1 %v628_v50  ;;  %v622_v57 = vpack.c.bf16 %v618_v52, %v617_v54 }
 0x59a   :  { %5133 = vmatprep.subr.bf16.mxu1 %v6048_v0  ;;  %v779_v24 = vpop.permute.xlu1 %778 }
 0x59d   :  { %5134 = vmatpush3.bf16.msra.mxu1 %v644_v55 }
 0x59e   :  { %5165 = vmatprep.subr.bf16.mxu1 %v6048_v0  ;;  %v781_v29 = vpop.permute.xlu1 %780 }
 0x59f   :  { %v5724_v58 = vpop.eup %5723 }
 0x5a0   :  { %5136 = vmatmul.mubr.msk.bf16.vlgmr.msra.gmra.mrb[24].mxu1 %vm421_vm5, %v622_v57  ;;  %v5726_v59 = vpop.eup %5725  ;;  %v620_v61 = vmul.f32 %v5724_v58, %v6288_v35 }
 0x5a1   :  { %5139 = vmatprep.mubr.msk.bf16.mxu1 %vm6049_vm0, %v6048_v0  ;;  %v619_v62 = vmul.f32 %v5726_v59, %v6283_v31 }
 0x5a2   :  { %v783_v32 = vpop.permute.xlu1 %782 }
 0x5a3   :  { %v623_v11 = vpack.c.bf16 %v620_v61, %v619_v62 }
 0x5a6   :  { %5166 = vmatpush3.bf16.xpose.msra.mxu1 %v800_v63  ;;  %v1004_v35 = vpop.permute.xlu1 %1003 }
 0x5a7   :  { %5167 = vmatprep.subr.bf16.mxu1 %v6048_v0 }
 0x5a8   :  { %5140 = vmatmul.mubr.msk.bf16.gmra.mrb[28].mxu1 %vm421_vm5, %v623_v11 }
 0x5a9   :  { %5143 = vmatprep.mubr.msk.bf16.mxu1 %vm6049_vm0, %v6048_v0 }
 0x5aa   :  { %v1008_v47 = vpop.permute.xlu1 %1007 }
 0x5ae   :  { %5168 = vmatpush3.bf16.xpose.msra.mxu1 %v803_v13 }
 0x5af   :  { %5169 = vmatprep.subr.bf16.mxu1 %v6048_v0 }
 0x5c9   :  { %v611_v14 = vpop.xlane.xlu0 %610 }
 0x5ca   :  { %5727 = vrcp.f32 %v611_v14 }
 0x5cd   :  { %v789_v16 = vpop.permute.xlu0 %788 }
 0x5ce   :  { %v806_v17 = vsel %vm346_vm4, %v789_v16, 0 }
 0x5cf   :  { %5170 = vmatpush3.bf16.xpose.msra.mxu1 %v806_v17 }
 0x5d0   :  { %5201 = vmatprep.subr.bf16.mxu1 %v6048_v0 }
 0x5d1   :  { %v1010_v22 = vpop.permute.xlu0 %1009 }
 0x5d2   :  { %v1025_v26 = vsel %vm346_vm4, %v1010_v22, 0 }
 0x5d4   :  { %v5728_v8 = vpop.eup %5727 }
 0x5d5   :  { %v621_v20 = vmul.f32 %v5728_v8, %v5718_v45  ;;  %v1012_v27 = vpop.permute.xlu0 %1011 }
 0x5d6   :  { %v1028_v30 = vsel %vm346_vm4, %v1012_v27, 0 }
 0x5d7   :  { %v624_v21 = vpack.c.bf16 %v621_v20, %v621_v20 }
 0x5d9   :  { %5144 = vmatmul.mubr.msk.bf16.gmra.mrb[32].mxu1 %vm421_vm5, %v624_v21  ;;  %v1014_v31 = vpop.permute.xlu0 %1013 }
 0x5da   :  { %5171 = vmatprep.mubr.msk.bf16.mxu1 %vm6049_vm0, %v6048_v0  ;;  %v1031_v33 = vsel %vm346_vm4, %v1014_v31, 0 }
 0x5dd   :  { %v1006_v36 = vpop.permute.xlu0 %1005 }
 0x5e1   :  { %5172 = vmatmul.mubr.msk.bf16.vlgmr.msra.gmra.mrb[36].mxu1 %vm346_vm4, %v779_v24 }
 0x5e2   :  { %5202 = vmatpush3.bf16.xpose.msra.mxu1 %v1025_v26  ;;  %5175 = vmatprep.mubr.msk.bf16.mxu1 %vm6049_vm0, %v6048_v0 }
 0x5e3   :  { %5203 = vmatprep.subr.bf16.mxu1 %v6048_v0 }
 0x5e9   :  { %5176 = vmatmul.mubr.msk.bf16.gmra.mrb[40].mxu1 %vm346_vm4, %v781_v29 }
 0x5ea   :  { %5204 = vmatpush3.bf16.xpose.msra.mxu1 %v1028_v30  ;;  %5179 = vmatprep.mubr.msk.bf16.mxu1 %vm6049_vm0, %v6048_v0 }
 0x5eb   :  { %5205 = vmatprep.subr.bf16.mxu1 %v6048_v0 }
 0x5f1   :  { %5180 = vmatmul.mubr.msk.bf16.gmra.mrb[44].mxu1 %vm346_vm4, %v783_v32 }
 0x5f2   :  { %5206 = vmatpush3.bf16.xpose.msra.mxu1 %v1031_v33  ;;  %5207 = vmatprep.mubr.msk.bf16.mxu1 %vm6049_vm0, %v6048_v0 }
 0x5f3   :  { %5237 = vmatprep.subr.bf16.mxu1 %v6048_v0 }
 0x5f9   :  { %5208 = vmatmul.mubr.msk.bf16.vlgmr.msra.gmra.mrb[48].mxu1 %vm346_vm4, %v1004_v35 }
 0x5fa   :  { %5211 = vmatprep.mubr.msk.bf16.mxu1 %vm6049_vm0, %v6048_v0 }
 0x601   :  { %v399_v37 = vpop.f32.mrb[12].mxu1  ;;  %5212 = vmatmul.mubr.msk.bf16.gmra.mrb[52].mxu1 %vm346_vm4, %v1006_v36 }
 0x602   :  { %v400_v38 = vadd.f32 %v399_v37, %v6107_v3  ;;  %v5101_v39 = vpop.f32.mrb[13].mxu1  ;;  %5215 = vmatprep.mubr.msk.bf16.mxu1 %vm6049_vm0, %v6048_v0 }
 0x603   :  { %v402_v40 = vpop.f32.mrb[14].mxu1 }
 0x604   :  { %v403_v41 = vadd.f32 %v402_v40, %v6123_v6  ;;  %v5102_v43 = vpop.f32.mrb[15].mxu1  ;;  %v422_v45 = vsel %vm421_vm5, %v400_v38, -inf }
 0x605   :  { %423 = vmax.xlane.f32.xlu0 %v422_v45 }
 0x606   :  { %v425_v46 = vsel %vm421_vm5, %v403_v41, -inf }
 0x607   :  { %426 = vmax.xlane.f32.xlu1 %v425_v46 }
 0x609   :  { %v407_v42 = vpop.f32.mrb[16].mxu1  ;;  %5216 = vmatmul.mubr.msk.bf16.gmra.mrb[56].mxu1 %vm346_vm4, %v1008_v47 }
 0x60a   :  { %v408_v3 = vadd.f32 %v407_v42, %v6117_v5  ;;  %v5105_v44 = vpop.f32.mrb[17].mxu1  ;;  %5239 = vmatprep.mubr.msk.bf16.mxu1 %vm6049_vm0, %v6048_v0 }
 0x60b   :  { %v410_v48 = vpop.f32.mrb[18].mxu1 }
 0x60c   :  { %v411_v6 = vadd.f32 %v410_v48, %v6130_v7  ;;  %v5106_v49 = vpop.f32.mrb[19].mxu1  ;;  %v428_v50 = vsel %vm421_vm5, %v408_v3, -inf }
 0x60d   :  { %429 = vmax.xlane.f32.xlu0 %v428_v50 }
 0x60e   :  { %v431_v51 = vsel %vm421_vm5, %v411_v6, -inf }
 0x611   :  { %432 = vmax.xlane.f32.xlu0 %v431_v51  ;;  %v415_v53 = vpop.f32.mrb[20].mxu1 }
 0x612   :  { %v6392_v52 = vadd.f32 %v415_v53, %v6142_v9  ;;  %v5109_v54 = vpop.f32.mrb[21].mxu1 }
 0x613   :  { %v418_v5 = vpop.f32.mrb[22].mxu1 }
 0x614   :  { %v5110_v55 = vpop.f32.mrb[23].mxu1  ;;  %v435_v57 = vsel %vm434_vm6, %v6392_v52, -inf }
 0x615   :  { %436 = vmax.xlane.f32.xlu1 %v435_v57 }
 0x673   :  { %v6396_v58 = vpop.f32.mrb[24].mxu1 }
 0x674   :  { %v5137_v7 = vpop.f32.mrb[25].mxu1 }
 0x675   :  { %v6398_v59 = vpop.f32.mrb[26].mxu1 }
 0x676   :  { %v5138_v60 = vpop.f32.mrb[27].mxu1 }
 0x67b   :  { %v6400_v61 = vpop.f32.mrb[28].mxu1 }
 0x67c   :  { %v5141_v62 = vpop.f32.mrb[29].mxu1 }
 0x67d   :  { %v6402_v63 = vpop.f32.mrb[30].mxu1 }
 0x67e   :  { %v5142_v9 = vpop.f32.mrb[31].mxu1 }
 0x692   :  { %v424_v11 = vpop.xlane.xlu0 %423 }
 0x693   :  { %v438_v12 = vsub.f32 %v400_v38, %v424_v11 }
 0x694   :  { %v427_v13 = vpop.xlane.xlu1 %426 }
 0x695   :  { %v443_v14 = vmul.f32 1.442695, %v438_v12  ;;  %v439_v16 = vsub.f32 %v403_v41, %v427_v13 }
 0x697   :  { %5729 = vpow2.f32 %v443_v14  ;;  %v445_v17 = vmul.f32 1.442695, %v439_v16 }
 0x699   :  { %5731 = vpow2.f32 %v445_v17  ;;  %v6031_v17 = vld [vmem:[%s8060_s1] sm:$0xff] }
 0x69a   :  { %v430_v8 = vpop.xlane.xlu0 %429 }
 0x69b   :  { %v440_v20 = vsub.f32 %v408_v3, %v430_v8 }
 0x69d   :  { %v447_v21 = vmul.f32 1.442695, %v440_v20 }
 0x69e   :  { %v433_v22 = vpop.xlane.xlu0 %432 }
 0x69f   :  { %5733 = vpow2.f32 %v447_v21  ;;  %v441_v24 = vsub.f32 %v411_v6, %v433_v22  ;;  %v6032_v21 = vld [vmem:[%s8060_s1 + $0x8] sm:$0xff] }
 0x6a1   :  { %v6404_v26 = vpop.eup %5729  ;;  %v449_v27 = vmul.f32 1.442695, %v441_v24  ;;  %v6033_v24 = vld [vmem:[%s8060_s1 + $0x10] sm:$0xff] }
 0x6a2   :  { %v453_v29 = vsel %vm421_vm5, %v6404_v26, 0.0  ;;  %v437_v50 = vpop.xlane.xlu1 %436 }
 0x6a3   :  { %v6408_v30 = vpop.eup %5731  ;;  %5735 = vpow2.f32 %v449_v27  ;;  %454 = vadd.xlane.f32.xlu0 %v453_v29  ;;  %v442_v53 = vsub.f32 %v6392_v52, %v437_v50 }
 0x6a4   :  { %v456_v31 = vsel %vm421_vm5, %v6408_v30, 0.0 }
 0x6a5   :  { %457 = vadd.xlane.f32.xlu1 %v456_v31  ;;  %v451_v55 = vmul.f32 1.442695, %v442_v53  ;;  %v6034_v31 = vld [vmem:[%s8060_s1 + $0x18] sm:$0xff] }
 0x6a7   :  { %5737 = vpow2.f32 %v451_v55 }
 0x6a9   :  { %v6412_v32 = vpop.eup %5733 }
 0x6aa   :  { %v459_v33 = vsel %vm421_vm5, %v6412_v32, 0.0 }
 0x6ab   :  { %460 = vadd.xlane.f32.xlu0 %v459_v33 }
 0x6ac   :  { %v6416_v35 = vpop.f32.mrb[32].mxu1 }
 0x6ad   :  { %v6418_v36 = vpop.eup %5735  ;;  %v5145_v37 = vpop.f32.mrb[33].mxu1 }
 0x6ae   :  { %v699_v38 = vpop.f32.mrb[34].mxu1  ;;  %v462_v39 = vsel %vm421_vm5, %v6418_v36, 0.0  ;;  %v6035_v37 = vld [vmem:[%s8060_s1 + $0x20] sm:$0x3] }
 0x6af   :  { %v5146_v40 = vpop.f32.mrb[35].mxu1  ;;  %463 = vadd.xlane.f32.xlu1 %v462_v39 }
 0x6b1   :  { %v6429_v12 = vpop.eup %5737 }
 0x6b2   :  { %v465_v20 = vsel %vm434_vm6, %v6429_v12, 0.0 }
 0x6b4   :  { %v842_v41 = vpop.f32.mrb[36].mxu1 }
 0x6b5   :  { %v5173_v43 = vpop.f32.mrb[37].mxu1  ;;  %v6434_v52 = vadd.f32 %v6031_v17, %v842_v41 }
 0x6b6   :  { %v845_v45 = vpop.f32.mrb[38].mxu1 }
 0x6b7   :  { %v5174_v46 = vpop.f32.mrb[39].mxu1  ;;  %v6441_v22 = vadd.f32 %v6032_v21, %v845_v45  ;;  %v864_v29 = vsel %vm421_vm5, %v6434_v52, -inf }
 0x6b9   :  { %v867_v39 = vsel %vm421_vm5, %v6441_v22, -inf }
 0x6bc   :  { %v850_v47 = vpop.f32.mrb[40].mxu1 }
 0x6bd   :  { %v5177_v42 = vpop.f32.mrb[41].mxu1  ;;  %v6446_v27 = vadd.f32 %v6033_v24, %v850_v47 }
 0x6be   :  { %v853_v3 = vpop.f32.mrb[42].mxu1 }
 0x6bf   :  { %v5178_v44 = vpop.f32.mrb[43].mxu1  ;;  %v6453_v33 = vadd.f32 %v6034_v31, %v853_v3  ;;  %v870_v40 = vsel %vm421_vm5, %v6446_v27, -inf }
 0x6c0   :  { %702 = vrot.lane.b32.xlu1 %v6222_v1, %s6050_s26 }
 0x6c1   :  { %704 = vrot.lane.b32.xlu0 %v6226_v18, %s6050_s26  ;;  %v873_v45 = vsel %vm421_vm5, %v6453_v33, -inf }
 0x6c4   :  { %v858_v48 = vpop.f32.mrb[44].mxu1  ;;  %706 = vrot.lane.b32.xlu1 %v6230_v23, %s6050_s26 }
 0x6c5   :  { %v5181_v6 = vpop.f32.mrb[45].mxu1  ;;  %v6458_v38 = vadd.f32 %v6035_v37, %v858_v48 }
 0x6c6   :  { %v861_v49 = vpop.f32.mrb[46].mxu1 }
 0x6c7   :  { %v5182_v51 = vpop.f32.mrb[47].mxu1  ;;  %v876_v46 = vsel %vm434_vm6, %v6458_v38, -inf }
 0x6cc   :  { %v1067_v54 = vpop.f32.mrb[48].mxu1 }
 0x6cd   :  { %v5209_v5 = vpop.f32.mrb[49].mxu1  ;;  %v6464_v41 = vadd.f32 %v6031_v17, %v1067_v54 }
 0x6ce   :  { %v1070_v57 = vpop.f32.mrb[50].mxu1 }
 0x6cf   :  { %v5210_v7 = vpop.f32.mrb[51].mxu1  ;;  %v6466_v43 = vadd.f32 %v6032_v21, %v1070_v57  ;;  %v1089_v47 = vsel %vm421_vm5, %v6464_v41, -inf }
 0x6d1   :  { %v1092_v42 = vsel %vm421_vm5, %v6466_v43, -inf }
 0x6d4   :  { %v1075_v60 = vpop.f32.mrb[52].mxu1 }
 0x6d5   :  { %v5213_v62 = vpop.f32.mrb[53].mxu1  ;;  %v6480_v3 = vadd.f32 %v6033_v24, %v1075_v60 }
 0x6d6   :  { %v1078_v9 = vpop.f32.mrb[54].mxu1 }
 0x6d7   :  { %v5214_v11 = vpop.f32.mrb[55].mxu1  ;;  %v6482_v44 = vadd.f32 %v6034_v31, %v1078_v9  ;;  %v1095_v6 = vsel %vm421_vm5, %v6480_v3, -inf }
 0x6d9   :  { %v1098_v49 = vsel %vm421_vm5, %v6482_v44, -inf }
 0x6dc   :  { %v1083_v13 = vpop.f32.mrb[56].mxu1 }
 0x6dd   :  { %v5217_v14 = vpop.f32.mrb[57].mxu1  ;;  %v6484_v48 = vadd.f32 %v6035_v37, %v1083_v13 }
 0x6de   :  { %v1086_v16 = vpop.f32.mrb[58].mxu1 }
 0x6df   :  { %v5218_v8 = vpop.f32.mrb[59].mxu1  ;;  %v1101_v50 = vsel %vm434_vm6, %v6484_v48, -inf }
 0x6e0   :  { %466 = vadd.xlane.f32.xlu0 %v465_v20 }
 0x6e4   :  { %865 = vmax.xlane.f32.xlu0 %v864_v29 }
 0x6e8   :  { %868 = vmax.xlane.f32.xlu1 %v867_v39  ;;  %871 = vmax.xlane.f32.xlu0 %v870_v40 }
 0x6ec   :  { %874 = vmax.xlane.f32.xlu1 %v873_v45  ;;  %877 = vmax.xlane.f32.xlu0 %v876_v46 }
 0x6f0   :  { %1090 = vmax.xlane.f32.xlu1 %v1089_v47  ;;  %1093 = vmax.xlane.f32.xlu0 %v1092_v42 }
 0x701   :  { %924 = vrot.lane.b32.xlu1 %v6226_v18, %s6059_s13 }
 0x706   :  { %922 = vrot.lane.b32.xlu0 %v6222_v1, %s6059_s13 }
 0x725   :  { %1096 = vmax.xlane.f32.xlu1 %v1095_v6  ;;  %1099 = vmax.xlane.f32.xlu0 %v1098_v49 }
 0x729   :  { %1102 = vmax.xlane.f32.xlu1 %v1101_v50 }
 0x730   :  { %v455_v53 = vpop.xlane.xlu0 %454 }
 0x732   :  { %v458_v51 = vpop.xlane.xlu1 %457 }
 0x733   :  { %5739 = vrcp.f32 %v458_v51 }
 0x734   :  { %5741 = vrcp.f32 %v455_v53 }
 0x738   :  { %v461_v5 = vpop.xlane.xlu0 %460 }
 0x73a   :  { %926 = vrot.lane.b32.xlu1 %v6230_v23, %s6059_s13 }
 0x73c   :  { %v464_v54 = vpop.xlane.xlu1 %463  ;;  %v705_v7 = vpop.permute.xlu0 %704 }
 0x73d   :  { %5743 = vrcp.f32 %v464_v54  ;;  %v5740_v57 = vpop.eup %5739 }
 0x73e   :  { %5745 = vrcp.f32 %v461_v5  ;;  %v5742_v60 = vpop.eup %5741  ;;  %v474_v9 = vmul.f32 %v5740_v57, %v6408_v30 }
 0x73f   :  { %v473_v11 = vmul.f32 %v5742_v60, %v6404_v26 }
 0x740   :  { %v703_v55 = vpop.permute.xlu1 %702 }
 0x741   :  { %5148 = vmatpush3.bf16.msra.mxu0 %v703_v55  ;;  %v478_v14 = vpack.c.bf16 %v474_v9, %v473_v11 }
 0x742   :  { %5149 = vmatprep.subr.bf16.mxu0 %v6048_v0 }
 0x744   :  { %v707_v62 = vpop.permute.xlu1 %706 }
 0x745   :  { %5150 = vmatpush3.bf16.msra.mxu0 %v705_v7  ;;  %v720_v13 = vsel %vm642_vm7, %v707_v62, 0 }
 0x746   :  { %5151 = vmatprep.subr.bf16.mxu0 %v6048_v0 }
 0x747   :  { %v5744_v16 = vpop.eup %5743 }
 0x748   :  { %v5746_v17 = vpop.eup %5745  ;;  %v476_v8 = vmul.f32 %v5744_v16, %v6418_v36 }
 0x749   :  { %5152 = vmatpush3.bf16.msra.mxu0 %v720_v13  ;;  %v475_v30 = vmul.f32 %v5746_v17, %v6412_v32 }
 0x74a   :  { %5183 = vmatprep.subr.bf16.mxu0 %v6048_v0 }
 0x74b   :  { %v479_v20 = vpack.c.bf16 %v476_v8, %v475_v30 }
 0x74c   :  { %5154 = vmatmul.mubr.msk.bf16.vlgmr.msra.gmra.mrb[24].mxu0 %vm421_vm5, %v478_v14 }
 0x74d   :  { %5157 = vmatprep.mubr.msk.bf16.mxu0 %vm6049_vm0, %v6048_v0 }
 0x754   :  { %5158 = vmatmul.mubr.msk.bf16.gmra.mrb[28].mxu0 %vm421_vm5, %v479_v20 }
 0x755   :  { %5161 = vmatprep.mubr.msk.bf16.mxu0 %vm6049_vm0, %v6048_v0 }
 0x76d   :  { %v467_v26 = vpop.xlane.xlu0 %466 }
 0x76e   :  { %5747 = vrcp.f32 %v467_v26 }
 0x771   :  { %v866_v21 = vpop.xlane.xlu0 %865 }
 0x772   :  { %v879_v24 = vsub.f32 %v6434_v52, %v866_v21 }
 0x774   :  { %v884_v29 = vmul.f32 1.442695, %v879_v24 }
 0x775   :  { %v872_v31 = vpop.xlane.xlu0 %871  ;;  %v869_v37 = vpop.xlane.xlu1 %868 }
 0x776   :  { %5749 = vpow2.f32 %v884_v29  ;;  %v881_v39 = vsub.f32 %v6446_v27, %v872_v31  ;;  %v880_v36 = vsub.f32 %v6441_v22, %v869_v37 }
 0x778   :  { %v5748_v32 = vpop.eup %5747  ;;  %v886_v40 = vmul.f32 1.442695, %v880_v36  ;;  %v888_v45 = vmul.f32 1.442695, %v881_v39 }
 0x779   :  { %v878_v46 = vpop.xlane.xlu0 %877  ;;  %v875_v47 = vpop.xlane.xlu1 %874  ;;  %v477_v42 = vmul.f32 %v5748_v32, %v6429_v12 }
 0x77a   :  { %v882_v6 = vsub.f32 %v6453_v33, %v875_v47  ;;  %5751 = vpow2.f32 %v886_v40  ;;  %v883_v52 = vsub.f32 %v6458_v38, %v878_v46 }
 0x77b   :  { %v480_v49 = vpack.c.bf16 %v477_v42, %v477_v42  ;;  %5753 = vpow2.f32 %v888_v45 }
 0x77c   :  { %v890_v50 = vmul.f32 1.442695, %v882_v6  ;;  %v892_v54 = vmul.f32 1.442695, %v883_v52 }
 0x77d   :  { %v1094_v51 = vpop.xlane.xlu0 %1093  ;;  %5162 = vmatmul.mubr.msk.bf16.gmra.mrb[32].mxu0 %vm421_vm5, %v480_v49  ;;  %v1091_v27 = vpop.xlane.xlu1 %1090 }
 0x77e   :  { %v1104_v22 = vsub.f32 %v6464_v41, %v1091_v27  ;;  %5189 = vmatprep.mubr.msk.bf16.mxu0 %vm6049_vm0, %v6048_v0  ;;  %5755 = vpow2.f32 %v890_v50  ;;  %v1105_v16 = vsub.f32 %v6466_v43, %v1094_v51 }
 0x780   :  { %v6518_v53 = vpop.eup %5749  ;;  %v1109_v12 = vmul.f32 1.442695, %v1104_v22  ;;  %v1111_v8 = vmul.f32 1.442695, %v1105_v16 }
 0x781   :  { %v923_v33 = vpop.permute.xlu0 %922  ;;  %v894_v5 = vsel %vm421_vm5, %v6518_v53, 0.0  ;;  %v925_v41 = vpop.permute.xlu1 %924 }
 0x782   :  { %895 = vadd.xlane.f32.xlu1 %v894_v5  ;;  %5184 = vmatpush3.bf16.msra.mxu0 %v923_v33  ;;  %5757 = vpow2.f32 %v1109_v12 }
 0x783   :  { %5185 = vmatprep.subr.bf16.mxu0 %v6048_v0  ;;  %5759 = vpow2.f32 %v892_v54 }
 0x784   :  { %v6523_v38 = vpop.eup %5751  ;;  %5761 = vpow2.f32 %v1111_v8 }
 0x785   :  { %v897_v55 = vsel %vm421_vm5, %v6523_v38, 0.0  ;;  %v6527_v57 = vpop.eup %5753 }
 0x786   :  { %5186 = vmatpush3.bf16.msra.mxu0 %v925_v41  ;;  %898 = vadd.xlane.f32.xlu0 %v897_v55  ;;  %v900_v7 = vsel %vm421_vm5, %v6527_v57, 0.0 }
 0x787   :  { %5187 = vmatprep.subr.bf16.mxu0 %v6048_v0 }
 0x788   :  { %v6532_v60 = vpop.eup %5755 }
 0x789   :  { %v903_v9 = vsel %vm421_vm5, %v6532_v60, 0.0 }
 0x78a   :  { %901 = vadd.xlane.f32.xlu0 %v900_v7 }
 0x78c   :  { %v6534_v62 = vpop.eup %5757 }
 0x78d   :  { %v1119_v11 = vsel %vm421_vm5, %v6534_v62, 0.0  ;;  %v6540_v13 = vpop.eup %5759 }
 0x78e   :  { %904 = vadd.xlane.f32.xlu0 %v903_v9  ;;  %1120 = vadd.xlane.f32.xlu1 %v1119_v11  ;;  %v906_v14 = vsel %vm434_vm6, %v6540_v13, 0.0  ;;  %v6554_v43 = vpop.eup %5761 }
 0x792   :  { %907 = vadd.xlane.f32.xlu0 %v906_v14 }
 0x79f   :  { %1147 = vrot.lane.b32.xlu1 %v6222_v1, %s6060_s14 }
 0x7a8   :  { %1149 = vrot.lane.b32.xlu0 %v6226_v18, %s6060_s14 }
 0x7b2   :  { %v1097_v17 = vpop.xlane.xlu1 %1096  ;;  %v1100_v26 = vpop.xlane.xlu0 %1099 }
 0x7b3   :  { %v1106_v30 = vsub.f32 %v6480_v3, %v1097_v17  ;;  %v1107_v29 = vsub.f32 %v6482_v44, %v1100_v26  ;;  %v1122_v44 = vsel %vm421_vm5, %v6554_v43, 0.0 }
 0x7b5   :  { %v1113_v31 = vmul.f32 1.442695, %v1106_v30  ;;  %v1115_v18 = vmul.f32 1.442695, %v1107_v29 }
 0x7b6   :  { %v1103_v20 = vpop.xlane.xlu1 %1102 }
 0x7b7   :  { %v1108_v21 = vsub.f32 %v6484_v48, %v1103_v20 }
 0x7b9   :  { %v1117_v24 = vmul.f32 1.442695, %v1108_v21 }
 0x7ba   :  { %v927_v37 = vpop.permute.xlu1 %926 }
 0x7bb   :  { %5763 = vpow2.f32 %v1117_v24  ;;  %v940_v1 = vsel %vm642_vm7, %v927_v37, 0 }
 0x7bc   :  { %5188 = vmatpush3.bf16.msra.mxu0 %v940_v1  ;;  %5765 = vpow2.f32 %v1113_v31 }
 0x7bd   :  { %5219 = vmatprep.subr.bf16.mxu0 %v6048_v0  ;;  %5767 = vpow2.f32 %v1115_v18 }
 0x7c5   :  { %v6556_v3 = vpop.eup %5763 }
 0x7c6   :  { %v1131_v48 = vsel %vm434_vm6, %v6556_v3, 0.0  ;;  %v6562_v39 = vpop.eup %5765 }
 0x7c7   :  { %1132 = vadd.xlane.f32.xlu1 %v1131_v48  ;;  %1123 = vadd.xlane.f32.xlu0 %v1122_v44  ;;  %v1125_v36 = vsel %vm421_vm5, %v6562_v39, 0.0  ;;  %v6566_v32 = vpop.eup %5767 }
 0x7c8   :  { %v1128_v40 = vsel %vm421_vm5, %v6566_v32, 0.0 }
 0x7cb   :  { %1126 = vadd.xlane.f32.xlu0 %v1125_v36 }
 0x7cf   :  { %1129 = vadd.xlane.f32.xlu0 %v1128_v40 }
 0x7e5   :  { %1151 = vrot.lane.b32.xlu0 %v6230_v23, %s6060_s14 }
 0x7e9   :  { %1233 = vrot.lane.b32.xlu0 %v6197_v10, %s6050_s26 }
 0x80f   :  { %v896_v45 = vpop.xlane.xlu1 %895 }
 0x810   :  { %5769 = vrcp.f32 %v896_v45 }
 0x813   :  { %v899_v46 = vpop.xlane.xlu0 %898 }
 0x814   :  { %5771 = vrcp.f32 %v899_v46 }
 0x817   :  { %v902_v47 = vpop.xlane.xlu0 %901 }
 0x818   :  { %5773 = vrcp.f32 %v902_v47 }
 0x81a   :  { %v5770_v6 = vpop.eup %5769 }
 0x81b   :  { %v905_v42 = vpop.xlane.xlu0 %904  ;;  %v1121_v49 = vpop.xlane.xlu1 %1120  ;;  %v914_v51 = vmul.f32 %v5770_v6, %v6518_v53 }
 0x81c   :  { %5775 = vrcp.f32 %v905_v42 }
 0x81e   :  { %v5772_v52 = vpop.eup %5771 }
 0x81f   :  { %v756_v50 = vpop.f32.mrb[24].mxu0  ;;  %v915_v27 = vmul.f32 %v5772_v52, %v6523_v38  ;;  %v908_v23 = vpop.xlane.xlu0 %907 }
 0x820   :  { %v6577_v22 = vadd.f32 %v756_v50, %v6396_v58  ;;  %5777 = vrcp.f32 %v908_v23  ;;  %v5155_v12 = vpop.f32.mrb[25].mxu0  ;;  %v1148_v55 = vpop.permute.xlu1 %1147 }
 0x821   :  { %v919_v54 = vpack.c.bf16 %v915_v27, %v914_v51  ;;  %v759_v33 = vpop.f32.mrb[26].mxu0  ;;  %5779 = vrcp.f32 %v1121_v49 }
 0x822   :  { %v6580_v5 = vadd.f32 %v759_v33, %v6398_v59  ;;  %v5156_v41 = vpop.f32.mrb[27].mxu0  ;;  %v5774_v7 = vpop.eup %5773 }
 0x823   :  { %5190 = vmatmul.mubr.msk.bf16.vlgmr.msra.gmra.mrb[36].mxu0 %vm421_vm5, %v919_v54  ;;  %v1150_v38 = vpop.permute.xlu0 %1149  ;;  %v916_v59 = vmul.f32 %v5774_v7, %v6527_v57 }
 0x824   :  { %5220 = vmatpush3.bf16.msra.mxu0 %v1148_v55  ;;  %5193 = vmatprep.mubr.msk.bf16.mxu0 %vm6049_vm0, %v6048_v0 }
 0x825   :  { %5221 = vmatprep.subr.bf16.mxu0 %v6048_v0 }
 0x826   :  { %v5776_v58 = vpop.eup %5775 }
 0x827   :  { %v764_v53 = vpop.f32.mrb[28].mxu0  ;;  %v917_v14 = vmul.f32 %v5776_v58, %v6532_v60 }
 0x828   :  { %v765_v9 = vadd.f32 %v764_v53, %v6400_v61  ;;  %v5159_v11 = vpop.f32.mrb[29].mxu0  ;;  %5222 = vmatpush3.bf16.msra.mxu0 %v1150_v38 }
 0x829   :  { %v767_v16 = vpop.f32.mrb[30].mxu0  ;;  %v920_v30 = vpack.c.bf16 %v917_v14, %v916_v59  ;;  %5223 = vmatprep.subr.bf16.mxu0 %v6048_v0 }
 0x82a   :  { %v768_v17 = vadd.f32 %v767_v16, %v6402_v63  ;;  %v5160_v8 = vpop.f32.mrb[31].mxu0  ;;  %v5778_v20 = vpop.eup %5777 }
 0x82b   :  { %5194 = vmatmul.mubr.msk.bf16.gmra.mrb[40].mxu0 %vm421_vm5, %v920_v30  ;;  %v918_v61 = vmul.f32 %v5778_v20, %v6540_v13  ;;  %v5780_v1 = vpop.eup %5779 }
 0x82c   :  { %5197 = vmatprep.mubr.msk.bf16.mxu0 %vm6049_vm0, %v6048_v0  ;;  %v1139_v48 = vmul.f32 %v5780_v1, %v6534_v62 }
 0x82d   :  { %v921_v26 = vpack.c.bf16 %v918_v61, %v918_v61 }
 0x833   :  { %5198 = vmatmul.mubr.msk.bf16.gmra.mrb[44].mxu0 %vm421_vm5, %v921_v26 }
 0x834   :  { %5225 = vmatprep.mubr.msk.bf16.mxu0 %vm6049_vm0, %v6048_v0 }
 0x850   :  { %v772_v57 = vpop.f32.mrb[32].mxu0 }
 0x851   :  { %v773_v63 = vadd.f32 %v772_v57, %v6416_v35  ;;  %v5163_v60 = vpop.f32.mrb[33].mxu0 }
 0x852   :  { %v775_v21 = vpop.f32.mrb[34].mxu0 }
 0x853   :  { %v5164_v24 = vpop.f32.mrb[35].mxu0 }
 0x854   :  { %v1124_v29 = vpop.xlane.xlu0 %1123  ;;  %v1133_v18 = vpop.xlane.xlu1 %1132 }
 0x855   :  { %5781 = vrcp.f32 %v1124_v29 }
 0x858   :  { %v1127_v31 = vpop.xlane.xlu0 %1126 }
 0x859   :  { %5783 = vrcp.f32 %v1127_v31 }
 0x85c   :  { %v1130_v37 = vpop.xlane.xlu0 %1129 }
 0x85d   :  { %5785 = vrcp.f32 %v1130_v37 }
 0x85e   :  { %5787 = vrcp.f32 %v1133_v18 }
 0x85f   :  { %v5782_v13 = vpop.eup %5781 }
 0x860   :  { %v1140_v44 = vmul.f32 %v5782_v13, %v6554_v43  ;;  %v1152_v36 = vpop.permute.xlu0 %1151 }
 0x861   :  { %v1165_v35 = vsel %vm642_vm7, %v1152_v36, 0 }
 0x862   :  { %v1144_v40 = vpack.c.bf16 %v1140_v44, %v1139_v48  ;;  %5224 = vmatpush3.bf16.msra.mxu0 %v1165_v35 }
 0x863   :  { %5251 = vmatprep.subr.bf16.mxu0 %v6048_v0  ;;  %v5784_v45 = vpop.eup %5783 }
 0x864   :  { %v1141_v47 = vmul.f32 %v5784_v45, %v6562_v39  ;;  %v1234_v16 = vpop.permute.xlu0 %1233 }
 0x865   :  { %5226 = vmatmul.mubr.msk.bf16.vlgmr.msra.gmra.mrb[48].mxu0 %vm421_vm5, %v1144_v40 }
 0x866   :  { %5229 = vmatprep.mubr.msk.bf16.mxu0 %vm6049_vm0, %v6048_v0 }
 0x867   :  { %v5786_v46 = vpop.eup %5785 }
 0x868   :  { %v1142_v62 = vmul.f32 %v5786_v46, %v6566_v32  ;;  %v5788_v42 = vpop.eup %5787 }
 0x869   :  { %v1143_v6 = vmul.f32 %v5788_v42, %v6556_v3 }
 0x86a   :  { %v1145_v43 = vpack.c.bf16 %v1142_v62, %v1141_v47 }
 0x86b   :  { %v1146_v49 = vpack.c.bf16 %v1143_v6, %v1143_v6 }
 0x86d   :  { %5230 = vmatmul.mubr.msk.bf16.gmra.mrb[52].mxu0 %vm421_vm5, %v1145_v43 }
 0x86e   :  { %5233 = vmatprep.mubr.msk.bf16.mxu0 %vm6049_vm0, %v6048_v0 }
 0x875   :  { %5234 = vmatmul.mubr.msk.bf16.gmra.mrb[56].mxu0 %vm421_vm5, %v1146_v49 }
 0x876   :  { %5259 = vmatprep.mubr.msk.bf16.mxu0 %vm6049_vm0, %v6048_v0 }
 0x8f6   :  { %v976_v52 = vpop.f32.mrb[36].mxu0 }
 0x8f7   :  { %v998_v39 = vadd.f32 %v976_v52, %v6577_v22  ;;  %v5191_v50 = vpop.f32.mrb[37].mxu0 }
 0x8f8   :  { %v979_v32 = vpop.f32.mrb[38].mxu0 }
 0x8f9   :  { %v999_v51 = vadd.f32 %v979_v32, %v6580_v5  ;;  %v5192_v27 = vpop.f32.mrb[39].mxu0 }
 0x8fe   :  { %v984_v23 = vpop.f32.mrb[40].mxu0 }
 0x8ff   :  { %v1000_v12 = vadd.f32 %v984_v23, %v765_v9  ;;  %v5195_v54 = vpop.f32.mrb[41].mxu0 }
 0x900   :  { %v987_v33 = vpop.f32.mrb[42].mxu0 }
 0x901   :  { %v1001_v41 = vadd.f32 %v987_v33, %v768_v17  ;;  %v5196_v3 = vpop.f32.mrb[43].mxu0 }
 0x906   :  { %v992_v55 = vpop.f32.mrb[44].mxu0 }
 0x907   :  { %v1002_v7 = vadd.f32 %v992_v55, %v773_v63  ;;  %v5199_v58 = vpop.f32.mrb[45].mxu0 }
 0x908   :  { %v995_v53 = vpop.f32.mrb[46].mxu0 }
 0x909   :  { %v5200_v38 = vpop.f32.mrb[47].mxu0 }
 0x90a   :  { %v5681_v38 = vld [vmem:[%s8062_s3 + $0x8] sm:$0xff]  }
 0x90b   :  { %5238 = vmatpush3.bf16.msra.mxu1 %v5681_v38 }
 0x90c   :  { %5271 = vmatprep.subr.bf16.mxu1 %v6048_v0 }
 0x938   :  { %v1201_v11 = vpop.f32.mrb[48].mxu0 }
 0x939   :  { %v1223_v59 = vadd.f32 %v1201_v11, %v998_v39  ;;  %v5227_v14 = vpop.f32.mrb[49].mxu0 }
 0x93a   :  { %v1204_v22 = vpop.f32.mrb[50].mxu0 }
 0x93b   :  { %v1228_v8 = vadd.f32 %v1223_v59, %v6159_v15  ;;  %v1224_v5 = vadd.f32 %v1204_v22, %v999_v51  ;;  %v5228_v30 = vpop.f32.mrb[51].mxu0 }
 0x93d   :  { %v1229_v9 = vadd.f32 %v1224_v5, %v6161_v19  ;;  %v6619_v20 = vadd.f32 %v1234_v16, %v1228_v8 }
 0x93f   :  { %v1241_v17 = vsel %vm170_vm2, %v6619_v20, 0.0  ;;  %v6623_v61 = vadd.f32 %v1234_v16, %v1229_v9 }
 0x940   :  { %1242 = vadd.xlane.f32.xlu0 %v1241_v17  ;;  %v1209_v26 = vpop.f32.mrb[52].mxu0 }
 0x941   :  { %v1225_v57 = vadd.f32 %v1209_v26, %v1000_v12  ;;  %v5231_v63 = vpop.f32.mrb[53].mxu0  ;;  %v1244_v60 = vsel %vm170_vm2, %v6623_v61, 0.0 }
 0x942   :  { %1245 = vadd.xlane.f32.xlu1 %v1244_v60  ;;  %v1212_v15 = vpop.f32.mrb[54].mxu0 }
 0x943   :  { %v1230_v21 = vadd.f32 %v1225_v57, %v6167_v25  ;;  %v1226_v24 = vadd.f32 %v1212_v15, %v1001_v41  ;;  %v5232_v19 = vpop.f32.mrb[55].mxu0 }
 0x945   :  { %v6628_v29 = vadd.f32 %v1234_v16, %v1230_v21  ;;  %v1231_v31 = vadd.f32 %v1226_v24, %v6169_v28 }
 0x947   :  { %v6631_v37 = vadd.f32 %v1234_v16, %v1231_v31  ;;  %v1247_v1 = vsel %vm170_vm2, %v6628_v29, 0.0 }
 0x948   :  { %1248 = vadd.xlane.f32.xlu1 %v1247_v1  ;;  %v1217_v13 = vpop.f32.mrb[56].mxu0 }
 0x949   :  { %v1227_v18 = vadd.f32 %v1217_v13, %v1002_v7  ;;  %v5235_v48 = vpop.f32.mrb[57].mxu0  ;;  %v1250_v25 = vsel %vm170_vm2, %v6631_v37, 0.0 }
 0x94a   :  { %v1220_v44 = vpop.f32.mrb[58].mxu0 }
 0x94b   :  { %v1232_v36 = vadd.f32 %v1227_v18, %v6175_v34  ;;  %v5236_v35 = vpop.f32.mrb[59].mxu0 }
 0x94c   :  { %1251 = vadd.xlane.f32.xlu1 %v1250_v25 }
 0x94d   :  { %v6638_v40 = vadd.f32 %v1234_v16, %v1232_v36 }
 0x94f   :  { %v1253_v28 = vsel %vm183_vm3, %v6638_v40, 0.0 }
 0x950   :  { %1254 = vadd.xlane.f32.xlu1 %v1253_v28 }
 0x9cd   :  { %v1243_v45 = vpop.xlane.xlu0 %1242 }
 0x9ce   :  { %v1256_v46 = vmul.f32 0.0625, %v1243_v45 }
 0x9cf   :  { %v1246_v47 = vpop.xlane.xlu1 %1245 }
 0x9d0   :  { %v1261_v62 = vsub.f32 %v6619_v20, %v1256_v46  ;;  %v1257_v43 = vmul.f32 0.0625, %v1246_v47 }
 0x9d2   :  { %v1262_v42 = vsub.f32 %v6623_v61, %v1257_v43  ;;  %v1266_v34 = vmul.f32 %v1261_v62, %v1261_v62 }
 0x9d4   :  { %v1271_v6 = vsel %vm170_vm2, %v1266_v34, 0.0  ;;  %v1267_v49 = vmul.f32 %v1262_v42, %v1262_v42 }
 0x9d5   :  { %v1249_v52 = vpop.xlane.xlu1 %1248  ;;  %1272 = vadd.xlane.f32.xlu1 %v1271_v6 }
 0x9d6   :  { %v1258_v39 = vmul.f32 0.0625, %v1249_v52  ;;  %v1274_v32 = vsel %vm170_vm2, %v1267_v49, 0.0 }
 0x9d8   :  { %v1263_v50 = vsub.f32 %v6628_v29, %v1258_v39 }
 0x9d9   :  { %v1252_v51 = vpop.xlane.xlu1 %1251  ;;  %1275 = vadd.xlane.f32.xlu1 %v1274_v32  ;;  %v5683_v32 = vld [vmem:[%s8062_s3 + $0x18] sm:$0xff]  }
 0x9da   :  { %v1259_v27 = vmul.f32 0.0625, %v1252_v51  ;;  %v1268_v23 = vmul.f32 %v1263_v50, %v1263_v50  ;;  %v5684_v51 = vld [vmem:[%s8062_s3 + $0x20] sm:$0xff]  }
 0x9dc   :  { %v1264_v12 = vsub.f32 %v6631_v37, %v1259_v27  ;;  %v1277_v54 = vsel %vm170_vm2, %v1268_v23, 0.0  ;;  %v5685_v27 = vld [vmem:[%s8062_s3 + $0x28] sm:$0xff]   ;;  %v1327_v23 = vsub.s32 2, %v6189_v2 }
 0x9dd   :  { %1278 = vadd.xlane.f32.xlu0 %v1277_v54  ;;  %v1255_v33 = vpop.xlane.xlu1 %1254 }
 0x9de   :  { %v1260_v41 = vmul.f32 0.0625, %v1255_v33  ;;  %v1269_v3 = vmul.f32 %v1264_v12, %v1264_v12 }
 0x9e0   :  { %v1265_v55 = vsub.f32 %v6638_v40, %v1260_v41  ;;  %v1280_v7 = vsel %vm170_vm2, %v1269_v3, 0.0 }
 0x9e1   :  { %1281 = vadd.xlane.f32.xlu1 %v1280_v7 }
 0x9e2   :  { %v1270_v58 = vmul.f32 %v1265_v55, %v1265_v55 }
 0x9e4   :  { %v1283_v53 = vsel %vm183_vm3, %v1270_v58, 0.0 }
 0x9e5   :  { %1284 = vadd.xlane.f32.xlu0 %v1283_v53 }
 0x9f2   :  { %1306 = vrot.lane.b32.xlu1 %v6197_v10, %s6054_s22 }
 0x9f6   :  { %1577 = vrot.lane.b32.xlu1 %v6197_v10, %s6055_s23 }
 0x9fb   :  { %1314 = vrot.lane.b32.xlu0 %v6197_v10, %s6056_s24 }
 0xa62   :  { %v1273_v11 = vpop.xlane.xlu1 %1272 }
 0xa63   :  { %v1286_v59 = vmul.f32 0.0625, %v1273_v11 }
 0xa65   :  { %v1291_v14 = vadd.f32 1e-06, %v1286_v59 }
 0xa66   :  { %v1276_v22 = vpop.xlane.xlu1 %1275 }
 0xa67   :  { %5789 = vrsqrt.f32 %v1291_v14  ;;  %v1287_v16 = vmul.f32 0.0625, %v1276_v22 }
 0xa69   :  { %v1292_v8 = vadd.f32 1e-06, %v1287_v16 }
 0xa6a   :  { %v1279_v5 = vpop.xlane.xlu0 %1278 }
 0xa6b   :  { %5791 = vrsqrt.f32 %v1292_v8  ;;  %v1288_v30 = vmul.f32 0.0625, %v1279_v5 }
 0xa6d   :  { %v1293_v9 = vadd.f32 1e-06, %v1288_v30 }
 0xa6e   :  { %v1282_v17 = vpop.xlane.xlu1 %1281 }
 0xa6f   :  { %5793 = vrsqrt.f32 %v1293_v9  ;;  %v1289_v26 = vmul.f32 0.0625, %v1282_v17 }
 0xa71   :  { %v5790_v57 = vpop.eup %5789  ;;  %v1294_v63 = vadd.f32 1e-06, %v1289_v26 }
 0xa72   :  { %v1285_v60 = vpop.xlane.xlu0 %1284  ;;  %v1301_v15 = vmul.f32 %v5790_v57, %v1261_v62  ;;  %v1307_v21 = vpop.permute.xlu1 %1306 }
 0xa73   :  { %5795 = vrsqrt.f32 %v1294_v63  ;;  %v1290_v10 = vmul.f32 0.0625, %v1285_v60 }
 0xa74   :  { %v1309_v1 = vmul.f32 %v1307_v21, %v1301_v15 }
 0xa75   :  { %v5792_v24 = vpop.eup %5791  ;;  %v1295_v19 = vadd.f32 1e-06, %v1290_v10 }
 0xa76   :  { %v1302_v31 = vmul.f32 %v5792_v24, %v1262_v42  ;;  %v1315_v13 = vpop.permute.xlu0 %1314 }
 0xa77   :  { %5797 = vrsqrt.f32 %v1295_v19  ;;  %v1317_v44 = vadd.f32 %v1315_v13, %v1309_v1 }
 0xa78   :  { %v1310_v18 = vmul.f32 %v1307_v21, %v1302_v31 }
 0xa79   :  { %v5794_v48 = vpop.eup %5793 }
 0xa7a   :  { %v1318_v36 = vadd.f32 %v1315_v13, %v1310_v18  ;;  %v1303_v35 = vmul.f32 %v5794_v48, %v1263_v50  ;;  %v5682_v50 = vld [vmem:[%s8062_s3 + $0x10] sm:$0xff]  }
 0xa7b   :  { %5252 = vmatpush3.bf16.msra.mxu0 %v5682_v50 }
 0xa7c   :  { %v1322_v25 = vpack.c.bf16 %v1318_v36, %v1317_v44  ;;  %v1311_v46 = vmul.f32 %v1307_v21, %v1303_v35  ;;  %5253 = vmatprep.subr.bf16.mxu0 %v6048_v0 }
 0xa7d   :  { %v5796_v28 = vpop.eup %5795 }
 0xa7e   :  { %5240 = vmatmul.mubr.msk.bf16.vlgmr.msra.gmra.mrb[60].mxu1 %vm170_vm2, %v1322_v25  ;;  %v1304_v45 = vmul.f32 %v5796_v28, %v1264_v12  ;;  %v1319_v43 = vadd.f32 %v1315_v13, %v1311_v46  ;;  %v6691_v12 = vld [vmem:[%s8061_s4] sm:$0xff] }
 0xa7f   :  { %5243 = vmatprep.mubr.msk.bf16.mxu1 %vm6049_vm0, %v6048_v0  ;;  %5254 = vmatpush3.bf16.msra.mxu0 %v5683_v32  ;;  %v1328_v54 = vrot.slane %v6691_v12, %v1327_v23 }
 0xa80   :  { %v1312_v47 = vmul.f32 %v1307_v21, %v1304_v45  ;;  %5255 = vmatprep.subr.bf16.mxu0 %v6048_v0 }
 0xa81   :  { %v5798_v62 = vpop.eup %5797 }
 0xa82   :  { %v1320_v42 = vadd.f32 %v1315_v13, %v1312_v47  ;;  %v1305_v34 = vmul.f32 %v5798_v62, %v1265_v55 }
 0xa83   :  { %5256 = vmatpush3.bf16.msra.mxu0 %v5684_v51 }
 0xa84   :  { %v1323_v6 = vpack.c.bf16 %v1320_v42, %v1319_v43  ;;  %v1313_v49 = vmul.f32 %v1307_v21, %v1305_v34  ;;  %5257 = vmatprep.subr.bf16.mxu0 %v6048_v0 }
 0xa86   :  { %5244 = vmatmul.mubr.msk.bf16.gmra.mrb[64].mxu1 %vm170_vm2, %v1323_v6  ;;  %v1321_v52 = vadd.f32 %v1315_v13, %v1313_v49 }
 0xa87   :  { %5247 = vmatprep.mubr.msk.bf16.mxu1 %vm6049_vm0, %v6048_v0  ;;  %5258 = vmatpush3.bf16.msra.mxu0 %v5685_v27 }
 0xa88   :  { %v1324_v39 = vpack.c.bf16 %v1321_v52, %v1321_v52  ;;  %5285 = vmatprep.subr.bf16.mxu0 %v6048_v0 }
 0xa8e   :  { %5248 = vmatmul.mubr.msk.bf16.gmra.mrb[68].mxu1 %vm170_vm2, %v1324_v39 }
 0xa8f   :  { %5273 = vmatprep.mubr.msk.bf16.mxu1 %vm6049_vm0, %v6048_v0 }
 0xb51   :  { %v1378_v33 = vpop.f32.mrb[60].mxu1 }
 0xb52   :  { %v6696_v41 = vadd.f32 %v1378_v33, %v1328_v54  ;;  %v5241_v3 = vpop.f32.mrb[61].mxu1 }
 0xb53   :  { %v1381_v55 = vpop.f32.mrb[62].mxu1 }
 0xb54   :  { %v1405_v7 = vmul.f32 0.70710677, %v6696_v41  ;;  %v6699_v58 = vadd.f32 %v1381_v55, %v1328_v54  ;;  %v5242_v53 = vpop.f32.mrb[63].mxu1 }
 0xb56   :  { %v6701_v38 = vclamps-f32 %v1405_v7, 4.0  ;;  %v1406_v11 = vmul.f32 0.70710677, %v6699_v58 }
 0xb58   :  { %v6706_v59 = vmul.f32 %v6701_v38, %v6701_v38  ;;  %v6708_v14 = vclamps-f32 %v1406_v11, 4.0 }
 0xb59   :  { %v1386_v22 = vpop.f32.mrb[64].mxu1 }
 0xb5a   :  { %v1425_v16 = vmul.f32 -2.7261424e-10, %v6706_v59  ;;  %v1485_v8 = vmul.f32 -1.45660715e-05, %v6706_v59  ;;  %v6714_v5 = vmul.f32 %v6708_v14, %v6708_v14  ;;  %v6716_v30 = vadd.f32 %v1386_v22, %v1328_v54  ;;  %v5245_v9 = vpop.f32.mrb[65].mxu1 }
 0xb5b   :  { %v1389_v17 = vpop.f32.mrb[66].mxu1 }
 0xb5c   :  { %v1430_v26 = vadd.f32 2.7706815e-08, %v1425_v16  ;;  %v1490_v57 = vadd.f32 -0.00021337405, %v1485_v8  ;;  %v1426_v63 = vmul.f32 -2.7261424e-10, %v6714_v5  ;;  %v6719_v60 = vadd.f32 %v1389_v17, %v1328_v54 }
 0xb5d   :  { %v1486_v15 = vmul.f32 -1.45660715e-05, %v6714_v5  ;;  %v1407_v10 = vmul.f32 0.70710677, %v6716_v30  ;;  %v5246_v21 = vpop.f32.mrb[67].mxu1 }
 0xb5e   :  { %v1435_v24 = vmul.f32 %v1430_v26, %v6706_v59  ;;  %v1495_v19 = vmul.f32 %v1490_v57, %v6706_v59  ;;  %v1431_v31 = vadd.f32 2.7706815e-08, %v1426_v63  ;;  %v1408_v18 = vmul.f32 0.70710677, %v6719_v60 }
 0xb5f   :  { %v1491_v1 = vadd.f32 -0.00021337405, %v1486_v15  ;;  %v6725_v13 = vclamps-f32 %v1407_v10, 4.0 }
 0xb60   :  { %v1440_v48 = vadd.f32 -2.101024e-06, %v1435_v24  ;;  %v1500_v44 = vadd.f32 -0.001682827, %v1495_v19  ;;  %v1436_v36 = vmul.f32 %v1431_v31, %v6714_v5  ;;  %v6734_v28 = vclamps-f32 %v1408_v18, 4.0 }
 0xb61   :  { %v1496_v35 = vmul.f32 %v1491_v1, %v6714_v5  ;;  %v6732_v25 = vmul.f32 %v6725_v13, %v6725_v13  ;;  %v1394_v45 = vpop.f32.mrb[68].mxu1 }
 0xb62   :  { %v1445_v46 = vmul.f32 %v1440_v48, %v6706_v59  ;;  %v1505_v47 = vmul.f32 %v1500_v44, %v6706_v59  ;;  %v1441_v62 = vadd.f32 -2.101024e-06, %v1436_v36  ;;  %v5249_v43 = vpop.f32.mrb[69].mxu1  ;;  %v6742_v49 = vmul.f32 %v6734_v28, %v6734_v28 }
 0xb63   :  { %v1501_v42 = vadd.f32 -0.001682827, %v1496_v35  ;;  %v1427_v34 = vmul.f32 -2.7261424e-10, %v6732_v25  ;;  %v1487_v6 = vmul.f32 -1.45660715e-05, %v6732_v25  ;;  %v6745_v32 = vadd.f32 %v1394_v45, %v1328_v54 }
 0xb64   :  { %v1450_v52 = vadd.f32 -5.6925062e-05, %v1445_v46  ;;  %v1510_v39 = vadd.f32 -0.0073733293, %v1505_v47  ;;  %v1446_v50 = vmul.f32 %v1441_v62, %v6714_v5  ;;  %v1397_v51 = vpop.f32.mrb[70].mxu1 }
 0xb65   :  { %v1506_v27 = vmul.f32 %v1501_v42, %v6714_v5  ;;  %v1432_v33 = vadd.f32 2.7706815e-08, %v1427_v34  ;;  %v1492_v3 = vadd.f32 -0.00021337405, %v1487_v6  ;;  %v1428_v55 = vmul.f32 -2.7261424e-10, %v6742_v49 }
 0xb66   :  { %v1455_v7 = vmul.f32 %v1450_v52, %v6706_v59  ;;  %v1515_v53 = vmul.f32 %v1510_v39, %v6706_v59  ;;  %v1451_v11 = vadd.f32 -5.6925062e-05, %v1446_v50  ;;  %v1488_v22 = vmul.f32 -1.45660715e-05, %v6742_v49  ;;  %v5250_v16 = vpop.f32.mrb[71].mxu1 }
 0xb67   :  { %v1511_v8 = vadd.f32 -0.0073733293, %v1506_v27  ;;  %v1437_v9 = vmul.f32 %v1432_v33, %v6732_v25  ;;  %v1497_v54 = vmul.f32 %v1492_v3, %v6732_v25  ;;  %v1433_v17 = vadd.f32 2.7706815e-08, %v1428_v55 }
 0xb68   :  { %v1460_v26 = vadd.f32 -0.00073499064, %v1455_v7  ;;  %v1520_v57 = vadd.f32 -0.014264739, %v1515_v53  ;;  %v1456_v63 = vmul.f32 %v1451_v11, %v6714_v5  ;;  %v1493_v15 = vadd.f32 -0.00021337405, %v1488_v22 }
 0xb69   :  { %v1516_v10 = vmul.f32 %v1511_v8, %v6714_v5  ;;  %v1442_v21 = vadd.f32 -2.101024e-06, %v1437_v9  ;;  %v1502_v24 = vadd.f32 -0.001682827, %v1497_v54  ;;  %v1438_v19 = vmul.f32 %v1433_v17, %v6742_v49 }
 0xb6a   :  { %v1465_v31 = vmul.f32 %v1460_v26, %v6706_v59  ;;  %5799 = vrcp.f32 %v1520_v57  ;;  %v1461_v1 = vadd.f32 -0.00073499064, %v1456_v63  ;;  %v1498_v18 = vmul.f32 %v1493_v15, %v6742_v49 }
 0xb6b   :  { %v1521_v48 = vadd.f32 -0.014264739, %v1516_v10  ;;  %v1447_v44 = vmul.f32 %v1442_v21, %v6732_v25  ;;  %v1507_v36 = vmul.f32 %v1502_v24, %v6732_v25  ;;  %v1443_v35 = vadd.f32 -2.101024e-06, %v1438_v19 }
 0xb6c   :  { %v1470_v45 = vadd.f32 -0.0029546, %v1465_v31  ;;  %v1466_v46 = vmul.f32 %v1461_v1, %v6714_v5  ;;  %v1503_v47 = vadd.f32 -0.001682827, %v1498_v18  ;;  %v1409_v62 = vmul.f32 0.70710677, %v6745_v32 }
 0xb6d   :  { %5801 = vrcp.f32 %v1521_v48  ;;  %v1452_v43 = vadd.f32 -5.6925062e-05, %v1447_v44  ;;  %v1512_v42 = vadd.f32 -0.0073733293, %v1507_v36  ;;  %v1448_v34 = vmul.f32 %v1443_v35, %v6742_v49 }
 0xb6e   :  { %v1475_v6 = vmul.f32 %v1470_v45, %v6706_v59  ;;  %v1471_v52 = vadd.f32 -0.0029546, %v1466_v46  ;;  %v1508_v39 = vmul.f32 %v1503_v47, %v6742_v49  ;;  %v6766_v50 = vclamps-f32 %v1409_v62, 4.0 }
 0xb6f   :  { %v1457_v51 = vmul.f32 %v1452_v43, %v6732_v25  ;;  %v1517_v27 = vmul.f32 %v1512_v42, %v6732_v25  ;;  %v1453_v33 = vadd.f32 -5.6925062e-05, %v1448_v34  ;;  %v1400_v62 = vmul.f32 0.5, %v6696_v41 }
 0xb70   :  { %v1480_v3 = vadd.f32 -0.016096033, %v1475_v6  ;;  %v1476_v55 = vmul.f32 %v1471_v52, %v6714_v5  ;;  %v1513_v7 = vadd.f32 -0.0073733293, %v1508_v39  ;;  %v6773_v53 = vmul.f32 %v6766_v50, %v6766_v50 }
 0xb71   :  { %v1462_v11 = vadd.f32 -0.00073499064, %v1457_v51  ;;  %v1522_v59 = vadd.f32 -0.014264739, %v1517_v27  ;;  %v1458_v22 = vmul.f32 %v1453_v33, %v6742_v49  ;;  %v1401_v43 = vmul.f32 0.5, %v6699_v58 }
 0xb72   :  { %v1525_v16 = vmul.f32 %v6701_v38, %v1480_v3  ;;  %v1481_v8 = vadd.f32 -0.016096033, %v1476_v55  ;;  %v1518_v9 = vmul.f32 %v1513_v7, %v6742_v49  ;;  %v1429_v54 = vmul.f32 -2.7261424e-10, %v6773_v53 }
 0xb73   :  { %v1467_v17 = vmul.f32 %v1462_v11, %v6732_v25  ;;  %5803 = vrcp.f32 %v1522_v59  ;;  %v1463_v5 = vadd.f32 -0.00073499064, %v1458_v22  ;;  %v1489_v26 = vmul.f32 -1.45660715e-05, %v6773_v53 }
 0xb74   :  { %v5800_v57 = vpop.eup %5799  ;;  %v1526_v63 = vmul.f32 %v6708_v14, %v1481_v8  ;;  %v1523_v15 = vadd.f32 -0.014264739, %v1518_v9  ;;  %v1434_v10 = vadd.f32 2.7706815e-08, %v1429_v54  ;;  %v1402_v8 = vmul.f32 0.5, %v6716_v30 }
 0xb75   :  { %v1531_v21 = vmul.f32 %v5800_v57, %v1525_v16  ;;  %v1472_v24 = vadd.f32 -0.0029546, %v1467_v17  ;;  %v1468_v38 = vmul.f32 %v1463_v5, %v6742_v49  ;;  %v1494_v19 = vadd.f32 -0.00021337405, %v1489_v26 }
 0xb76   :  { %5805 = vrcp.f32 %v1523_v15  ;;  %v1439_v31 = vmul.f32 %v1434_v10, %v6773_v53  ;;  %v1403_v9 = vmul.f32 0.5, %v6719_v60  ;;  %v1404_v60 = vmul.f32 0.5, %v6745_v32 }
 0xb77   :  { %v5802_v1 = vpop.eup %5801  ;;  %v1477_v18 = vmul.f32 %v1472_v24, %v6732_v25  ;;  %v1473_v48 = vadd.f32 -0.0029546, %v1468_v38  ;;  %v1499_v44 = vmul.f32 %v1494_v19, %v6773_v53  ;;  %v1540_v36 = vadd.f32 1.0, %v1531_v21 }
 0xb78   :  { %v1533_v35 = vmul.f32 %v5802_v1, %v1526_v63  ;;  %v1444_v45 = vadd.f32 -2.101024e-06, %v1439_v31 }
 0xb79   :  { %v1482_v14 = vadd.f32 -0.016096033, %v1477_v18  ;;  %v1478_v46 = vmul.f32 %v1473_v48, %v6742_v49  ;;  %v1504_v47 = vadd.f32 -0.001682827, %v1499_v44  ;;  %v1545_v39 = vmul.f32 %v1540_v36, %v1400_v62 }
 0xb7a   :  { %v1541_v42 = vadd.f32 1.0, %v1533_v35  ;;  %v1449_v34 = vmul.f32 %v1444_v45, %v6773_v53 }
 0xb7b   :  { %v1527_v6 = vmul.f32 %v6725_v13, %v1482_v14  ;;  %v1483_v25 = vadd.f32 -0.016096033, %v1478_v46  ;;  %v1509_v52 = vmul.f32 %v1504_v47, %v6773_v53 }
 0xb7c   :  { %v1546_v51 = vmul.f32 %v1541_v42, %v1401_v43  ;;  %v1454_v27 = vadd.f32 -5.6925062e-05, %v1449_v34 }
 0xb7d   :  { %v5804_v33 = vpop.eup %5803  ;;  %v1528_v3 = vmul.f32 %v6734_v28, %v1483_v25  ;;  %v1514_v49 = vadd.f32 -0.0073733293, %v1509_v52 }
 0xb7e   :  { %v1550_v55 = vpack.c.bf16 %v1546_v51, %v1545_v39  ;;  %v1535_v41 = vmul.f32 %v5804_v33, %v1527_v6  ;;  %v1459_v58 = vmul.f32 %v1454_v27, %v6773_v53 }
 0xb7f   :  { %v1519_v7 = vmul.f32 %v1514_v49, %v6773_v53 }
 0xb80   :  { %v5806_v11 = vpop.eup %5805  ;;  %v1464_v59 = vadd.f32 -0.00073499064, %v1459_v58  ;;  %5260 = vmatmul.mubr.msk.bf16.vlgmr.msra.gmra.mrb[60].mxu0 %vm1580_vm8, %v1550_v55  ;;  %v1542_v13 = vadd.f32 1.0, %v1535_v41 }
 0xb81   :  { %v1537_v22 = vmul.f32 %v5806_v11, %v1528_v3  ;;  %v1524_v16 = vadd.f32 -0.014264739, %v1519_v7  ;;  %5263 = vmatprep.mubr.msk.bf16.mxu0 %vm6049_vm0, %v6048_v0 }
 0xb82   :  { %v1469_v28 = vmul.f32 %v1464_v59, %v6773_v53  ;;  %v1547_v5 = vmul.f32 %v1542_v13, %v1402_v8 }
 0xb83   :  { %v1543_v54 = vadd.f32 1.0, %v1537_v22  ;;  %5807 = vrcp.f32 %v1524_v16 }
 0xb84   :  { %v1474_v17 = vadd.f32 -0.0029546, %v1469_v28 }
 0xb85   :  { %v1548_v26 = vmul.f32 %v1543_v54, %v1403_v9 }
 0xb86   :  { %v1479_v57 = vmul.f32 %v1474_v17, %v6773_v53  ;;  %v1578_v53 = vpop.permute.xlu1 %1577 }
 0xb87   :  { %v1551_v63 = vpack.c.bf16 %v1548_v26, %v1547_v5 }
 0xb88   :  { %v1484_v15 = vadd.f32 -0.016096033, %v1479_v57 }
 0xb89   :  { %5264 = vmatmul.mubr.msk.bf16.gmra.mrb[64].mxu0 %vm1580_vm8, %v1551_v63 }
 0xb8a   :  { %v1529_v10 = vmul.f32 %v6766_v50, %v1484_v15  ;;  %5267 = vmatprep.mubr.msk.bf16.mxu0 %vm6049_vm0, %v6048_v0 }
 0xb8d   :  { %v5808_v21 = vpop.eup %5807 }
 0xb8e   :  { %v1539_v30 = vmul.f32 %v5808_v21, %v1529_v10 }
 0xb90   :  { %v1544_v24 = vadd.f32 1.0, %v1539_v30  ;;  %v1731_v30 = vsub.s32 4, %v6189_v2 }
 0xb92   :  { %v1549_v38 = vmul.f32 %v1544_v24, %v1404_v60  ;;  %v6847_v60 = vrot.slane %v6691_v12, %v1731_v30  ;;  %v5686_v24 = vld [vmem:[%s8062_s3 + $0x30] sm:$0xff]  }
 0xb93   :  { %5272 = vmatpush3.bf16.msra.mxu1 %v5686_v24 }
 0xb94   :  { %v1552_v19 = vpack.c.bf16 %v1549_v38, %v1549_v38  ;;  %5303 = vmatprep.subr.bf16.mxu1 %v6048_v0 }
 0xb96   :  { %5268 = vmatmul.mubr.msk.bf16.gmra.mrb[68].mxu0 %vm1580_vm8, %v1552_v19 }
 0xb97   :  { %5291 = vmatprep.mubr.msk.bf16.mxu0 %vm6049_vm0, %v6048_v0 }
 0xc53   :  { %v1624_v31 = vpop.f32.mrb[60].mxu0 }
 0xc54   :  { %v1625_v1 = vadd.f32 %v1624_v31, %v1578_v53  ;;  %v5261_v18 = vpop.f32.mrb[61].mxu0 }
 0xc55   :  { %v1627_v50 = vpop.f32.mrb[62].mxu0 }
 0xc56   :  { %v6811_v48 = vadd.f32 %v1625_v1, %v6619_v20  ;;  %v1628_v44 = vadd.f32 %v1627_v50, %v1578_v53  ;;  %v5262_v36 = vpop.f32.mrb[63].mxu0 }
 0xc58   :  { %v6814_v32 = vadd.f32 %v1628_v44, %v6623_v61  ;;  %v1664_v35 = vsel %vm170_vm2, %v6811_v48, 0.0 }
 0xc59   :  { %1665 = vadd.xlane.f32.xlu1 %v1664_v35 }
 0xc5a   :  { %v1667_v45 = vsel %vm170_vm2, %v6814_v32, 0.0 }
 0xc5b   :  { %1668 = vadd.xlane.f32.xlu0 %v1667_v45 }
 0xc5c   :  { %v1632_v14 = vpop.f32.mrb[64].mxu0 }
 0xc5d   :  { %v1633_v46 = vadd.f32 %v1632_v14, %v1578_v53  ;;  %v5265_v47 = vpop.f32.mrb[65].mxu0 }
 0xc5e   :  { %v1635_v62 = vpop.f32.mrb[66].mxu0 }
 0xc5f   :  { %v6821_v20 = vadd.f32 %v1633_v46, %v6628_v29  ;;  %v1636_v43 = vadd.f32 %v1635_v62, %v1578_v53  ;;  %v5266_v42 = vpop.f32.mrb[67].mxu0 }
 0xc61   :  { %v6824_v61 = vadd.f32 %v1636_v43, %v6631_v37  ;;  %v1670_v34 = vsel %vm170_vm2, %v6821_v20, 0.0 }
 0xc62   :  { %1671 = vadd.xlane.f32.xlu0 %v1670_v34 }
 0xc63   :  { %v1673_v6 = vsel %vm170_vm2, %v6824_v61, 0.0 }
 0xc64   :  { %1674 = vadd.xlane.f32.xlu1 %v1673_v6 }
 0xc69   :  { %v1640_v25 = vpop.f32.mrb[68].mxu0 }
 0xc6a   :  { %v1641_v52 = vadd.f32 %v1640_v25, %v1578_v53  ;;  %v5269_v39 = vpop.f32.mrb[69].mxu0 }
 0xc6b   :  { %v1643_v51 = vpop.f32.mrb[70].mxu0 }
 0xc6c   :  { %v6831_v29 = vadd.f32 %v1641_v52, %v6638_v40  ;;  %v5270_v27 = vpop.f32.mrb[71].mxu0 }
 0xc6e   :  { %v1676_v37 = vsel %vm183_vm3, %v6831_v29, 0.0 }
 0xc6f   :  { %1677 = vadd.xlane.f32.xlu0 %v1676_v37 }
 0xce6   :  { %v1666_v33 = vpop.xlane.xlu1 %1665 }
 0xce7   :  { %v1679_v3 = vmul.f32 0.0625, %v1666_v33 }
 0xce8   :  { %v1669_v49 = vpop.xlane.xlu0 %1668 }
 0xce9   :  { %v1684_v55 = vsub.f32 %v6811_v48, %v1679_v3  ;;  %v1680_v41 = vmul.f32 0.0625, %v1669_v49 }
 0xceb   :  { %v1685_v58 = vsub.f32 %v6814_v32, %v1680_v41  ;;  %v1689_v7 = vmul.f32 %v1684_v55, %v1684_v55 }
 0xced   :  { %v1694_v11 = vsel %vm170_vm2, %v1689_v7, 0.0  ;;  %v1690_v59 = vmul.f32 %v1685_v58, %v1685_v58 }
 0xcee   :  { %1695 = vadd.xlane.f32.xlu1 %v1694_v11 }
 0xcef   :  { %v1672_v40 = vpop.xlane.xlu0 %1671  ;;  %v1697_v13 = vsel %vm170_vm2, %v1690_v59, 0.0 }
 0xcf0   :  { %v1681_v22 = vmul.f32 0.0625, %v1672_v40  ;;  %1698 = vadd.xlane.f32.xlu0 %v1697_v13 }
 0xcf1   :  { %v1675_v16 = vpop.xlane.xlu1 %1674 }
 0xcf2   :  { %v1686_v28 = vsub.f32 %v6821_v20, %v1681_v22  ;;  %v1682_v8 = vmul.f32 0.0625, %v1675_v16 }
 0xcf4   :  { %v1687_v9 = vsub.f32 %v6824_v61, %v1682_v8  ;;  %v1691_v54 = vmul.f32 %v1686_v28, %v1686_v28  ;;  %v1752_v8 = vsub.s32 3, %v6189_v2 }
 0xcf6   :  { %v1700_v17 = vsel %vm170_vm2, %v1691_v54, 0.0  ;;  %v1692_v5 = vmul.f32 %v1687_v9, %v1687_v9 }
 0xcf7   :  { %1701 = vadd.xlane.f32.xlu1 %v1700_v17 }
 0xcf8   :  { %v1703_v26 = vsel %vm170_vm2, %v1692_v5, 0.0 }
 0xcf9   :  { %1704 = vadd.xlane.f32.xlu0 %v1703_v26 }
 0xcfc   :  { %v1678_v57 = vpop.xlane.xlu0 %1677 }
 0xcfd   :  { %v1683_v63 = vmul.f32 0.0625, %v1678_v57 }
 0xcff   :  { %v1688_v15 = vsub.f32 %v6831_v29, %v1683_v63 }
 0xd01   :  { %v1693_v10 = vmul.f32 %v1688_v15, %v1688_v15 }
 0xd03   :  { %v1706_v21 = vsel %vm183_vm3, %v1693_v10, 0.0 }
 0xd04   :  { %1707 = vadd.xlane.f32.xlu1 %v1706_v21 }
 0xd0f   :  { %1739 = vrot.lane.b32.xlu0 %v6847_v60, %s6051_s17 }
 0xd7b   :  { %v1696_v38 = vpop.xlane.xlu1 %1695 }
 0xd7c   :  { %v1709_v19 = vmul.f32 0.0625, %v1696_v38 }
 0xd7d   :  { %v1699_v53 = vpop.xlane.xlu0 %1698 }
 0xd7e   :  { %v1714_v31 = vadd.f32 1e-06, %v1709_v19  ;;  %v1710_v1 = vmul.f32 0.0625, %v1699_v53 }
 0xd80   :  { %5809 = vrsqrt.f32 %v1714_v31  ;;  %v1715_v18 = vadd.f32 1e-06, %v1710_v1 }
 0xd82   :  { %5811 = vrsqrt.f32 %v1715_v18 }
 0xd84   :  { %v1702_v50 = vpop.xlane.xlu1 %1701 }
 0xd85   :  { %v1711_v44 = vmul.f32 0.0625, %v1702_v50 }
 0xd86   :  { %v1705_v36 = vpop.xlane.xlu0 %1704 }
 0xd87   :  { %v1716_v35 = vadd.f32 1e-06, %v1711_v44  ;;  %v1712_v45 = vmul.f32 0.0625, %v1705_v36 }
 0xd89   :  { %5813 = vrsqrt.f32 %v1716_v35  ;;  %v1717_v14 = vadd.f32 1e-06, %v1712_v45 }
 0xd8a   :  { %v5810_v46 = vpop.eup %5809  ;;  %v1740_v34 = vpop.permute.xlu0 %1739 }
 0xd8b   :  { %v1724_v47 = vmul.f32 %v5810_v46, %v1684_v55  ;;  %5815 = vrsqrt.f32 %v1717_v14 }
 0xd8c   :  { %v5812_v62 = vpop.eup %5811 }
 0xd8d   :  { %v1725_v43 = vmul.f32 %v5812_v62, %v1685_v58  ;;  %v1733_v42 = vmul.f32 %v6847_v60, %v1724_v47 }
 0xd8f   :  { %v1734_v6 = vmul.f32 %v6847_v60, %v1725_v43  ;;  %v1742_v52 = vadd.f32 %v1740_v34, %v1733_v42 }
 0xd91   :  { %v1708_v25 = vpop.xlane.xlu1 %1707  ;;  %v1743_v39 = vadd.f32 %v1740_v34, %v1734_v6  ;;  %v6907_v6 = vld [vmem:[%s8060_s1] sm:$0xff] }
 0xd92   :  { %v1713_v51 = vmul.f32 0.0625, %v1708_v25 }
 0xd93   :  { %v5814_v27 = vpop.eup %5813  ;;  %v1747_v37 = vpack.c.bf16 %v1743_v39, %v1742_v52 }
 0xd94   :  { %v1718_v33 = vadd.f32 1e-06, %v1713_v51  ;;  %v1726_v3 = vmul.f32 %v5814_v27, %v1686_v28  ;;  %v6913_v51 = vld [vmem:[%s8060_s1 + $0x8] sm:$0xff] }
 0xd95   :  { %v5816_v49 = vpop.eup %5815  ;;  %5274 = vmatmul.mubr.msk.bf16.vlgmr.msra.gmra.mrb[72].mxu1 %vm170_vm2, %v1747_v37 }
 0xd96   :  { %5817 = vrsqrt.f32 %v1718_v33  ;;  %5277 = vmatprep.mubr.msk.bf16.mxu1 %vm6049_vm0, %v6048_v0  ;;  %v1727_v55 = vmul.f32 %v5816_v49, %v1687_v9  ;;  %v1735_v41 = vmul.f32 %v6847_v60, %v1726_v3  ;;  %v1753_v9 = vrot.slane %v6691_v12, %v1752_v8 }
 0xd98   :  { %v1736_v58 = vmul.f32 %v6847_v60, %v1727_v55  ;;  %v1744_v7 = vadd.f32 %v1740_v34, %v1735_v41  ;;  %v6921_v55 = vld [vmem:[%s8060_s1 + $0x10] sm:$0xff] }
 0xd9a   :  { %v1745_v11 = vadd.f32 %v1740_v34, %v1736_v58 }
 0xd9c   :  { %v1748_v59 = vpack.c.bf16 %v1745_v11, %v1744_v7  ;;  %v6927_v11 = vld [vmem:[%s8060_s1 + $0x18] sm:$0xff] }
 0xd9e   :  { %5278 = vmatmul.mubr.msk.bf16.gmra.mrb[76].mxu1 %vm170_vm2, %v1748_v59 }
 0xd9f   :  { %5281 = vmatprep.mubr.msk.bf16.mxu1 %vm6049_vm0, %v6048_v0 }
 0xda0   :  { %v5818_v40 = vpop.eup %5817 }
 0xda1   :  { %v1728_v13 = vmul.f32 %v5818_v40, %v1688_v15 }
 0xda3   :  { %v1737_v22 = vmul.f32 %v6847_v60, %v1728_v13 }
 0xda5   :  { %v1746_v16 = vadd.f32 %v1740_v34, %v1737_v22 }
 0xda7   :  { %v1749_v28 = vpack.c.bf16 %v1746_v16, %v1746_v16 }
 0xda9   :  { %5282 = vmatmul.mubr.msk.bf16.gmra.mrb[80].mxu1 %vm170_vm2, %v1749_v28 }
 0xdaa   :  { %5309 = vmatprep.mubr.msk.bf16.mxu1 %vm6049_vm0, %v6048_v0 }
 0xe68   :  { %v1803_v54 = vpop.f32.mrb[72].mxu1 }
 0xe69   :  { %v5275_v17 = vpop.f32.mrb[73].mxu1  ;;  %v1804_v26 = vadd.f32 %v1803_v54, %v1753_v9  ;;  %v6939_v54 = vld [vmem:[%s8060_s1 + $0x20] sm:$0x3] }
 0xe6a   :  { %v1806_v5 = vpop.f32.mrb[74].mxu1 }
 0xe6b   :  { %v1807_v57 = vadd.f32 %v1806_v5, %v1753_v9  ;;  %v5276_v63 = vpop.f32.mrb[75].mxu1 }
 0xe6d   :  { %v6871_v15 = vpack.c.bf16 %v1807_v57, %v1804_v26 }
 0xe6f   :  { %1975 = vrot.lane.b32.xlu1 %v6871_v15, %s6052_s20 }
 0xe71   :  { %v1811_v10 = vpop.f32.mrb[76].mxu1 }
 0xe72   :  { %v5279_v21 = vpop.f32.mrb[77].mxu1  ;;  %v1812_v24 = vadd.f32 %v1811_v10, %v1753_v9 }
 0xe73   :  { %v1814_v30 = vpop.f32.mrb[78].mxu1 }
 0xe74   :  { %v1815_v38 = vadd.f32 %v1814_v30, %v1753_v9  ;;  %v5280_v19 = vpop.f32.mrb[79].mxu1 }
 0xe76   :  { %v6875_v53 = vpack.c.bf16 %v1815_v38, %v1812_v24 }
 0xe78   :  { %1977 = vrot.lane.b32.xlu1 %v6875_v53, %s6052_s20 }
 0xe7c   :  { %v1819_v12 = vpop.f32.mrb[80].mxu1  ;;  %1969 = vrot.lane.b32.xlu1 %v6871_v15, %s6053_s21 }
 0xe7d   :  { %v1820_v31 = vadd.f32 %v1819_v12, %v1753_v9  ;;  %v5283_v1 = vpop.f32.mrb[81].mxu1 }
 0xe7e   :  { %v1822_v18 = vpop.f32.mrb[82].mxu1 }
 0xe7f   :  { %v6881_v50 = vpack.c.bf16 %v1820_v31, %v1820_v31  ;;  %v5284_v44 = vpop.f32.mrb[83].mxu1 }
 0xe81   :  { %1979 = vrot.lane.b32.xlu0 %v6881_v50, %s6052_s20  ;;  %1973 = vrot.lane.b32.xlu1 %v6881_v50, %s6053_s21 }
 0xe85   :  { %1971 = vrot.lane.b32.xlu0 %v6875_v53, %s6053_s21 }
 0xee1   :  { %v1976_v36 = vpop.permute.xlu1 %1975 }
 0xee2   :  { %v1991_v35 = vsel %vm346_vm4, %v1976_v36, 0 }
 0xee3   :  { %5304 = vmatpush3.bf16.xpose.msra.mxu1 %v1991_v35 }
 0xee4   :  { %5305 = vmatprep.subr.bf16.mxu1 %v6048_v0 }
 0xeea   :  { %v1978_v45 = vpop.permute.xlu1 %1977 }
 0xeeb   :  { %v1994_v14 = vsel %vm346_vm4, %v1978_v45, 0 }
 0xeec   :  { %5306 = vmatpush3.bf16.xpose.msra.mxu1 %v1994_v14 }
 0xeed   :  { %5307 = vmatprep.subr.bf16.mxu1 %v6048_v0 }
 0xeee   :  { %v1970_v62 = vpop.permute.xlu1 %1969 }
 0xef3   :  { %v1980_v46 = vpop.permute.xlu0 %1979  ;;  %v1974_v42 = vpop.permute.xlu1 %1973 }
 0xef4   :  { %v1997_v47 = vsel %vm346_vm4, %v1980_v46, 0 }
 0xef5   :  { %5308 = vmatpush3.bf16.xpose.msra.mxu1 %v1997_v47 }
 0xef6   :  { %5339 = vmatprep.subr.bf16.mxu1 %v6048_v0 }
 0xef7   :  { %v1972_v43 = vpop.permute.xlu0 %1971 }
 0xefc   :  { %5310 = vmatmul.mubr.msk.bf16.vlgmr.msra.gmra.mrb[84].mxu1 %vm346_vm4, %v1970_v62 }
 0xefd   :  { %5313 = vmatprep.mubr.msk.bf16.mxu1 %vm6049_vm0, %v6048_v0 }
 0xf04   :  { %5314 = vmatmul.mubr.msk.bf16.gmra.mrb[88].mxu1 %vm346_vm4, %v1972_v43 }
 0xf05   :  { %5317 = vmatprep.mubr.msk.bf16.mxu1 %vm6049_vm0, %v6048_v0 }
 0xf0c   :  { %5318 = vmatmul.mubr.msk.bf16.gmra.mrb[92].mxu1 %vm346_vm4, %v1974_v42 }
 0xf0d   :  { %5345 = vmatprep.mubr.msk.bf16.mxu1 %vm6049_vm0, %v6048_v0 }
 0xfcf   :  { %v2033_v34 = vpop.f32.mrb[84].mxu1 }
 0xfd0   :  { %v2034_v25 = vadd.f32 %v6907_v6, %v2033_v34  ;;  %v5311_v52 = vpop.f32.mrb[85].mxu1 }
 0xfd1   :  { %v2036_v39 = vpop.f32.mrb[86].mxu1 }
 0xfd2   :  { %v2037_v27 = vadd.f32 %v6913_v51, %v2036_v39  ;;  %v5312_v37 = vpop.f32.mrb[87].mxu1  ;;  %v2055_v33 = vsel %vm421_vm5, %v2034_v25, -inf }
 0xfd3   :  { %2056 = vmax.xlane.f32.xlu0 %v2055_v33 }
 0xfd4   :  { %v2058_v3 = vsel %vm421_vm5, %v2037_v27, -inf }
 0xfd5   :  { %2059 = vmax.xlane.f32.xlu1 %v2058_v3 }
 0xfd7   :  { %v2041_v49 = vpop.f32.mrb[88].mxu1 }
 0xfd8   :  { %v2042_v41 = vadd.f32 %v6921_v55, %v2041_v49  ;;  %v5315_v58 = vpop.f32.mrb[89].mxu1 }
 0xfd9   :  { %v2044_v7 = vpop.f32.mrb[90].mxu1 }
 0xfda   :  { %v2045_v59 = vadd.f32 %v6927_v11, %v2044_v7  ;;  %v5316_v40 = vpop.f32.mrb[91].mxu1  ;;  %v2061_v13 = vsel %vm421_vm5, %v2042_v41, -inf }
 0xfdb   :  { %2062 = vmax.xlane.f32.xlu0 %v2061_v13 }
 0xfdc   :  { %v2064_v22 = vsel %vm421_vm5, %v2045_v59, -inf }
 0xfdf   :  { %2065 = vmax.xlane.f32.xlu0 %v2064_v22  ;;  %v2049_v16 = vpop.f32.mrb[92].mxu1 }
 0xfe0   :  { %v5319_v28 = vpop.f32.mrb[93].mxu1  ;;  %v2050_v17 = vadd.f32 %v6939_v54, %v2049_v16 }
 0xfe1   :  { %v2052_v8 = vpop.f32.mrb[94].mxu1 }
 0xfe2   :  { %v5320_v9 = vpop.f32.mrb[95].mxu1  ;;  %v2067_v5 = vsel %vm434_vm6, %v2050_v17, -inf }
 0xfe6   :  { %1833 = vrot.lane.b32.xlu1 %v6875_v53, %s6054_s22 }
 0xff5   :  { %1831 = vrot.lane.b32.xlu0 %v6871_v15, %s6054_s22 }
0x100a   :  { %2068 = vmax.xlane.f32.xlu1 %v2067_v5 }
0x101b   :  { %1835 = vrot.lane.b32.xlu1 %v6881_v50, %s6054_s22 }
0x101f   :  { %2113 = vrot.lane.b32.xlu1 %v6871_v15, %s6055_s23 }
0x1060   :  { %v2057_v26 = vpop.xlane.xlu0 %2056 }
0x1061   :  { %v2070_v57 = vsub.f32 %v2034_v25, %v2057_v26 }
0x1062   :  { %v2060_v63 = vpop.xlane.xlu1 %2059 }
0x1063   :  { %v2075_v10 = vmul.f32 1.442695, %v2070_v57  ;;  %v2071_v21 = vsub.f32 %v2037_v27, %v2060_v63 }
0x1065   :  { %5819 = vpow2.f32 %v2075_v10  ;;  %v2077_v30 = vmul.f32 1.442695, %v2071_v21 }
0x1066   :  { %v1834_v46 = vpop.permute.xlu1 %1833 }
0x1067   :  { %5821 = vpow2.f32 %v2077_v30  ;;  %v1850_v43 = vsel %vm346_vm4, %v1834_v46, 0 }
0x1068   :  { %v2063_v24 = vpop.xlane.xlu0 %2062 }
0x1069   :  { %v2072_v38 = vsub.f32 %v2042_v41, %v2063_v24 }
0x106b   :  { %v2079_v19 = vmul.f32 1.442695, %v2072_v38 }
0x106c   :  { %v2066_v12 = vpop.xlane.xlu0 %2065 }
0x106d   :  { %5823 = vpow2.f32 %v2079_v19  ;;  %v2073_v31 = vsub.f32 %v2045_v59, %v2066_v12 }
0x106f   :  { %v6947_v1 = vpop.eup %5819  ;;  %v2081_v18 = vmul.f32 1.442695, %v2073_v31 }
0x1070   :  { %v1832_v44 = vpop.permute.xlu0 %1831  ;;  %v2085_v36 = vsel %vm421_vm5, %v6947_v1, 0.0 }
0x1071   :  { %v6951_v35 = vpop.eup %5821  ;;  %5825 = vpow2.f32 %v2081_v18  ;;  %v1847_v45 = vsel %vm346_vm4, %v1832_v44, 0  ;;  %2086 = vadd.xlane.f32.xlu0 %v2085_v36 }
0x1072   :  { %5286 = vmatpush3.bf16.xpose.msra.mxu0 %v1847_v45  ;;  %v2088_v14 = vsel %vm421_vm5, %v6951_v35, 0.0 }
0x1073   :  { %2089 = vadd.xlane.f32.xlu1 %v2088_v14  ;;  %5287 = vmatprep.subr.bf16.mxu0 %v6048_v0 }
0x1077   :  { %v6957_v47 = vpop.eup %5823 }
0x1078   :  { %v2091_v62 = vsel %vm421_vm5, %v6957_v47, 0.0 }
0x1079   :  { %2092 = vadd.xlane.f32.xlu0 %v2091_v62 }
0x107a   :  { %5288 = vmatpush3.bf16.xpose.msra.mxu0 %v1850_v43 }
0x107b   :  { %v6962_v42 = vpop.eup %5825  ;;  %5289 = vmatprep.subr.bf16.mxu0 %v6048_v0 }
0x107c   :  { %v2094_v34 = vsel %vm421_vm5, %v6962_v42, 0.0 }
0x107d   :  { %2095 = vadd.xlane.f32.xlu0 %v2094_v34 }
0x1084   :  { %2117 = vrot.lane.b32.xlu1 %v6881_v50, %s6055_s23 }
0x1088   :  { %2271 = vrot.lane.b32.xlu1 %v6871_v15, %s6056_s24 }
0x108c   :  { %2273 = vrot.lane.b32.xlu1 %v6875_v53, %s6056_s24 }
0x1090   :  { %2265 = vrot.lane.b32.xlu1 %v6871_v15, %s6051_s17 }
0x1093   :  { %2115 = vrot.lane.b32.xlu0 %v6875_v53, %s6055_s23 }
0x1094   :  { %2267 = vrot.lane.b32.xlu1 %v6875_v53, %s6051_s17 }
0x1097   :  { %v2069_v25 = vpop.xlane.xlu1 %2068 }
0x1098   :  { %2269 = vrot.lane.b32.xlu1 %v6881_v50, %s6051_s17  ;;  %v2074_v39 = vsub.f32 %v2050_v17, %v2069_v25 }
0x109a   :  { %v2083_v37 = vmul.f32 1.442695, %v2074_v39 }
0x109b   :  { %v1836_v52 = vpop.permute.xlu1 %1835 }
0x109c   :  { %v1853_v27 = vsel %vm346_vm4, %v1836_v52, 0  ;;  %2490 = vrot.lane.b32.xlu1 %v6871_v15, %s6057_s25  ;;  %5827 = vpow2.f32 %v2083_v37 }
0x109d   :  { %5290 = vmatpush3.bf16.xpose.msra.mxu0 %v1853_v27 }
0x109e   :  { %5321 = vmatprep.subr.bf16.mxu0 %v6048_v0 }
0x109f   :  { %v2114_v33 = vpop.permute.xlu1 %2113 }
0x10a0   :  { %2494 = vrot.lane.b32.xlu1 %v6881_v50, %s6057_s25 }
0x10a4   :  { %5292 = vmatmul.mubr.msk.bf16.vlgmr.msra.gmra.mrb[72].mxu0 %vm346_vm4, %v6871_v15 }
0x10a5   :  { %5322 = vmatpush3.bf16.msra.mxu0 %v2114_v33  ;;  %5295 = vmatprep.mubr.msk.bf16.mxu0 %vm6049_vm0, %v6048_v0 }
0x10a6   :  { %5323 = vmatprep.subr.bf16.mxu0 %v6048_v0  ;;  %v5828_v3 = vpop.eup %5827 }
0x10a7   :  { %v2097_v49 = vsel %vm434_vm6, %v5828_v3, 0.0 }
0x10ac   :  { %5296 = vmatmul.mubr.msk.bf16.gmra.mrb[76].mxu0 %vm346_vm4, %v6875_v53 }
0x10ad   :  { %5299 = vmatprep.mubr.msk.bf16.mxu0 %vm6049_vm0, %v6048_v0 }
0x10b2   :  { %2098 = vadd.xlane.f32.xlu0 %v2097_v49 }
0x10b4   :  { %5300 = vmatmul.mubr.msk.bf16.gmra.mrb[80].mxu0 %vm346_vm4, %v6881_v50 }
0x10b5   :  { %5327 = vmatprep.mubr.msk.bf16.mxu0 %vm6049_vm0, %v6048_v0 }
0x10c8   :  { %2275 = vrot.lane.b32.xlu0 %v6881_v50, %s6056_s24 }
0x10cc   :  { %2496 = vrot.lane.b32.xlu0 %v6871_v15, %s6058_s27 }
0x10d0   :  { %2498 = vrot.lane.b32.xlu0 %v6875_v53, %s6058_s27 }
0x10d4   :  { %2500 = vrot.lane.b32.xlu0 %v6881_v50, %s6058_s27 }
0x10d8   :  { %2492 = vrot.lane.b32.xlu0 %v6875_v53, %s6057_s25 }
0x10fe   :  { %v2087_v58 = vpop.xlane.xlu0 %2086 }
0x1100   :  { %v2090_v41 = vpop.xlane.xlu1 %2089 }
0x1101   :  { %5829 = vrcp.f32 %v2090_v41 }
0x1102   :  { %5831 = vrcp.f32 %v2087_v58 }
0x1104   :  { %v2118_v16 = vpop.permute.xlu1 %2117 }
0x1105   :  { %v2131_v9 = vsel %vm642_vm7, %v2118_v16, 0 }
0x1106   :  { %v2093_v7 = vpop.xlane.xlu0 %2092 }
0x1108   :  { %v2272_v57 = vpop.permute.xlu1 %2271 }
0x1109   :  { %v2287_v21 = vsel %vm346_vm4, %v2272_v57, 0 }
0x110a   :  { %v2096_v59 = vpop.xlane.xlu0 %2095 }
0x110b   :  { %5833 = vrcp.f32 %v2096_v59  ;;  %v5830_v40 = vpop.eup %5829 }
0x110c   :  { %5835 = vrcp.f32 %v2093_v7  ;;  %v5832_v22 = vpop.eup %5831  ;;  %v2106_v28 = vmul.f32 %v5830_v40, %v6951_v35  ;;  %v2274_v24 = vpop.permute.xlu1 %2273 }
0x110d   :  { %v2105_v8 = vmul.f32 %v5832_v22, %v6947_v1  ;;  %v2290_v38 = vsel %vm346_vm4, %v2274_v24, 0 }
0x110e   :  { %v2116_v13 = vpop.permute.xlu0 %2115 }
0x110f   :  { %5324 = vmatpush3.bf16.msra.mxu0 %v2116_v13  ;;  %v2110_v17 = vpack.c.bf16 %v2106_v28, %v2105_v8 }
0x1110   :  { %5325 = vmatprep.subr.bf16.mxu0 %v6048_v0  ;;  %v2266_v35 = vpop.permute.xlu1 %2265 }
0x1113   :  { %5326 = vmatpush3.bf16.msra.mxu0 %v2131_v9 }
0x1114   :  { %5357 = vmatprep.subr.bf16.mxu0 %v6048_v0  ;;  %v2268_v46 = vpop.permute.xlu1 %2267 }
0x1115   :  { %v5834_v5 = vpop.eup %5833 }
0x1116   :  { %5328 = vmatmul.mubr.msk.bf16.vlgmr.msra.gmra.mrb[84].mxu0 %vm421_vm5, %v2110_v17  ;;  %v5836_v26 = vpop.eup %5835  ;;  %v2108_v63 = vmul.f32 %v5834_v5, %v6962_v42 }
0x1117   :  { %5331 = vmatprep.mubr.msk.bf16.mxu0 %vm6049_vm0, %v6048_v0  ;;  %v2107_v10 = vmul.f32 %v5836_v26, %v6957_v47 }
0x1118   :  { %v2270_v43 = vpop.permute.xlu1 %2269 }
0x1119   :  { %v2111_v30 = vpack.c.bf16 %v2108_v63, %v2107_v10 }
0x111c   :  { %5358 = vmatpush3.bf16.xpose.msra.mxu0 %v2287_v21  ;;  %v2491_v34 = vpop.permute.xlu1 %2490 }
0x111d   :  { %5359 = vmatprep.subr.bf16.mxu0 %v6048_v0 }
0x111e   :  { %5332 = vmatmul.mubr.msk.bf16.gmra.mrb[88].mxu0 %vm421_vm5, %v2111_v30 }
0x111f   :  { %5335 = vmatprep.mubr.msk.bf16.mxu0 %vm6049_vm0, %v6048_v0 }
0x1120   :  { %v2495_v58 = vpop.permute.xlu1 %2494 }
0x1124   :  { %5360 = vmatpush3.bf16.xpose.msra.mxu0 %v2290_v38 }
0x1125   :  { %5361 = vmatprep.subr.bf16.mxu0 %v6048_v0 }
0x113f   :  { %v2099_v19 = vpop.xlane.xlu0 %2098 }
0x1140   :  { %5837 = vrcp.f32 %v2099_v19 }
0x1143   :  { %v2276_v12 = vpop.permute.xlu0 %2275 }
0x1144   :  { %v2293_v31 = vsel %vm346_vm4, %v2276_v12, 0 }
0x1145   :  { %5362 = vmatpush3.bf16.xpose.msra.mxu0 %v2293_v31 }
0x1146   :  { %5393 = vmatprep.subr.bf16.mxu0 %v6048_v0 }
0x1147   :  { %v2497_v36 = vpop.permute.xlu0 %2496 }
0x1148   :  { %v2512_v45 = vsel %vm346_vm4, %v2497_v36, 0 }
0x114a   :  { %v5838_v1 = vpop.eup %5837 }
0x114b   :  { %v2109_v18 = vmul.f32 %v5838_v1, %v5828_v3  ;;  %v2499_v14 = vpop.permute.xlu0 %2498 }
0x114c   :  { %v2515_v47 = vsel %vm346_vm4, %v2499_v14, 0 }
0x114d   :  { %v2112_v44 = vpack.c.bf16 %v2109_v18, %v2109_v18 }
0x114f   :  { %5336 = vmatmul.mubr.msk.bf16.gmra.mrb[92].mxu0 %vm421_vm5, %v2112_v44  ;;  %v2501_v62 = vpop.permute.xlu0 %2500 }
0x1150   :  { %5363 = vmatprep.mubr.msk.bf16.mxu0 %vm6049_vm0, %v6048_v0  ;;  %v2518_v42 = vsel %vm346_vm4, %v2501_v62, 0 }
0x1153   :  { %v2493_v25 = vpop.permute.xlu0 %2492 }
0x1157   :  { %5364 = vmatmul.mubr.msk.bf16.vlgmr.msra.gmra.mrb[96].mxu0 %vm346_vm4, %v2266_v35 }
0x1158   :  { %5394 = vmatpush3.bf16.xpose.msra.mxu0 %v2512_v45  ;;  %5367 = vmatprep.mubr.msk.bf16.mxu0 %vm6049_vm0, %v6048_v0 }
0x1159   :  { %5395 = vmatprep.subr.bf16.mxu0 %v6048_v0 }
0x115f   :  { %5368 = vmatmul.mubr.msk.bf16.gmra.mrb[100].mxu0 %vm346_vm4, %v2268_v46 }
0x1160   :  { %5396 = vmatpush3.bf16.xpose.msra.mxu0 %v2515_v47  ;;  %5371 = vmatprep.mubr.msk.bf16.mxu0 %vm6049_vm0, %v6048_v0 }
0x1161   :  { %5397 = vmatprep.subr.bf16.mxu0 %v6048_v0 }
0x1167   :  { %5372 = vmatmul.mubr.msk.bf16.gmra.mrb[104].mxu0 %vm346_vm4, %v2270_v43 }
0x1168   :  { %5398 = vmatpush3.bf16.xpose.msra.mxu0 %v2518_v42  ;;  %5399 = vmatprep.mubr.msk.bf16.mxu0 %vm6049_vm0, %v6048_v0 }
0x1169   :  { %5429 = vmatprep.subr.bf16.mxu0 %v6048_v0 }
0x116f   :  { %5400 = vmatmul.mubr.msk.bf16.vlgmr.msra.gmra.mrb[108].mxu0 %vm346_vm4, %v2491_v34 }
0x1170   :  { %5403 = vmatprep.mubr.msk.bf16.mxu0 %vm6049_vm0, %v6048_v0 }
0x1177   :  { %v1889_v52 = vpop.f32.mrb[72].mxu0  ;;  %5404 = vmatmul.mubr.msk.bf16.gmra.mrb[112].mxu0 %vm346_vm4, %v2493_v25 }
0x1178   :  { %v1890_v39 = vadd.f32 %v6907_v6, %v1889_v52  ;;  %v5293_v27 = vpop.f32.mrb[73].mxu0  ;;  %5407 = vmatprep.mubr.msk.bf16.mxu0 %vm6049_vm0, %v6048_v0 }
0x1179   :  { %v1892_v37 = vpop.f32.mrb[74].mxu0 }
0x117a   :  { %v1893_v33 = vadd.f32 %v6913_v51, %v1892_v37  ;;  %v5294_v3 = vpop.f32.mrb[75].mxu0  ;;  %v1911_v49 = vsel %vm421_vm5, %v1890_v39, -inf }
0x117b   :  { %1912 = vmax.xlane.f32.xlu0 %v1911_v49 }
0x117c   :  { %v1914_v41 = vsel %vm421_vm5, %v1893_v33, -inf }
0x117d   :  { %1915 = vmax.xlane.f32.xlu1 %v1914_v41 }
0x117f   :  { %v1897_v7 = vpop.f32.mrb[76].mxu0  ;;  %5408 = vmatmul.mubr.msk.bf16.gmra.mrb[116].mxu0 %vm346_vm4, %v2495_v58 }
0x1180   :  { %v1898_v59 = vadd.f32 %v6921_v55, %v1897_v7  ;;  %v5297_v40 = vpop.f32.mrb[77].mxu0  ;;  %5431 = vmatprep.mubr.msk.bf16.mxu0 %vm6049_vm0, %v6048_v0 }
0x1181   :  { %v1900_v13 = vpop.f32.mrb[78].mxu0 }
0x1182   :  { %v1901_v22 = vadd.f32 %v6927_v11, %v1900_v13  ;;  %v5298_v16 = vpop.f32.mrb[79].mxu0  ;;  %v1917_v28 = vsel %vm421_vm5, %v1898_v59, -inf }
0x1183   :  { %1918 = vmax.xlane.f32.xlu0 %v1917_v28 }
0x1184   :  { %v1920_v8 = vsel %vm421_vm5, %v1901_v22, -inf }
0x1187   :  { %1921 = vmax.xlane.f32.xlu0 %v1920_v8  ;;  %v1905_v9 = vpop.f32.mrb[80].mxu0 }
0x1188   :  { %v7066_v17 = vadd.f32 %v6939_v54, %v1905_v9  ;;  %v5301_v5 = vpop.f32.mrb[81].mxu0 }
0x1189   :  { %v1908_v26 = vpop.f32.mrb[82].mxu0 }
0x118a   :  { %v5302_v57 = vpop.f32.mrb[83].mxu0  ;;  %v1923_v63 = vsel %vm434_vm6, %v7066_v17, -inf }
0x118b   :  { %1924 = vmax.xlane.f32.xlu1 %v1923_v63 }
0x11e9   :  { %v7070_v10 = vpop.f32.mrb[84].mxu0 }
0x11ea   :  { %v5329_v21 = vpop.f32.mrb[85].mxu0 }
0x11eb   :  { %v7072_v30 = vpop.f32.mrb[86].mxu0 }
0x11ec   :  { %v5330_v24 = vpop.f32.mrb[87].mxu0 }
0x11f1   :  { %v7074_v38 = vpop.f32.mrb[88].mxu0 }
0x11f2   :  { %v5333_v19 = vpop.f32.mrb[89].mxu0 }
0x11f3   :  { %v7076_v12 = vpop.f32.mrb[90].mxu0 }
0x11f4   :  { %v5334_v31 = vpop.f32.mrb[91].mxu0 }
0x1208   :  { %v1913_v1 = vpop.xlane.xlu0 %1912 }
0x1209   :  { %v1926_v18 = vsub.f32 %v1890_v39, %v1913_v1 }
0x120a   :  { %v1916_v44 = vpop.xlane.xlu1 %1915 }
0x120b   :  { %v1931_v36 = vmul.f32 1.442695, %v1926_v18  ;;  %v1927_v35 = vsub.f32 %v1893_v33, %v1916_v44 }
0x120d   :  { %5839 = vpow2.f32 %v1931_v36  ;;  %v1933_v45 = vmul.f32 1.442695, %v1927_v35 }
0x120f   :  { %5841 = vpow2.f32 %v1933_v45 }
0x1210   :  { %v1919_v14 = vpop.xlane.xlu0 %1918 }
0x1211   :  { %v1928_v46 = vsub.f32 %v1898_v59, %v1919_v14 }
0x1213   :  { %v1935_v47 = vmul.f32 1.442695, %v1928_v46 }
0x1214   :  { %v1922_v62 = vpop.xlane.xlu0 %1921 }
0x1215   :  { %5843 = vpow2.f32 %v1935_v47  ;;  %v1929_v43 = vsub.f32 %v1901_v22, %v1922_v62 }
0x1217   :  { %v7078_v42 = vpop.eup %5839  ;;  %v1937_v34 = vmul.f32 1.442695, %v1929_v43 }
0x1218   :  { %v1941_v25 = vsel %vm421_vm5, %v7078_v42, 0.0  ;;  %v1925_v63 = vpop.xlane.xlu1 %1924 }
0x1219   :  { %v7082_v52 = vpop.eup %5841  ;;  %5845 = vpow2.f32 %v1937_v34  ;;  %1942 = vadd.xlane.f32.xlu0 %v1941_v25  ;;  %v1930_v24 = vsub.f32 %v7066_v17, %v1925_v63 }
0x121a   :  { %v1944_v39 = vsel %vm421_vm5, %v7082_v52, 0.0 }
0x121b   :  { %1945 = vadd.xlane.f32.xlu1 %v1944_v39  ;;  %v1939_v1 = vmul.f32 1.442695, %v1930_v24 }
0x121d   :  { %5847 = vpow2.f32 %v1939_v1 }
0x121f   :  { %v7086_v27 = vpop.eup %5843 }
0x1220   :  { %v1947_v37 = vsel %vm421_vm5, %v7086_v27, 0.0 }
0x1221   :  { %1948 = vadd.xlane.f32.xlu0 %v1947_v37 }
0x1222   :  { %v7090_v33 = vpop.f32.mrb[92].mxu0 }
0x1223   :  { %v7092_v3 = vpop.eup %5845  ;;  %v5337_v49 = vpop.f32.mrb[93].mxu0 }
0x1224   :  { %v2186_v41 = vpop.f32.mrb[94].mxu0  ;;  %v1950_v58 = vsel %vm421_vm5, %v7092_v3, 0.0 }
0x1225   :  { %1951 = vadd.xlane.f32.xlu1 %v1950_v58  ;;  %v5338_v7 = vpop.f32.mrb[95].mxu0 }
0x1227   :  { %v7103_v46 = vpop.eup %5847 }
0x1228   :  { %v1953_v17 = vsel %vm434_vm6, %v7103_v46, 0.0 }
0x122a   :  { %v2329_v59 = vpop.f32.mrb[96].mxu0 }
0x122b   :  { %v5365_v40 = vpop.f32.mrb[97].mxu0  ;;  %v7106_v34 = vadd.f32 %v6907_v6, %v2329_v59 }
0x122c   :  { %v2332_v13 = vpop.f32.mrb[98].mxu0 }
0x122d   :  { %v5366_v22 = vpop.f32.mrb[99].mxu0  ;;  %v7111_v39 = vadd.f32 %v6913_v51, %v2332_v13  ;;  %v2351_v49 = vsel %vm421_vm5, %v7106_v34, -inf }
0x122f   :  { %v2354_v7 = vsel %vm421_vm5, %v7111_v39, -inf }
0x1232   :  { %v2337_v16 = vpop.f32.mrb[100].mxu0 }
0x1233   :  { %v5369_v28 = vpop.f32.mrb[101].mxu0  ;;  %v7114_v37 = vadd.f32 %v6921_v55, %v2337_v16 }
0x1234   :  { %v2340_v8 = vpop.f32.mrb[102].mxu0 }
0x1235   :  { %v5370_v9 = vpop.f32.mrb[103].mxu0  ;;  %v7119_v41 = vadd.f32 %v6927_v11, %v2340_v8  ;;  %v2357_v59 = vsel %vm421_vm5, %v7114_v37, -inf }
0x1236   :  { %2189 = vrot.lane.b32.xlu1 %v6871_v15, %s6050_s26 }
0x1237   :  { %2191 = vrot.lane.b32.xlu0 %v6875_v53, %s6050_s26  ;;  %v2360_v22 = vsel %vm421_vm5, %v7119_v41, -inf }
0x123a   :  { %2193 = vrot.lane.b32.xlu1 %v6881_v50, %s6050_s26  ;;  %v2345_v5 = vpop.f32.mrb[104].mxu0 }
0x123b   :  { %v5373_v26 = vpop.f32.mrb[105].mxu0  ;;  %v7122_v58 = vadd.f32 %v6939_v54, %v2345_v5 }
0x123c   :  { %v2348_v57 = vpop.f32.mrb[106].mxu0 }
0x123d   :  { %v5374_v21 = vpop.f32.mrb[107].mxu0  ;;  %v2363_v16 = vsel %vm434_vm6, %v7122_v58, -inf }
0x1242   :  { %v2554_v19 = vpop.f32.mrb[108].mxu0 }
0x1243   :  { %v5401_v31 = vpop.f32.mrb[109].mxu0  ;;  %v7129_v40 = vadd.f32 %v6907_v6, %v2554_v19 }
0x1244   :  { %v2557_v18 = vpop.f32.mrb[110].mxu0 }
0x1245   :  { %v5402_v44 = vpop.f32.mrb[111].mxu0  ;;  %v7132_v13 = vadd.f32 %v6913_v51, %v2557_v18  ;;  %v2576_v28 = vsel %vm421_vm5, %v7129_v40, -inf }
0x1247   :  { %v2579_v8 = vsel %vm421_vm5, %v7132_v13, -inf }
0x124a   :  { %v2562_v36 = vpop.f32.mrb[112].mxu0 }
0x124b   :  { %v5405_v35 = vpop.f32.mrb[113].mxu0  ;;  %v7147_v6 = vadd.f32 %v6921_v55, %v2562_v36 }
0x124c   :  { %v2565_v45 = vpop.f32.mrb[114].mxu0 }
0x124d   :  { %v5406_v14 = vpop.f32.mrb[115].mxu0  ;;  %v7150_v51 = vadd.f32 %v6927_v11, %v2565_v45  ;;  %v2582_v5 = vsel %vm421_vm5, %v7147_v6, -inf }
0x124f   :  { %v2585_v26 = vsel %vm421_vm5, %v7150_v51, -inf }
0x1252   :  { %v2570_v47 = vpop.f32.mrb[116].mxu0 }
0x1253   :  { %v5409_v62 = vpop.f32.mrb[117].mxu0  ;;  %v7153_v9 = vadd.f32 %v6939_v54, %v2570_v47 }
0x1254   :  { %v2573_v43 = vpop.f32.mrb[118].mxu0 }
0x1255   :  { %v5410_v25 = vpop.f32.mrb[119].mxu0  ;;  %v2588_v57 = vsel %vm434_vm6, %v7153_v9, -inf }
0x1256   :  { %1954 = vadd.xlane.f32.xlu0 %v1953_v17 }
0x125a   :  { %2352 = vmax.xlane.f32.xlu0 %v2351_v49 }
0x125e   :  { %2355 = vmax.xlane.f32.xlu1 %v2354_v7  ;;  %2358 = vmax.xlane.f32.xlu0 %v2357_v59 }
0x1262   :  { %2361 = vmax.xlane.f32.xlu1 %v2360_v22  ;;  %2364 = vmax.xlane.f32.xlu0 %v2363_v16 }
0x1266   :  { %2577 = vmax.xlane.f32.xlu1 %v2576_v28  ;;  %2580 = vmax.xlane.f32.xlu0 %v2579_v8 }
0x1277   :  { %2411 = vrot.lane.b32.xlu1 %v6875_v53, %s6059_s13 }
0x127c   :  { %2409 = vrot.lane.b32.xlu0 %v6871_v15, %s6059_s13 }
0x129b   :  { %2583 = vmax.xlane.f32.xlu1 %v2582_v5  ;;  %2586 = vmax.xlane.f32.xlu0 %v2585_v26 }
0x129f   :  { %2589 = vmax.xlane.f32.xlu1 %v2588_v57 }
0x12a6   :  { %v1943_v63 = vpop.xlane.xlu0 %1942 }
0x12a8   :  { %v1946_v55 = vpop.xlane.xlu1 %1945 }
0x12a9   :  { %5849 = vrcp.f32 %v1946_v55 }
0x12aa   :  { %5851 = vrcp.f32 %v1943_v63 }
0x12ae   :  { %v1949_v54 = vpop.xlane.xlu0 %1948 }
0x12b0   :  { %2413 = vrot.lane.b32.xlu1 %v6881_v50, %s6059_s13 }
0x12b2   :  { %v1952_v11 = vpop.xlane.xlu1 %1951  ;;  %v2192_v19 = vpop.permute.xlu0 %2191 }
0x12b3   :  { %5853 = vrcp.f32 %v1952_v11  ;;  %v5850_v24 = vpop.eup %5849 }
0x12b4   :  { %5855 = vrcp.f32 %v1949_v54  ;;  %v5852_v31 = vpop.eup %5851  ;;  %v1962_v18 = vmul.f32 %v5850_v24, %v7082_v52 }
0x12b5   :  { %v1961_v44 = vmul.f32 %v5852_v31, %v7078_v42 }
0x12b6   :  { %v2190_v21 = vpop.permute.xlu1 %2189 }
0x12b7   :  { %5340 = vmatpush3.bf16.msra.mxu1 %v2190_v21  ;;  %v1966_v35 = vpack.c.bf16 %v1962_v18, %v1961_v44 }
0x12b8   :  { %5341 = vmatprep.subr.bf16.mxu1 %v6048_v0 }
0x12ba   :  { %v2194_v1 = vpop.permute.xlu1 %2193 }
0x12bb   :  { %5342 = vmatpush3.bf16.msra.mxu1 %v2192_v19  ;;  %v2207_v36 = vsel %vm642_vm7, %v2194_v1, 0 }
0x12bc   :  { %5343 = vmatprep.subr.bf16.mxu1 %v6048_v0 }
0x12bd   :  { %v5854_v45 = vpop.eup %5853 }
0x12be   :  { %v5856_v14 = vpop.eup %5855  ;;  %v1964_v47 = vmul.f32 %v5854_v45, %v7092_v3 }
0x12bf   :  { %5344 = vmatpush3.bf16.msra.mxu1 %v2207_v36  ;;  %v1963_v52 = vmul.f32 %v5856_v14, %v7086_v27 }
0x12c0   :  { %5375 = vmatprep.subr.bf16.mxu1 %v6048_v0 }
0x12c1   :  { %v1967_v62 = vpack.c.bf16 %v1964_v47, %v1963_v52 }
0x12c2   :  { %5346 = vmatmul.mubr.msk.bf16.vlgmr.msra.gmra.mrb[96].mxu1 %vm421_vm5, %v1966_v35 }
0x12c3   :  { %5349 = vmatprep.mubr.msk.bf16.mxu1 %vm6049_vm0, %v6048_v0 }
0x12ca   :  { %5350 = vmatmul.mubr.msk.bf16.gmra.mrb[100].mxu1 %vm421_vm5, %v1967_v62 }
0x12cb   :  { %5353 = vmatprep.mubr.msk.bf16.mxu1 %vm6049_vm0, %v6048_v0 }
0x12e3   :  { %v1955_v42 = vpop.xlane.xlu0 %1954 }
0x12e4   :  { %5857 = vrcp.f32 %v1955_v42 }
0x12e7   :  { %v2353_v43 = vpop.xlane.xlu0 %2352 }
0x12e8   :  { %v2366_v25 = vsub.f32 %v7106_v34, %v2353_v43 }
0x12ea   :  { %v2371_v17 = vmul.f32 1.442695, %v2366_v25 }
0x12eb   :  { %v2356_v49 = vpop.xlane.xlu1 %2355  ;;  %v2359_v7 = vpop.xlane.xlu0 %2358 }
0x12ec   :  { %5859 = vpow2.f32 %v2371_v17  ;;  %v2367_v59 = vsub.f32 %v7111_v39, %v2356_v49  ;;  %v2368_v3 = vsub.f32 %v7114_v37, %v2359_v7 }
0x12ee   :  { %v5858_v27 = vpop.eup %5857  ;;  %v2373_v22 = vmul.f32 1.442695, %v2367_v59  ;;  %v2375_v16 = vmul.f32 1.442695, %v2368_v3 }
0x12ef   :  { %v2362_v28 = vpop.xlane.xlu1 %2361  ;;  %v2365_v8 = vpop.xlane.xlu0 %2364  ;;  %v1965_v5 = vmul.f32 %v5858_v27, %v7103_v46 }
0x12f0   :  { %5861 = vpow2.f32 %v2373_v22  ;;  %v2369_v26 = vsub.f32 %v7119_v41, %v2362_v28  ;;  %v2370_v55 = vsub.f32 %v7122_v58, %v2365_v8 }
0x12f1   :  { %v1968_v57 = vpack.c.bf16 %v1965_v5, %v1965_v5  ;;  %5863 = vpow2.f32 %v2375_v16 }
0x12f2   :  { %v2377_v34 = vmul.f32 1.442695, %v2369_v26  ;;  %v2379_v46 = vmul.f32 1.442695, %v2370_v55 }
0x12f3   :  { %5354 = vmatmul.mubr.msk.bf16.gmra.mrb[104].mxu1 %vm421_vm5, %v1968_v57  ;;  %v2578_v39 = vpop.xlane.xlu1 %2577  ;;  %v2581_v63 = vpop.xlane.xlu0 %2580 }
0x12f4   :  { %v2591_v37 = vsub.f32 %v7129_v40, %v2578_v39  ;;  %5381 = vmatprep.mubr.msk.bf16.mxu1 %vm6049_vm0, %v6048_v0  ;;  %5865 = vpow2.f32 %v2377_v34  ;;  %v2592_v14 = vsub.f32 %v7132_v13, %v2581_v63 }
0x12f6   :  { %v7187_v11 = vpop.eup %5859  ;;  %v2596_v54 = vmul.f32 1.442695, %v2591_v37  ;;  %v2598_v52 = vmul.f32 1.442695, %v2592_v14 }
0x12f7   :  { %v2410_v41 = vpop.permute.xlu0 %2409  ;;  %v2381_v21 = vsel %vm421_vm5, %v7187_v11, 0.0  ;;  %v2412_v40 = vpop.permute.xlu1 %2411 }
0x12f8   :  { %5867 = vpow2.f32 %v2596_v54  ;;  %5376 = vmatpush3.bf16.msra.mxu1 %v2410_v41  ;;  %2382 = vadd.xlane.f32.xlu1 %v2381_v21 }
0x12f9   :  { %5377 = vmatprep.subr.bf16.mxu1 %v6048_v0  ;;  %5869 = vpow2.f32 %v2379_v46 }
0x12fa   :  { %v7192_v58 = vpop.eup %5861  ;;  %5871 = vpow2.f32 %v2598_v52 }
0x12fb   :  { %v2384_v24 = vsel %vm421_vm5, %v7192_v58, 0.0  ;;  %v7196_v19 = vpop.eup %5863 }
0x12fc   :  { %5378 = vmatpush3.bf16.msra.mxu1 %v2412_v40  ;;  %2385 = vadd.xlane.f32.xlu0 %v2384_v24  ;;  %v2387_v31 = vsel %vm421_vm5, %v7196_v19, 0.0 }
0x12fd   :  { %5379 = vmatprep.subr.bf16.mxu1 %v6048_v0 }
0x12fe   :  { %v7201_v1 = vpop.eup %5865 }
0x12ff   :  { %v2390_v44 = vsel %vm421_vm5, %v7201_v1, 0.0 }
0x1300   :  { %2388 = vadd.xlane.f32.xlu0 %v2387_v31 }
0x1302   :  { %v7203_v18 = vpop.eup %5867 }
0x1303   :  { %v2606_v36 = vsel %vm421_vm5, %v7203_v18, 0.0  ;;  %v7209_v35 = vpop.eup %5869 }
0x1304   :  { %2391 = vadd.xlane.f32.xlu0 %v2390_v44  ;;  %2607 = vadd.xlane.f32.xlu1 %v2606_v36  ;;  %v2393_v45 = vsel %vm434_vm6, %v7209_v35, 0.0  ;;  %v7223_v13 = vpop.eup %5871 }
0x1308   :  { %2394 = vadd.xlane.f32.xlu0 %v2393_v45 }
0x1315   :  { %2634 = vrot.lane.b32.xlu1 %v6871_v15, %s6060_s14 }
0x131e   :  { %2636 = vrot.lane.b32.xlu0 %v6875_v53, %s6060_s14 }
0x1328   :  { %v2584_v47 = vpop.xlane.xlu1 %2583  ;;  %v2587_v42 = vpop.xlane.xlu0 %2586 }
0x1329   :  { %v2593_v62 = vsub.f32 %v7147_v6, %v2584_v47  ;;  %v2594_v49 = vsub.f32 %v7150_v51, %v2587_v42 }
0x132b   :  { %v2600_v17 = vmul.f32 1.442695, %v2593_v62  ;;  %v2602_v53 = vmul.f32 1.442695, %v2594_v49 }
0x132c   :  { %v2590_v43 = vpop.xlane.xlu1 %2589 }
0x132d   :  { %v2595_v25 = vsub.f32 %v7153_v9, %v2590_v43  ;;  %v2609_v9 = vsel %vm421_vm5, %v7223_v13, 0.0 }
0x132f   :  { %v2604_v7 = vmul.f32 1.442695, %v2595_v25 }
0x1330   :  { %v2414_v59 = vpop.permute.xlu1 %2413 }
0x1331   :  { %5873 = vpow2.f32 %v2604_v7  ;;  %v2427_v15 = vsel %vm642_vm7, %v2414_v59, 0 }
0x1332   :  { %5380 = vmatpush3.bf16.msra.mxu1 %v2427_v15  ;;  %5875 = vpow2.f32 %v2600_v17 }
0x1333   :  { %5411 = vmatprep.subr.bf16.mxu1 %v6048_v0  ;;  %5877 = vpow2.f32 %v2602_v53 }
0x133b   :  { %v7225_v6 = vpop.eup %5873 }
0x133c   :  { %v2618_v51 = vsel %vm434_vm6, %v7225_v6, 0.0  ;;  %v7231_v3 = vpop.eup %5875 }
0x133d   :  { %2610 = vadd.xlane.f32.xlu0 %v2609_v9  ;;  %2619 = vadd.xlane.f32.xlu1 %v2618_v51  ;;  %v2612_v27 = vsel %vm421_vm5, %v7231_v3, 0.0  ;;  %v7235_v22 = vpop.eup %5877 }
0x133e   :  { %v2615_v16 = vsel %vm421_vm5, %v7235_v22, 0.0 }
0x1341   :  { %2613 = vadd.xlane.f32.xlu0 %v2612_v27 }
0x1345   :  { %2616 = vadd.xlane.f32.xlu0 %v2615_v16 }
0x135b   :  { %2638 = vrot.lane.b32.xlu0 %v6881_v50, %s6060_s14 }
0x135f   :  { %2720 = vrot.lane.b32.xlu0 %v6847_v60, %s6050_s26 }
0x1385   :  { %v2383_v28 = vpop.xlane.xlu1 %2382 }
0x1386   :  { %5879 = vrcp.f32 %v2383_v28 }
0x1389   :  { %v2386_v8 = vpop.xlane.xlu0 %2385 }
0x138a   :  { %5881 = vrcp.f32 %v2386_v8 }
0x138d   :  { %v2389_v5 = vpop.xlane.xlu0 %2388 }
0x138e   :  { %5883 = vrcp.f32 %v2389_v5 }
0x1390   :  { %v5880_v57 = vpop.eup %5879 }
0x1391   :  { %v2392_v26 = vpop.xlane.xlu0 %2391  ;;  %v2608_v34 = vpop.xlane.xlu1 %2607  ;;  %v2401_v39 = vmul.f32 %v5880_v57, %v7187_v11 }
0x1392   :  { %5885 = vrcp.f32 %v2392_v26 }
0x1394   :  { %v5882_v55 = vpop.eup %5881 }
0x1395   :  { %v2402_v63 = vmul.f32 %v5882_v55, %v7192_v58  ;;  %v2243_v37 = vpop.f32.mrb[96].mxu1  ;;  %v2395_v50 = vpop.xlane.xlu0 %2394 }
0x1396   :  { %v7246_v46 = vadd.f32 %v2243_v37, %v7070_v10  ;;  %5887 = vrcp.f32 %v2395_v50  ;;  %v5347_v54 = vpop.f32.mrb[97].mxu1  ;;  %v2635_v31 = vpop.permute.xlu1 %2634 }
0x1397   :  { %v2406_v41 = vpack.c.bf16 %v2402_v63, %v2401_v39  ;;  %v2246_v21 = vpop.f32.mrb[98].mxu1  ;;  %5889 = vrcp.f32 %v2608_v34 }
0x1398   :  { %v7249_v40 = vadd.f32 %v2246_v21, %v7072_v30  ;;  %v5348_v24 = vpop.f32.mrb[99].mxu1  ;;  %v5884_v44 = vpop.eup %5883 }
0x1399   :  { %5382 = vmatmul.mubr.msk.bf16.vlgmr.msra.gmra.mrb[108].mxu1 %vm421_vm5, %v2406_v41  ;;  %v2637_v11 = vpop.permute.xlu0 %2636  ;;  %v2403_v36 = vmul.f32 %v5884_v44, %v7196_v19 }
0x139a   :  { %5412 = vmatpush3.bf16.msra.mxu1 %v2635_v31  ;;  %5385 = vmatprep.mubr.msk.bf16.mxu1 %vm6049_vm0, %v6048_v0 }
0x139b   :  { %5413 = vmatprep.subr.bf16.mxu1 %v6048_v0 }
0x139c   :  { %v5886_v10 = vpop.eup %5885 }
0x139d   :  { %v2251_v58 = vpop.f32.mrb[100].mxu1  ;;  %v2404_v45 = vmul.f32 %v5886_v10, %v7201_v1 }
0x139e   :  { %v2252_v30 = vadd.f32 %v2251_v58, %v7074_v38  ;;  %5414 = vmatpush3.bf16.msra.mxu1 %v2637_v11  ;;  %v5351_v14 = vpop.f32.mrb[101].mxu1 }
0x139f   :  { %v2254_v47 = vpop.f32.mrb[102].mxu1  ;;  %v2407_v52 = vpack.c.bf16 %v2404_v45, %v2403_v36  ;;  %5415 = vmatprep.subr.bf16.mxu1 %v6048_v0 }
0x13a0   :  { %v5888_v62 = vpop.eup %5887  ;;  %v2255_v42 = vadd.f32 %v2254_v47, %v7076_v12  ;;  %v5352_v43 = vpop.f32.mrb[103].mxu1 }
0x13a1   :  { %5386 = vmatmul.mubr.msk.bf16.gmra.mrb[112].mxu1 %vm421_vm5, %v2407_v52  ;;  %v2405_v19 = vmul.f32 %v5888_v62, %v7209_v35  ;;  %v5890_v53 = vpop.eup %5889 }
0x13a2   :  { %5389 = vmatprep.mubr.msk.bf16.mxu1 %vm6049_vm0, %v6048_v0  ;;  %v2626_v51 = vmul.f32 %v5890_v53, %v7203_v18 }
0x13a3   :  { %v2408_v1 = vpack.c.bf16 %v2405_v19, %v2405_v19 }
0x13a9   :  { %5390 = vmatmul.mubr.msk.bf16.gmra.mrb[116].mxu1 %vm421_vm5, %v2408_v1 }
0x13aa   :  { %5417 = vmatprep.mubr.msk.bf16.mxu1 %vm6049_vm0, %v6048_v0 }
0x13c6   :  { %v2259_v38 = vpop.f32.mrb[104].mxu1 }
0x13c7   :  { %v2260_v25 = vadd.f32 %v2259_v38, %v7090_v33  ;;  %v5355_v17 = vpop.f32.mrb[105].mxu1 }
0x13c8   :  { %v2262_v49 = vpop.f32.mrb[106].mxu1 }
0x13c9   :  { %v5356_v12 = vpop.f32.mrb[107].mxu1 }
0x13ca   :  { %v2611_v7 = vpop.xlane.xlu0 %2610  ;;  %v2620_v9 = vpop.xlane.xlu1 %2619 }
0x13cb   :  { %5891 = vrcp.f32 %v2611_v7 }
0x13ce   :  { %v2614_v59 = vpop.xlane.xlu0 %2613 }
0x13cf   :  { %5893 = vrcp.f32 %v2614_v59 }
0x13d2   :  { %v2617_v15 = vpop.xlane.xlu0 %2616 }
0x13d3   :  { %5895 = vrcp.f32 %v2617_v15 }
0x13d4   :  { %5897 = vrcp.f32 %v2620_v9 }
0x13d5   :  { %v5892_v35 = vpop.eup %5891 }
0x13d6   :  { %v2627_v27 = vmul.f32 %v5892_v35, %v7223_v13  ;;  %v2639_v16 = vpop.permute.xlu0 %2638 }
0x13d7   :  { %v2652_v33 = vsel %vm642_vm7, %v2639_v16, 0 }
0x13d8   :  { %v2631_v28 = vpack.c.bf16 %v2627_v27, %v2626_v51  ;;  %5416 = vmatpush3.bf16.msra.mxu1 %v2652_v33 }
0x13d9   :  { %5443 = vmatprep.subr.bf16.mxu1 %v6048_v0  ;;  %v5894_v8 = vpop.eup %5893 }
0x13da   :  { %v2628_v26 = vmul.f32 %v5894_v8, %v7231_v3  ;;  %v2721_v52 = vpop.permute.xlu0 %2720 }
0x13db   :  { %5418 = vmatmul.mubr.msk.bf16.vlgmr.msra.gmra.mrb[120].mxu1 %vm421_vm5, %v2631_v28 }
0x13dc   :  { %5421 = vmatprep.mubr.msk.bf16.mxu1 %vm6049_vm0, %v6048_v0 }
0x13dd   :  { %v5896_v5 = vpop.eup %5895 }
0x13de   :  { %v2629_v18 = vmul.f32 %v5896_v5, %v7235_v22  ;;  %v5898_v57 = vpop.eup %5897 }
0x13df   :  { %v2630_v34 = vmul.f32 %v5898_v57, %v7225_v6 }
0x13e0   :  { %v2632_v13 = vpack.c.bf16 %v2629_v18, %v2628_v26 }
0x13e1   :  { %v2633_v55 = vpack.c.bf16 %v2630_v34, %v2630_v34 }
0x13e3   :  { %5422 = vmatmul.mubr.msk.bf16.gmra.mrb[124].mxu1 %vm421_vm5, %v2632_v13 }
0x13e4   :  { %5425 = vmatprep.mubr.msk.bf16.mxu1 %vm6049_vm0, %v6048_v0 }
0x13eb   :  { %5426 = vmatmul.mubr.msk.bf16.gmra.mrb[128].mxu1 %vm421_vm5, %v2633_v55 }
0x13ec   :  { %5451 = vmatprep.mubr.msk.bf16.mxu1 %vm6049_vm0, %v6048_v0 }
0x146c   :  { %v2463_v39 = vpop.f32.mrb[108].mxu1 }
0x146d   :  { %v2485_v3 = vadd.f32 %v2463_v39, %v7246_v46  ;;  %v5383_v63 = vpop.f32.mrb[109].mxu1 }
0x146e   :  { %v2466_v22 = vpop.f32.mrb[110].mxu1 }
0x146f   :  { %v2486_v37 = vadd.f32 %v2466_v22, %v7249_v40  ;;  %v5384_v50 = vpop.f32.mrb[111].mxu1 }
0x1474   :  { %v2471_v54 = vpop.f32.mrb[112].mxu1 }
0x1475   :  { %v2487_v41 = vadd.f32 %v2471_v54, %v2252_v30  ;;  %v5387_v21 = vpop.f32.mrb[113].mxu1 }
0x1476   :  { %v2474_v24 = vpop.f32.mrb[114].mxu1 }
0x1477   :  { %v2488_v31 = vadd.f32 %v2474_v24, %v2255_v42  ;;  %v5388_v6 = vpop.f32.mrb[115].mxu1 }
0x147c   :  { %v2479_v44 = vpop.f32.mrb[116].mxu1 }
0x147d   :  { %v2489_v10 = vadd.f32 %v2479_v44, %v2260_v25  ;;  %v5391_v11 = vpop.f32.mrb[117].mxu1 }
0x147e   :  { %v2482_v58 = vpop.f32.mrb[118].mxu1 }
0x147f   :  { %v5392_v36 = vpop.f32.mrb[119].mxu1 }
0x14ae   :  { %v2688_v45 = vpop.f32.mrb[120].mxu1 }
0x14af   :  { %v2710_v14 = vadd.f32 %v2688_v45, %v2485_v3  ;;  %v5419_v47 = vpop.f32.mrb[121].mxu1  ;;  %v5687_v45 = vld [vmem:[%s8062_s3 + $0x38] sm:$0xff]  }
0x14b0   :  { %v2691_v46 = vpop.f32.mrb[122].mxu1  ;;  %5430 = vmatpush3.bf16.msra.mxu0 %v5687_v45 }
0x14b1   :  { %v2715_v62 = vadd.f32 %v2710_v14, %v6811_v48  ;;  %v2711_v40 = vadd.f32 %v2691_v46, %v2486_v37  ;;  %v5420_v43 = vpop.f32.mrb[123].mxu1  ;;  %5463 = vmatprep.subr.bf16.mxu0 %v6048_v0 }
0x14b3   :  { %v2716_v30 = vadd.f32 %v2711_v40, %v6814_v32  ;;  %v7288_v19 = vadd.f32 %v2721_v52, %v2715_v62 }
0x14b5   :  { %v2728_v42 = vsel %vm170_vm2, %v7288_v19, 0.0  ;;  %v7292_v1 = vadd.f32 %v2721_v52, %v2716_v30 }
0x14b6   :  { %2729 = vadd.xlane.f32.xlu0 %v2728_v42  ;;  %v2696_v38 = vpop.f32.mrb[124].mxu1 }
0x14b7   :  { %v2712_v25 = vadd.f32 %v2696_v38, %v2487_v41  ;;  %v5423_v17 = vpop.f32.mrb[125].mxu1  ;;  %v2731_v49 = vsel %vm170_vm2, %v7292_v1, 0.0 }
0x14b8   :  { %2732 = vadd.xlane.f32.xlu1 %v2731_v49  ;;  %v2699_v48 = vpop.f32.mrb[126].mxu1 }
0x14b9   :  { %v2717_v12 = vadd.f32 %v2712_v25, %v6821_v20  ;;  %v2713_v7 = vadd.f32 %v2699_v48, %v2488_v31  ;;  %v5424_v32 = vpop.f32.mrb[127].mxu1 }
0x14bb   :  { %v7297_v59 = vadd.f32 %v2721_v52, %v2717_v12  ;;  %v2718_v15 = vadd.f32 %v2713_v7, %v6824_v61 }
0x14bd   :  { %v7300_v53 = vadd.f32 %v2721_v52, %v2718_v15  ;;  %v2734_v35 = vsel %vm170_vm2, %v7297_v59, 0.0 }
0x14be   :  { %2735 = vadd.xlane.f32.xlu1 %v2734_v35  ;;  %v2704_v9 = vpop.f32.mrb[128].mxu1 }
0x14bf   :  { %v2714_v51 = vadd.f32 %v2704_v9, %v2489_v10  ;;  %v5427_v27 = vpop.f32.mrb[129].mxu1  ;;  %v2737_v20 = vsel %vm170_vm2, %v7300_v53, 0.0 }
0x14c0   :  { %v2707_v16 = vpop.f32.mrb[130].mxu1 }
0x14c1   :  { %v2719_v33 = vadd.f32 %v2714_v51, %v6831_v29  ;;  %v5428_v28 = vpop.f32.mrb[131].mxu1 }
0x14c2   :  { %2738 = vadd.xlane.f32.xlu1 %v2737_v20 }
0x14c3   :  { %v7307_v8 = vadd.f32 %v2721_v52, %v2719_v33 }
0x14c5   :  { %v2740_v61 = vsel %vm183_vm3, %v7307_v8, 0.0 }
0x14c6   :  { %2741 = vadd.xlane.f32.xlu1 %v2740_v61 }
0x1543   :  { %v2730_v5 = vpop.xlane.xlu0 %2729 }
0x1544   :  { %v2743_v26 = vmul.f32 0.0625, %v2730_v5 }
0x1545   :  { %v2733_v18 = vpop.xlane.xlu1 %2732 }
0x1546   :  { %v2748_v13 = vsub.f32 %v7288_v19, %v2743_v26  ;;  %v2744_v57 = vmul.f32 0.0625, %v2733_v18 }
0x1548   :  { %v2749_v34 = vsub.f32 %v7292_v1, %v2744_v57  ;;  %v2753_v29 = vmul.f32 %v2748_v13, %v2748_v13 }
0x154a   :  { %v2758_v55 = vsel %vm170_vm2, %v2753_v29, 0.0  ;;  %v2754_v39 = vmul.f32 %v2749_v34, %v2749_v34 }
0x154b   :  { %2759 = vadd.xlane.f32.xlu1 %v2758_v55  ;;  %v2736_v3 = vpop.xlane.xlu1 %2735 }
0x154c   :  { %v2745_v63 = vmul.f32 0.0625, %v2736_v3  ;;  %v2761_v37 = vsel %vm170_vm2, %v2754_v39, 0.0 }
0x154e   :  { %v2750_v22 = vsub.f32 %v7297_v59, %v2745_v63 }
0x154f   :  { %2762 = vadd.xlane.f32.xlu1 %v2761_v37  ;;  %v2739_v50 = vpop.xlane.xlu1 %2738  ;;  %v5688_v37 = vld [vmem:[%s8062_s3 + $0x40] sm:$0xff]  }
0x1550   :  { %v2746_v54 = vmul.f32 0.0625, %v2739_v50  ;;  %v2755_v41 = vmul.f32 %v2750_v22, %v2750_v22  ;;  %5444 = vmatpush3.bf16.msra.mxu1 %v5688_v37  ;;  %v5689_v50 = vld [vmem:[%s8062_s3 + $0x48] sm:$0xff]  }
0x1551   :  { %5445 = vmatprep.subr.bf16.mxu1 %v6048_v0 }
0x1552   :  { %v2751_v21 = vsub.f32 %v7300_v53, %v2746_v54  ;;  %v2764_v24 = vsel %vm170_vm2, %v2755_v41, 0.0  ;;  %v5690_v54 = vld [vmem:[%s8062_s3 + $0x50] sm:$0xff]   ;;  %v5691_v41 = vld [vmem:[%s8062_s3 + $0x58] sm:$0xff]  }
0x1553   :  { %2765 = vadd.xlane.f32.xlu0 %v2764_v24  ;;  %v2742_v31 = vpop.xlane.xlu1 %2741  ;;  %v7360_v24 = vld [vmem:[%s8061_s4] sm:$0xff] }
0x1554   :  { %v2747_v6 = vmul.f32 0.0625, %v2742_v31  ;;  %v2756_v44 = vmul.f32 %v2751_v21, %v2751_v21  ;;  %5446 = vmatpush3.bf16.msra.mxu1 %v5689_v50 }
0x1555   :  { %5447 = vmatprep.subr.bf16.mxu1 %v6048_v0 }
0x1556   :  { %v2752_v10 = vsub.f32 %v7307_v8, %v2747_v6  ;;  %v2767_v11 = vsel %vm170_vm2, %v2756_v44, 0.0 }
0x1557   :  { %2768 = vadd.xlane.f32.xlu1 %v2767_v11 }
0x1558   :  { %v2757_v58 = vmul.f32 %v2752_v10, %v2752_v10  ;;  %5448 = vmatpush3.bf16.msra.mxu1 %v5690_v54 }
0x1559   :  { %5449 = vmatprep.subr.bf16.mxu1 %v6048_v0 }
0x155a   :  { %v2770_v36 = vsel %vm183_vm3, %v2757_v58, 0.0 }
0x155b   :  { %2771 = vadd.xlane.f32.xlu0 %v2770_v36 }
0x155c   :  { %5450 = vmatpush3.bf16.msra.mxu1 %v5691_v41 }
0x155d   :  { %5477 = vmatprep.subr.bf16.mxu1 %v6048_v0 }
0x1568   :  { %2793 = vrot.lane.b32.xlu1 %v6847_v60, %s6054_s22 }
0x156c   :  { %3064 = vrot.lane.b32.xlu1 %v6847_v60, %s6055_s23 }
0x1571   :  { %2801 = vrot.lane.b32.xlu0 %v6847_v60, %s6056_s24 }
0x15d8   :  { %v2760_v14 = vpop.xlane.xlu1 %2759 }
0x15d9   :  { %v2773_v47 = vmul.f32 0.0625, %v2760_v14 }
0x15db   :  { %v2778_v46 = vadd.f32 1e-06, %v2773_v47 }
0x15dc   :  { %v2763_v52 = vpop.xlane.xlu1 %2762 }
0x15dd   :  { %5899 = vrsqrt.f32 %v2778_v46  ;;  %v2774_v62 = vmul.f32 0.0625, %v2763_v52 }
0x15df   :  { %v2779_v40 = vadd.f32 1e-06, %v2774_v62 }
0x15e0   :  { %v2766_v43 = vpop.xlane.xlu0 %2765 }
0x15e1   :  { %5901 = vrsqrt.f32 %v2779_v40  ;;  %v2775_v30 = vmul.f32 0.0625, %v2766_v43 }
0x15e3   :  { %v2780_v42 = vadd.f32 1e-06, %v2775_v30 }
0x15e4   :  { %v2769_v38 = vpop.xlane.xlu1 %2768 }
0x15e5   :  { %5903 = vrsqrt.f32 %v2780_v42  ;;  %v2776_v25 = vmul.f32 0.0625, %v2769_v38 }
0x15e7   :  { %v5900_v17 = vpop.eup %5899  ;;  %v2781_v49 = vadd.f32 1e-06, %v2776_v25 }
0x15e8   :  { %v2772_v48 = vpop.xlane.xlu0 %2771  ;;  %v2788_v12 = vmul.f32 %v5900_v17, %v2748_v13  ;;  %v2794_v7 = vpop.permute.xlu1 %2793 }
0x15e9   :  { %5905 = vrsqrt.f32 %v2781_v49  ;;  %v2777_v60 = vmul.f32 0.0625, %v2772_v48 }
0x15ea   :  { %v2796_v9 = vmul.f32 %v2794_v7, %v2788_v12 }
0x15eb   :  { %v5902_v32 = vpop.eup %5901  ;;  %v2782_v15 = vadd.f32 1e-06, %v2777_v60 }
0x15ec   :  { %v2789_v35 = vmul.f32 %v5902_v32, %v2749_v34  ;;  %v2802_v51 = vpop.permute.xlu0 %2801 }
0x15ed   :  { %5907 = vrsqrt.f32 %v2782_v15  ;;  %v2804_v33 = vadd.f32 %v2802_v51, %v2796_v9 }
0x15ee   :  { %v2797_v27 = vmul.f32 %v2794_v7, %v2789_v35 }
0x15ef   :  { %v5904_v16 = vpop.eup %5903 }
0x15f0   :  { %v2805_v28 = vadd.f32 %v2802_v51, %v2797_v27  ;;  %v2790_v20 = vmul.f32 %v5904_v16, %v2750_v22 }
0x15f2   :  { %v2809_v61 = vpack.c.bf16 %v2805_v28, %v2804_v33  ;;  %v2798_v18 = vmul.f32 %v2794_v7, %v2790_v20 }
0x15f3   :  { %v5906_v5 = vpop.eup %5905 }
0x15f4   :  { %5432 = vmatmul.mubr.msk.bf16.vlgmr.msra.gmra.mrb[120].mxu0 %vm170_vm2, %v2809_v61  ;;  %v2791_v26 = vmul.f32 %v5906_v5, %v2751_v21  ;;  %v2806_v34 = vadd.f32 %v2802_v51, %v2798_v18  ;;  %v2814_v21 = vsub.s32 5, %v6189_v2 }
0x15f5   :  { %5435 = vmatprep.mubr.msk.bf16.mxu0 %vm6049_vm0, %v6048_v0 }
0x15f6   :  { %v2799_v13 = vmul.f32 %v2794_v7, %v2791_v26  ;;  %v2815_v31 = vrot.slane %v7360_v24, %v2814_v21 }
0x15f7   :  { %v5908_v57 = vpop.eup %5907 }
0x15f8   :  { %v2807_v29 = vadd.f32 %v2802_v51, %v2799_v13  ;;  %v2792_v55 = vmul.f32 %v5908_v57, %v2752_v10 }
0x15fa   :  { %v2810_v39 = vpack.c.bf16 %v2807_v29, %v2806_v34  ;;  %v2800_v3 = vmul.f32 %v2794_v7, %v2792_v55 }
0x15fc   :  { %5436 = vmatmul.mubr.msk.bf16.gmra.mrb[124].mxu0 %vm170_vm2, %v2810_v39  ;;  %v2808_v63 = vadd.f32 %v2802_v51, %v2800_v3 }
0x15fd   :  { %5439 = vmatprep.mubr.msk.bf16.mxu0 %vm6049_vm0, %v6048_v0 }
0x15fe   :  { %v2811_v22 = vpack.c.bf16 %v2808_v63, %v2808_v63 }
0x1604   :  { %5440 = vmatmul.mubr.msk.bf16.gmra.mrb[128].mxu0 %vm170_vm2, %v2811_v22 }
0x1605   :  { %5465 = vmatprep.mubr.msk.bf16.mxu0 %vm6049_vm0, %v6048_v0 }
0x16c7   :  { %v2865_v6 = vpop.f32.mrb[120].mxu0 }
0x16c8   :  { %v7363_v44 = vadd.f32 %v2865_v6, %v2815_v31  ;;  %v5433_v10 = vpop.f32.mrb[121].mxu0 }
0x16c9   :  { %v2868_v11 = vpop.f32.mrb[122].mxu0 }
0x16ca   :  { %v2892_v58 = vmul.f32 0.70710677, %v7363_v44  ;;  %v7366_v36 = vadd.f32 %v2868_v11, %v2815_v31  ;;  %v5434_v45 = vpop.f32.mrb[123].mxu0 }
0x16cc   :  { %v7368_v14 = vclamps-f32 %v2892_v58, 4.0  ;;  %v2893_v47 = vmul.f32 0.70710677, %v7366_v36 }
0x16ce   :  { %v7373_v46 = vmul.f32 %v7368_v14, %v7368_v14  ;;  %v7375_v52 = vclamps-f32 %v2893_v47, 4.0 }
0x16cf   :  { %v2873_v62 = vpop.f32.mrb[124].mxu0 }
0x16d0   :  { %v2912_v40 = vmul.f32 -2.7261424e-10, %v7373_v46  ;;  %v2972_v43 = vmul.f32 -1.45660715e-05, %v7373_v46  ;;  %v7381_v30 = vmul.f32 %v7375_v52, %v7375_v52  ;;  %v7383_v42 = vadd.f32 %v2873_v62, %v2815_v31  ;;  %v5437_v38 = vpop.f32.mrb[125].mxu0 }
0x16d1   :  { %v2876_v25 = vpop.f32.mrb[126].mxu0 }
0x16d2   :  { %v2917_v17 = vadd.f32 2.7706815e-08, %v2912_v40  ;;  %v2977_v49 = vadd.f32 -0.00021337405, %v2972_v43  ;;  %v2913_v48 = vmul.f32 -2.7261424e-10, %v7381_v30  ;;  %v7386_v12 = vadd.f32 %v2876_v25, %v2815_v31 }
0x16d3   :  { %v2973_v60 = vmul.f32 -1.45660715e-05, %v7381_v30  ;;  %v2894_v7 = vmul.f32 0.70710677, %v7383_v42  ;;  %v5438_v32 = vpop.f32.mrb[127].mxu0 }
0x16d4   :  { %v2922_v15 = vmul.f32 %v2917_v17, %v7373_v46  ;;  %v2982_v35 = vmul.f32 %v2977_v49, %v7373_v46  ;;  %v2918_v9 = vadd.f32 2.7706815e-08, %v2913_v48  ;;  %v2895_v16 = vmul.f32 0.70710677, %v7386_v12 }
0x16d5   :  { %v2978_v51 = vadd.f32 -0.00021337405, %v2973_v60  ;;  %v7392_v27 = vclamps-f32 %v2894_v7, 4.0 }
0x16d6   :  { %v2927_v33 = vadd.f32 -2.101024e-06, %v2922_v15  ;;  %v2987_v28 = vadd.f32 -0.001682827, %v2982_v35  ;;  %v2923_v20 = vmul.f32 %v2918_v9, %v7381_v30  ;;  %v7401_v26 = vclamps-f32 %v2895_v16, 4.0 }
0x16d7   :  { %v2983_v61 = vmul.f32 %v2978_v51, %v7381_v30  ;;  %v7399_v5 = vmul.f32 %v7392_v27, %v7392_v27  ;;  %v2881_v18 = vpop.f32.mrb[128].mxu0 }
0x16d8   :  { %v2932_v13 = vmul.f32 %v2927_v33, %v7373_v46  ;;  %v2992_v57 = vmul.f32 %v2987_v28, %v7373_v46  ;;  %v2928_v34 = vadd.f32 -2.101024e-06, %v2923_v20  ;;  %v5441_v29 = vpop.f32.mrb[129].mxu0  ;;  %v7409_v63 = vmul.f32 %v7401_v26, %v7401_v26 }
0x16d9   :  { %v2988_v55 = vadd.f32 -0.001682827, %v2983_v61  ;;  %v2914_v39 = vmul.f32 -2.7261424e-10, %v7399_v5  ;;  %v2974_v3 = vmul.f32 -1.45660715e-05, %v7399_v5  ;;  %v7412_v54 = vadd.f32 %v2881_v18, %v2815_v31 }
0x16da   :  { %v2937_v22 = vadd.f32 -5.6925062e-05, %v2932_v13  ;;  %v2997_v37 = vadd.f32 -0.0073733293, %v2992_v57  ;;  %v2933_v50 = vmul.f32 %v2928_v34, %v7381_v30  ;;  %v2884_v41 = vpop.f32.mrb[130].mxu0 }
0x16db   :  { %v2993_v21 = vmul.f32 %v2988_v55, %v7381_v30  ;;  %v2919_v6 = vadd.f32 2.7706815e-08, %v2914_v39  ;;  %v2979_v10 = vadd.f32 -0.00021337405, %v2974_v3  ;;  %v2915_v11 = vmul.f32 -2.7261424e-10, %v7409_v63 }
0x16dc   :  { %v2942_v58 = vmul.f32 %v2937_v22, %v7373_v46  ;;  %v3002_v45 = vmul.f32 %v2997_v37, %v7373_v46  ;;  %v2938_v47 = vadd.f32 -5.6925062e-05, %v2933_v50  ;;  %v2975_v62 = vmul.f32 -1.45660715e-05, %v7409_v63  ;;  %v5442_v40 = vpop.f32.mrb[131].mxu0 }
0x16dd   :  { %v2998_v43 = vadd.f32 -0.0073733293, %v2993_v21  ;;  %v2924_v38 = vmul.f32 %v2919_v6, %v7399_v5  ;;  %v2984_v31 = vmul.f32 %v2979_v10, %v7399_v5  ;;  %v2920_v25 = vadd.f32 2.7706815e-08, %v2915_v11 }
0x16de   :  { %v2947_v17 = vadd.f32 -0.00073499064, %v2942_v58  ;;  %v3007_v49 = vadd.f32 -0.014264739, %v3002_v45  ;;  %v2943_v48 = vmul.f32 %v2938_v47, %v7381_v30  ;;  %v2980_v60 = vadd.f32 -0.00021337405, %v2975_v62 }
0x16df   :  { %v3003_v7 = vmul.f32 %v2998_v43, %v7381_v30  ;;  %v2929_v32 = vadd.f32 -2.101024e-06, %v2924_v38  ;;  %v2989_v15 = vadd.f32 -0.001682827, %v2984_v31  ;;  %v2925_v35 = vmul.f32 %v2920_v25, %v7409_v63 }
0x16e0   :  { %v2952_v9 = vmul.f32 %v2947_v17, %v7373_v46  ;;  %5909 = vrcp.f32 %v3007_v49  ;;  %v2948_v51 = vadd.f32 -0.00073499064, %v2943_v48  ;;  %v2985_v16 = vmul.f32 %v2980_v60, %v7409_v63 }
0x16e1   :  { %v3008_v33 = vadd.f32 -0.014264739, %v3003_v7  ;;  %v2934_v28 = vmul.f32 %v2929_v32, %v7399_v5  ;;  %v2994_v20 = vmul.f32 %v2989_v15, %v7399_v5  ;;  %v2930_v61 = vadd.f32 -2.101024e-06, %v2925_v35 }
0x16e2   :  { %v2957_v18 = vadd.f32 -0.0029546, %v2952_v9  ;;  %v2953_v13 = vmul.f32 %v2948_v51, %v7381_v30  ;;  %v2990_v57 = vadd.f32 -0.001682827, %v2985_v16  ;;  %v2896_v34 = vmul.f32 0.70710677, %v7412_v54 }
0x16e3   :  { %5911 = vrcp.f32 %v3008_v33  ;;  %v2939_v29 = vadd.f32 -5.6925062e-05, %v2934_v28  ;;  %v2999_v55 = vadd.f32 -0.0073733293, %v2994_v20  ;;  %v2935_v39 = vmul.f32 %v2930_v61, %v7409_v63 }
0x16e4   :  { %v2962_v3 = vmul.f32 %v2957_v18, %v7373_v46  ;;  %v2958_v22 = vadd.f32 -0.0029546, %v2953_v13  ;;  %v2995_v37 = vmul.f32 %v2990_v57, %v7409_v63  ;;  %v7433_v50 = vclamps-f32 %v2896_v34, 4.0 }
0x16e5   :  { %v2944_v41 = vmul.f32 %v2939_v29, %v7399_v5  ;;  %v3004_v21 = vmul.f32 %v2999_v55, %v7399_v5  ;;  %v2940_v6 = vadd.f32 -5.6925062e-05, %v2935_v39  ;;  %v2887_v34 = vmul.f32 0.5, %v7363_v44 }
0x16e6   :  { %v2967_v10 = vadd.f32 -0.016096033, %v2962_v3  ;;  %v2963_v11 = vmul.f32 %v2958_v22, %v7381_v30  ;;  %v3000_v58 = vadd.f32 -0.0073733293, %v2995_v37  ;;  %v7440_v45 = vmul.f32 %v7433_v50, %v7433_v50 }
0x16e7   :  { %v2949_v47 = vadd.f32 -0.00073499064, %v2944_v41  ;;  %v3009_v46 = vadd.f32 -0.014264739, %v3004_v21  ;;  %v2945_v62 = vmul.f32 %v2940_v6, %v7409_v63  ;;  %v2888_v29 = vmul.f32 0.5, %v7366_v36 }
0x16e8   :  { %v3012_v40 = vmul.f32 %v7368_v14, %v2967_v10  ;;  %v2968_v43 = vadd.f32 -0.016096033, %v2963_v11  ;;  %v3005_v38 = vmul.f32 %v3000_v58, %v7409_v63  ;;  %v2916_v31 = vmul.f32 -2.7261424e-10, %v7440_v45 }
0x16e9   :  { %v2954_v25 = vmul.f32 %v2949_v47, %v7399_v5  ;;  %5913 = vrcp.f32 %v3009_v46  ;;  %v2950_v30 = vadd.f32 -0.00073499064, %v2945_v62  ;;  %v2976_v17 = vmul.f32 -1.45660715e-05, %v7440_v45 }
0x16ea   :  { %v5910_v49 = vpop.eup %5909  ;;  %v3013_v48 = vmul.f32 %v7375_v52, %v2968_v43  ;;  %v3010_v60 = vadd.f32 -0.014264739, %v3005_v38  ;;  %v2921_v7 = vadd.f32 2.7706815e-08, %v2916_v31  ;;  %v2890_v38 = vmul.f32 0.5, %v7386_v12 }
0x16eb   :  { %v3018_v32 = vmul.f32 %v5910_v49, %v3012_v40  ;;  %v2959_v15 = vadd.f32 -0.0029546, %v2954_v25  ;;  %v2955_v14 = vmul.f32 %v2950_v30, %v7409_v63  ;;  %v2981_v35 = vadd.f32 -0.00021337405, %v2976_v17 }
0x16ec   :  { %5915 = vrcp.f32 %v3010_v60  ;;  %v2926_v9 = vmul.f32 %v2921_v7, %v7440_v45  ;;  %v2891_v12 = vmul.f32 0.5, %v7412_v54 }
0x16ed   :  { %v5912_v51 = vpop.eup %5911  ;;  %v2964_v16 = vmul.f32 %v2959_v15, %v7399_v5  ;;  %v2960_v33 = vadd.f32 -0.0029546, %v2955_v14  ;;  %v2986_v28 = vmul.f32 %v2981_v35, %v7440_v45  ;;  %v3027_v20 = vadd.f32 1.0, %v3018_v32 }
0x16ee   :  { %v3020_v61 = vmul.f32 %v5912_v51, %v3013_v48  ;;  %v2931_v18 = vadd.f32 -2.101024e-06, %v2926_v9 }
0x16ef   :  { %v2969_v52 = vadd.f32 -0.016096033, %v2964_v16  ;;  %v2965_v13 = vmul.f32 %v2960_v33, %v7409_v63  ;;  %v2991_v57 = vadd.f32 -0.001682827, %v2986_v28  ;;  %v3032_v37 = vmul.f32 %v3027_v20, %v2887_v34 }
0x16f0   :  { %v3028_v55 = vadd.f32 1.0, %v3020_v61  ;;  %v2936_v39 = vmul.f32 %v2931_v18, %v7440_v45 }
0x16f1   :  { %v3014_v3 = vmul.f32 %v7392_v27, %v2969_v52  ;;  %v2970_v5 = vadd.f32 -0.016096033, %v2965_v13  ;;  %v2996_v22 = vmul.f32 %v2991_v57, %v7440_v45 }
0x16f2   :  { %v3033_v41 = vmul.f32 %v3028_v55, %v2888_v29  ;;  %v2941_v21 = vadd.f32 -5.6925062e-05, %v2936_v39 }
0x16f3   :  { %v5914_v6 = vpop.eup %5913  ;;  %v3015_v10 = vmul.f32 %v7401_v26, %v2970_v5  ;;  %v3001_v63 = vadd.f32 -0.0073733293, %v2996_v22  ;;  %v2889_v26 = vmul.f32 0.5, %v7383_v42 }
0x16f4   :  { %v3037_v11 = vpack.c.bf16 %v3033_v41, %v3032_v37  ;;  %v3022_v58 = vmul.f32 %v5914_v6, %v3014_v3  ;;  %v2946_v44 = vmul.f32 %v2941_v21, %v7440_v45 }
0x16f5   :  { %v3006_v36 = vmul.f32 %v3001_v63, %v7440_v45 }
0x16f6   :  { %v5916_v47 = vpop.eup %5915  ;;  %v2951_v46 = vadd.f32 -0.00073499064, %v2946_v44  ;;  %5452 = vmatmul.mubr.msk.bf16.vlgmr.msra.gmra.mrb[132].mxu1 %vm1580_vm8, %v3037_v11  ;;  %v3029_v27 = vadd.f32 1.0, %v3022_v58 }
0x16f7   :  { %v3024_v62 = vmul.f32 %v5916_v47, %v3015_v10  ;;  %v3011_v40 = vadd.f32 -0.014264739, %v3006_v36  ;;  %5455 = vmatprep.mubr.msk.bf16.mxu1 %vm6049_vm0, %v6048_v0 }
0x16f8   :  { %v2956_v43 = vmul.f32 %v2951_v46, %v7440_v45  ;;  %v3034_v30 = vmul.f32 %v3029_v27, %v2889_v26 }
0x16f9   :  { %v3030_v31 = vadd.f32 1.0, %v3024_v62  ;;  %5917 = vrcp.f32 %v3011_v40 }
0x16fa   :  { %v2961_v25 = vadd.f32 -0.0029546, %v2956_v43 }
0x16fb   :  { %v3035_v17 = vmul.f32 %v3030_v31, %v2890_v38 }
0x16fc   :  { %v2966_v49 = vmul.f32 %v2961_v25, %v7440_v45  ;;  %v3065_v45 = vpop.permute.xlu1 %3064 }
0x16fd   :  { %v3038_v48 = vpack.c.bf16 %v3035_v17, %v3034_v30 }
0x16fe   :  { %v2971_v60 = vadd.f32 -0.016096033, %v2966_v49 }
0x16ff   :  { %5456 = vmatmul.mubr.msk.bf16.gmra.mrb[136].mxu1 %vm1580_vm8, %v3038_v48 }
0x1700   :  { %v3016_v7 = vmul.f32 %v7433_v50, %v2971_v60  ;;  %5459 = vmatprep.mubr.msk.bf16.mxu1 %vm6049_vm0, %v6048_v0 }
0x1703   :  { %v5918_v32 = vpop.eup %5917 }
0x1704   :  { %v3026_v42 = vmul.f32 %v5918_v32, %v3016_v7  ;;  %v5692_v32 = vld [vmem:[%s8062_s3 + $0x60] sm:$0xff]  }
0x1705   :  { %5464 = vmatpush3.bf16.msra.mxu0 %v5692_v32 }
0x1706   :  { %v3031_v15 = vadd.f32 1.0, %v3026_v42  ;;  %5495 = vmatprep.subr.bf16.mxu0 %v6048_v0 }
0x1708   :  { %v3036_v14 = vmul.f32 %v3031_v15, %v2891_v12  ;;  %v3217_v12 = vsub.s32 7, %v6189_v2 }
0x170a   :  { %v3039_v35 = vpack.c.bf16 %v3036_v14, %v3036_v14  ;;  %v7518_v15 = vrot.slane %v7360_v24, %v3217_v12 }
0x170c   :  { %5460 = vmatmul.mubr.msk.bf16.gmra.mrb[140].mxu1 %vm1580_vm8, %v3039_v35 }
0x170d   :  { %5483 = vmatprep.mubr.msk.bf16.mxu1 %vm6049_vm0, %v6048_v0 }
0x17c9   :  { %v3110_v9 = vpop.f32.mrb[132].mxu1 }
0x17ca   :  { %v3111_v51 = vadd.f32 %v3110_v9, %v3065_v45  ;;  %v5453_v16 = vpop.f32.mrb[133].mxu1 }
0x17cb   :  { %v3113_v50 = vpop.f32.mrb[134].mxu1 }
0x17cc   :  { %v7478_v33 = vadd.f32 %v3111_v51, %v7288_v19  ;;  %v3114_v28 = vadd.f32 %v3113_v50, %v3065_v45  ;;  %v5454_v20 = vpop.f32.mrb[135].mxu1 }
0x17ce   :  { %v7481_v54 = vadd.f32 %v3114_v28, %v7292_v1  ;;  %v3150_v61 = vsel %vm170_vm2, %v7478_v33, 0.0 }
0x17cf   :  { %3151 = vadd.xlane.f32.xlu1 %v3150_v61 }
0x17d0   :  { %v3153_v18 = vsel %vm170_vm2, %v7481_v54, 0.0 }
0x17d1   :  { %3154 = vadd.xlane.f32.xlu0 %v3153_v18 }
0x17d2   :  { %v3118_v52 = vpop.f32.mrb[136].mxu1 }
0x17d3   :  { %v3119_v13 = vadd.f32 %v3118_v52, %v3065_v45  ;;  %v5457_v57 = vpop.f32.mrb[137].mxu1 }
0x17d4   :  { %v3121_v34 = vpop.f32.mrb[138].mxu1 }
0x17d5   :  { %v7488_v19 = vadd.f32 %v3119_v13, %v7297_v59  ;;  %v3122_v29 = vadd.f32 %v3121_v34, %v3065_v45  ;;  %v5458_v55 = vpop.f32.mrb[139].mxu1 }
0x17d7   :  { %v7491_v1 = vadd.f32 %v3122_v29, %v7300_v53  ;;  %v3156_v39 = vsel %vm170_vm2, %v7488_v19, 0.0 }
0x17d8   :  { %3157 = vadd.xlane.f32.xlu0 %v3156_v39 }
0x17d9   :  { %v3159_v3 = vsel %vm170_vm2, %v7491_v1, 0.0 }
0x17da   :  { %3160 = vadd.xlane.f32.xlu1 %v3159_v3 }
0x17df   :  { %v3126_v5 = vpop.f32.mrb[140].mxu1 }
0x17e0   :  { %v3127_v22 = vadd.f32 %v3126_v5, %v3065_v45  ;;  %v5461_v37 = vpop.f32.mrb[141].mxu1 }
0x17e1   :  { %v3129_v41 = vpop.f32.mrb[142].mxu1 }
0x17e2   :  { %v7498_v59 = vadd.f32 %v3127_v22, %v7307_v8  ;;  %v5462_v21 = vpop.f32.mrb[143].mxu1 }
0x17e4   :  { %v3162_v53 = vsel %vm183_vm3, %v7498_v59, 0.0 }
0x17e5   :  { %3163 = vadd.xlane.f32.xlu0 %v3162_v53 }
0x185c   :  { %v3152_v6 = vpop.xlane.xlu1 %3151 }
0x185d   :  { %v3165_v10 = vmul.f32 0.0625, %v3152_v6 }
0x185e   :  { %v3155_v63 = vpop.xlane.xlu0 %3154 }
0x185f   :  { %v3170_v11 = vsub.f32 %v7478_v33, %v3165_v10  ;;  %v3166_v58 = vmul.f32 0.0625, %v3155_v63 }
0x1861   :  { %v3171_v44 = vsub.f32 %v7481_v54, %v3166_v58  ;;  %v3175_v36 = vmul.f32 %v3170_v11, %v3170_v11 }
0x1863   :  { %v3180_v47 = vsel %vm170_vm2, %v3175_v36, 0.0  ;;  %v3176_v46 = vmul.f32 %v3171_v44, %v3171_v44 }
0x1864   :  { %3181 = vadd.xlane.f32.xlu1 %v3180_v47 }
0x1865   :  { %v3158_v8 = vpop.xlane.xlu0 %3157  ;;  %v3183_v27 = vsel %vm170_vm2, %v3176_v46, 0.0 }
0x1866   :  { %v3167_v62 = vmul.f32 0.0625, %v3158_v8  ;;  %3184 = vadd.xlane.f32.xlu0 %v3183_v27 }
0x1867   :  { %v3161_v40 = vpop.xlane.xlu1 %3160 }
0x1868   :  { %v3172_v43 = vsub.f32 %v7488_v19, %v3167_v62  ;;  %v3168_v26 = vmul.f32 0.0625, %v3161_v40 }
0x186a   :  { %v3173_v38 = vsub.f32 %v7491_v1, %v3168_v26  ;;  %v3177_v31 = vmul.f32 %v3172_v43, %v3172_v43  ;;  %v3238_v26 = vsub.s32 6, %v6189_v2 }
0x186c   :  { %v3186_v25 = vsel %vm170_vm2, %v3177_v31, 0.0  ;;  %v3178_v30 = vmul.f32 %v3173_v38, %v3173_v38 }
0x186d   :  { %3187 = vadd.xlane.f32.xlu1 %v3186_v25 }
0x186e   :  { %v3189_v17 = vsel %vm170_vm2, %v3178_v30, 0.0 }
0x186f   :  { %3190 = vadd.xlane.f32.xlu0 %v3189_v17 }
0x1872   :  { %v3164_v49 = vpop.xlane.xlu0 %3163 }
0x1873   :  { %v3169_v48 = vmul.f32 0.0625, %v3164_v49 }
0x1875   :  { %v3174_v60 = vsub.f32 %v7498_v59, %v3169_v48 }
0x1877   :  { %v3179_v7 = vmul.f32 %v3174_v60, %v3174_v60 }
0x1879   :  { %v3192_v42 = vsel %vm183_vm3, %v3179_v7, 0.0 }
0x187a   :  { %3193 = vadd.xlane.f32.xlu1 %v3192_v42 }
0x1885   :  { %3225 = vrot.lane.b32.xlu0 %v7518_v15, %s6051_s17 }
0x18f1   :  { %v3182_v14 = vpop.xlane.xlu1 %3181 }
0x18f2   :  { %v3195_v35 = vmul.f32 0.0625, %v3182_v14 }
0x18f3   :  { %v3185_v45 = vpop.xlane.xlu0 %3184 }
0x18f4   :  { %v3200_v9 = vadd.f32 1e-06, %v3195_v35  ;;  %v3196_v51 = vmul.f32 0.0625, %v3185_v45 }
0x18f6   :  { %5919 = vrsqrt.f32 %v3200_v9  ;;  %v3201_v16 = vadd.f32 1e-06, %v3196_v51 }
0x18f8   :  { %5921 = vrsqrt.f32 %v3201_v16 }
0x18fa   :  { %v3188_v50 = vpop.xlane.xlu1 %3187 }
0x18fb   :  { %v3197_v28 = vmul.f32 0.0625, %v3188_v50 }
0x18fc   :  { %v3191_v20 = vpop.xlane.xlu0 %3190 }
0x18fd   :  { %v3202_v61 = vadd.f32 1e-06, %v3197_v28  ;;  %v3198_v18 = vmul.f32 0.0625, %v3191_v20 }
0x18ff   :  { %5923 = vrsqrt.f32 %v3202_v61  ;;  %v3203_v52 = vadd.f32 1e-06, %v3198_v18 }
0x1900   :  { %v5920_v13 = vpop.eup %5919  ;;  %v3226_v39 = vpop.permute.xlu0 %3225 }
0x1901   :  { %5925 = vrsqrt.f32 %v3203_v52  ;;  %v3210_v57 = vmul.f32 %v5920_v13, %v3170_v11 }
0x1902   :  { %v5922_v34 = vpop.eup %5921 }
0x1903   :  { %v3211_v29 = vmul.f32 %v5922_v34, %v3171_v44  ;;  %v3219_v55 = vmul.f32 %v7518_v15, %v3210_v57 }
0x1905   :  { %v3220_v3 = vmul.f32 %v7518_v15, %v3211_v29  ;;  %v3228_v22 = vadd.f32 %v3226_v39, %v3219_v55 }
0x1907   :  { %v3194_v5 = vpop.xlane.xlu1 %3193  ;;  %v3229_v37 = vadd.f32 %v3226_v39, %v3220_v3  ;;  %v7574_v3 = vld [vmem:[%s8060_s1] sm:$0xff] }
0x1908   :  { %v3199_v41 = vmul.f32 0.0625, %v3194_v5 }
0x1909   :  { %v5924_v21 = vpop.eup %5923  ;;  %v3233_v53 = vpack.c.bf16 %v3229_v37, %v3228_v22 }
0x190a   :  { %v3204_v6 = vadd.f32 1e-06, %v3199_v41  ;;  %v3212_v10 = vmul.f32 %v5924_v21, %v3172_v43  ;;  %v7580_v41 = vld [vmem:[%s8060_s1 + $0x8] sm:$0xff] }
0x190b   :  { %v5926_v63 = vpop.eup %5925  ;;  %5466 = vmatmul.mubr.msk.bf16.vlgmr.msra.gmra.mrb[132].mxu0 %vm170_vm2, %v3233_v53 }
0x190c   :  { %5927 = vrsqrt.f32 %v3204_v6  ;;  %v3213_v11 = vmul.f32 %v5926_v63, %v3173_v38  ;;  %v3221_v58 = vmul.f32 %v7518_v15, %v3212_v10  ;;  %5469 = vmatprep.mubr.msk.bf16.mxu0 %vm6049_vm0, %v6048_v0  ;;  %v3239_v38 = vrot.slane %v7360_v24, %v3238_v26 }
0x190e   :  { %v3222_v44 = vmul.f32 %v7518_v15, %v3213_v11  ;;  %v3230_v36 = vadd.f32 %v3226_v39, %v3221_v58  ;;  %v7588_v11 = vld [vmem:[%s8060_s1 + $0x10] sm:$0xff] }
0x1910   :  { %v3231_v47 = vadd.f32 %v3226_v39, %v3222_v44 }
0x1912   :  { %v3234_v46 = vpack.c.bf16 %v3231_v47, %v3230_v36  ;;  %v7594_v47 = vld [vmem:[%s8060_s1 + $0x18] sm:$0xff] }
0x1914   :  { %5470 = vmatmul.mubr.msk.bf16.gmra.mrb[136].mxu0 %vm170_vm2, %v3234_v46 }
0x1915   :  { %5473 = vmatprep.mubr.msk.bf16.mxu0 %vm6049_vm0, %v6048_v0 }
0x1916   :  { %v5928_v8 = vpop.eup %5927 }
0x1917   :  { %v3214_v27 = vmul.f32 %v5928_v8, %v3174_v60 }
0x1919   :  { %v3223_v62 = vmul.f32 %v7518_v15, %v3214_v27 }
0x191b   :  { %v3232_v40 = vadd.f32 %v3226_v39, %v3223_v62 }
0x191d   :  { %v3235_v43 = vpack.c.bf16 %v3232_v40, %v3232_v40 }
0x191f   :  { %5474 = vmatmul.mubr.msk.bf16.gmra.mrb[140].mxu0 %vm170_vm2, %v3235_v43 }
0x1920   :  { %5501 = vmatprep.mubr.msk.bf16.mxu0 %vm6049_vm0, %v6048_v0 }
0x19de   :  { %v3289_v31 = vpop.f32.mrb[132].mxu0 }
0x19df   :  { %v5467_v25 = vpop.f32.mrb[133].mxu0  ;;  %v3290_v17 = vadd.f32 %v3289_v31, %v3239_v38  ;;  %v7606_v31 = vld [vmem:[%s8060_s1 + $0x20] sm:$0x3] }
0x19e0   :  { %v3292_v30 = vpop.f32.mrb[134].mxu0 }
0x19e1   :  { %v3293_v49 = vadd.f32 %v3292_v30, %v3239_v38  ;;  %v5468_v48 = vpop.f32.mrb[135].mxu0 }
0x19e3   :  { %v7538_v60 = vpack.c.bf16 %v3293_v49, %v3290_v17 }
0x19e5   :  { %3461 = vrot.lane.b32.xlu1 %v7538_v60, %s6052_s20 }
0x19e7   :  { %v3297_v7 = vpop.f32.mrb[136].mxu0 }
0x19e8   :  { %v5471_v32 = vpop.f32.mrb[137].mxu0  ;;  %v3298_v12 = vadd.f32 %v3297_v7, %v3239_v38 }
0x19e9   :  { %v3300_v42 = vpop.f32.mrb[138].mxu0 }
0x19ea   :  { %v3301_v14 = vadd.f32 %v3300_v42, %v3239_v38  ;;  %v5472_v35 = vpop.f32.mrb[139].mxu0 }
0x19ec   :  { %v7542_v45 = vpack.c.bf16 %v3301_v14, %v3298_v12 }
0x19ee   :  { %3463 = vrot.lane.b32.xlu1 %v7542_v45, %s6052_s20 }
0x19f2   :  { %v3305_v24 = vpop.f32.mrb[140].mxu0  ;;  %3455 = vrot.lane.b32.xlu1 %v7538_v60, %s6053_s21 }
0x19f3   :  { %v3306_v9 = vadd.f32 %v3305_v24, %v3239_v38  ;;  %v5475_v51 = vpop.f32.mrb[141].mxu0 }
0x19f4   :  { %v3308_v16 = vpop.f32.mrb[142].mxu0 }
0x19f5   :  { %v7548_v50 = vpack.c.bf16 %v3306_v9, %v3306_v9  ;;  %v5476_v28 = vpop.f32.mrb[143].mxu0 }
0x19f7   :  { %3465 = vrot.lane.b32.xlu0 %v7548_v50, %s6052_s20  ;;  %3459 = vrot.lane.b32.xlu1 %v7548_v50, %s6053_s21 }
0x19fb   :  { %3457 = vrot.lane.b32.xlu0 %v7542_v45, %s6053_s21 }
0x1a57   :  { %v3462_v20 = vpop.permute.xlu1 %3461 }
0x1a58   :  { %v3477_v61 = vsel %vm346_vm4, %v3462_v20, 0 }
0x1a59   :  { %5496 = vmatpush3.bf16.xpose.msra.mxu0 %v3477_v61 }
0x1a5a   :  { %5497 = vmatprep.subr.bf16.mxu0 %v6048_v0 }
0x1a60   :  { %v3464_v18 = vpop.permute.xlu1 %3463 }
0x1a61   :  { %v3480_v52 = vsel %vm346_vm4, %v3464_v18, 0 }
0x1a62   :  { %5498 = vmatpush3.bf16.xpose.msra.mxu0 %v3480_v52 }
0x1a63   :  { %5499 = vmatprep.subr.bf16.mxu0 %v6048_v0 }
0x1a64   :  { %v3456_v34 = vpop.permute.xlu1 %3455 }
0x1a69   :  { %v3466_v13 = vpop.permute.xlu0 %3465  ;;  %v3460_v55 = vpop.permute.xlu1 %3459 }
0x1a6a   :  { %v3483_v57 = vsel %vm346_vm4, %v3466_v13, 0 }
0x1a6b   :  { %5500 = vmatpush3.bf16.xpose.msra.mxu0 %v3483_v57 }
0x1a6c   :  { %5531 = vmatprep.subr.bf16.mxu0 %v6048_v0 }
0x1a6d   :  { %v3458_v29 = vpop.permute.xlu0 %3457 }
0x1a72   :  { %5502 = vmatmul.mubr.msk.bf16.vlgmr.msra.gmra.mrb[144].mxu0 %vm346_vm4, %v3456_v34 }
0x1a73   :  { %5505 = vmatprep.mubr.msk.bf16.mxu0 %vm6049_vm0, %v6048_v0 }
0x1a7a   :  { %5506 = vmatmul.mubr.msk.bf16.gmra.mrb[148].mxu0 %vm346_vm4, %v3458_v29 }
0x1a7b   :  { %5509 = vmatprep.mubr.msk.bf16.mxu0 %vm6049_vm0, %v6048_v0 }
0x1a82   :  { %5510 = vmatmul.mubr.msk.bf16.gmra.mrb[152].mxu0 %vm346_vm4, %v3460_v55 }
0x1a83   :  { %5537 = vmatprep.mubr.msk.bf16.mxu0 %vm6049_vm0, %v6048_v0 }
0x1b45   :  { %v3519_v39 = vpop.f32.mrb[144].mxu0 }
0x1b46   :  { %v3520_v5 = vadd.f32 %v7574_v3, %v3519_v39  ;;  %v5503_v22 = vpop.f32.mrb[145].mxu0 }
0x1b47   :  { %v3522_v37 = vpop.f32.mrb[146].mxu0 }
0x1b48   :  { %v3523_v21 = vadd.f32 %v7580_v41, %v3522_v37  ;;  %v5504_v53 = vpop.f32.mrb[147].mxu0  ;;  %v3541_v6 = vsel %vm421_vm5, %v3520_v5, -inf }
0x1b49   :  { %3542 = vmax.xlane.f32.xlu0 %v3541_v6 }
0x1b4a   :  { %v3544_v10 = vsel %vm421_vm5, %v3523_v21, -inf }
0x1b4b   :  { %3545 = vmax.xlane.f32.xlu1 %v3544_v10 }
0x1b4d   :  { %v3527_v63 = vpop.f32.mrb[148].mxu0 }
0x1b4e   :  { %v3528_v58 = vadd.f32 %v7588_v11, %v3527_v63  ;;  %v5507_v44 = vpop.f32.mrb[149].mxu0 }
0x1b4f   :  { %v3530_v36 = vpop.f32.mrb[150].mxu0 }
0x1b50   :  { %v3531_v46 = vadd.f32 %v7594_v47, %v3530_v36  ;;  %v5508_v8 = vpop.f32.mrb[151].mxu0  ;;  %v3547_v27 = vsel %vm421_vm5, %v3528_v58, -inf }
0x1b51   :  { %3548 = vmax.xlane.f32.xlu0 %v3547_v27 }
0x1b52   :  { %v3550_v62 = vsel %vm421_vm5, %v3531_v46, -inf }
0x1b55   :  { %3551 = vmax.xlane.f32.xlu0 %v3550_v62  ;;  %v3535_v40 = vpop.f32.mrb[152].mxu0 }
0x1b56   :  { %v5511_v43 = vpop.f32.mrb[153].mxu0  ;;  %v3536_v25 = vadd.f32 %v7606_v31, %v3535_v40 }
0x1b57   :  { %v3538_v26 = vpop.f32.mrb[154].mxu0 }
0x1b58   :  { %v5512_v38 = vpop.f32.mrb[155].mxu0  ;;  %v3553_v30 = vsel %vm434_vm6, %v3536_v25, -inf }
0x1b5c   :  { %3319 = vrot.lane.b32.xlu1 %v7542_v45, %s6054_s22 }
0x1b6b   :  { %3317 = vrot.lane.b32.xlu0 %v7538_v60, %s6054_s22 }
0x1b80   :  { %3554 = vmax.xlane.f32.xlu1 %v3553_v30 }
0x1b91   :  { %3321 = vrot.lane.b32.xlu1 %v7548_v50, %s6054_s22 }
0x1b95   :  { %3599 = vrot.lane.b32.xlu1 %v7538_v60, %s6055_s23 }
0x1bd6   :  { %v3543_v17 = vpop.xlane.xlu0 %3542 }
0x1bd7   :  { %v3556_v49 = vsub.f32 %v3520_v5, %v3543_v17 }
0x1bd8   :  { %v3546_v48 = vpop.xlane.xlu1 %3545 }
0x1bd9   :  { %v3561_v7 = vmul.f32 1.442695, %v3556_v49  ;;  %v3557_v32 = vsub.f32 %v3523_v21, %v3546_v48 }
0x1bdb   :  { %5929 = vpow2.f32 %v3561_v7  ;;  %v3563_v42 = vmul.f32 1.442695, %v3557_v32 }
0x1bdc   :  { %v3320_v13 = vpop.permute.xlu1 %3319 }
0x1bdd   :  { %5931 = vpow2.f32 %v3563_v42  ;;  %v3336_v29 = vsel %vm346_vm4, %v3320_v13, 0 }
0x1bde   :  { %v3549_v12 = vpop.xlane.xlu0 %3548 }
0x1bdf   :  { %v3558_v14 = vsub.f32 %v3528_v58, %v3549_v12 }
0x1be1   :  { %v3565_v35 = vmul.f32 1.442695, %v3558_v14 }
0x1be2   :  { %v3552_v24 = vpop.xlane.xlu0 %3551 }
0x1be3   :  { %5933 = vpow2.f32 %v3565_v35  ;;  %v3559_v9 = vsub.f32 %v3531_v46, %v3552_v24 }
0x1be5   :  { %v7614_v51 = vpop.eup %5929  ;;  %v3567_v16 = vmul.f32 1.442695, %v3559_v9 }
0x1be6   :  { %v3318_v28 = vpop.permute.xlu0 %3317  ;;  %v3571_v20 = vsel %vm421_vm5, %v7614_v51, 0.0 }
0x1be7   :  { %v7618_v61 = vpop.eup %5931  ;;  %5935 = vpow2.f32 %v3567_v16  ;;  %v3333_v18 = vsel %vm346_vm4, %v3318_v28, 0  ;;  %3572 = vadd.xlane.f32.xlu0 %v3571_v20 }
0x1be8   :  { %5478 = vmatpush3.bf16.xpose.msra.mxu1 %v3333_v18  ;;  %v3574_v52 = vsel %vm421_vm5, %v7618_v61, 0.0 }
0x1be9   :  { %3575 = vadd.xlane.f32.xlu1 %v3574_v52  ;;  %5479 = vmatprep.subr.bf16.mxu1 %v6048_v0 }
0x1bed   :  { %v7624_v57 = vpop.eup %5933 }
0x1bee   :  { %v3577_v34 = vsel %vm421_vm5, %v7624_v57, 0.0 }
0x1bef   :  { %3578 = vadd.xlane.f32.xlu0 %v3577_v34 }
0x1bf0   :  { %5480 = vmatpush3.bf16.xpose.msra.mxu1 %v3336_v29 }
0x1bf1   :  { %v5936_v55 = vpop.eup %5935  ;;  %5481 = vmatprep.subr.bf16.mxu1 %v6048_v0 }
0x1bf2   :  { %v3580_v39 = vsel %vm421_vm5, %v5936_v55, 0.0 }
0x1bf3   :  { %3581 = vadd.xlane.f32.xlu0 %v3580_v39 }
0x1bfa   :  { %3603 = vrot.lane.b32.xlu1 %v7548_v50, %s6055_s23 }
0x1bfe   :  { %3757 = vrot.lane.b32.xlu1 %v7538_v60, %s6056_s24 }
0x1c02   :  { %3759 = vrot.lane.b32.xlu1 %v7542_v45, %s6056_s24 }
0x1c06   :  { %3751 = vrot.lane.b32.xlu1 %v7538_v60, %s6051_s17 }
0x1c09   :  { %3601 = vrot.lane.b32.xlu0 %v7542_v45, %s6055_s23 }
0x1c0a   :  { %3753 = vrot.lane.b32.xlu1 %v7542_v45, %s6051_s17 }
0x1c0d   :  { %v3555_v5 = vpop.xlane.xlu1 %3554 }
0x1c0e   :  { %3755 = vrot.lane.b32.xlu1 %v7548_v50, %s6051_s17  ;;  %v3560_v37 = vsub.f32 %v3536_v25, %v3555_v5 }
0x1c10   :  { %v3569_v53 = vmul.f32 1.442695, %v3560_v37 }
0x1c11   :  { %v3322_v22 = vpop.permute.xlu1 %3321 }
0x1c12   :  { %v3339_v21 = vsel %vm346_vm4, %v3322_v22, 0  ;;  %3976 = vrot.lane.b32.xlu1 %v7538_v60, %s6057_s25  ;;  %5937 = vpow2.f32 %v3569_v53 }
0x1c13   :  { %5482 = vmatpush3.bf16.xpose.msra.mxu1 %v3339_v21 }
0x1c14   :  { %5513 = vmatprep.subr.bf16.mxu1 %v6048_v0 }
0x1c15   :  { %v3600_v6 = vpop.permute.xlu1 %3599 }
0x1c1a   :  { %5484 = vmatmul.mubr.msk.bf16.vlgmr.msra.gmra.mrb[144].mxu1 %vm346_vm4, %v7538_v60 }
0x1c1b   :  { %5514 = vmatpush3.bf16.msra.mxu1 %v3600_v6  ;;  %5487 = vmatprep.mubr.msk.bf16.mxu1 %vm6049_vm0, %v6048_v0 }
0x1c1c   :  { %5515 = vmatprep.subr.bf16.mxu1 %v6048_v0  ;;  %v5938_v10 = vpop.eup %5937 }
0x1c1d   :  { %v3583_v63 = vsel %vm434_vm6, %v5938_v10, 0.0 }
0x1c22   :  { %5488 = vmatmul.mubr.msk.bf16.gmra.mrb[148].mxu1 %vm346_vm4, %v7542_v45 }
0x1c23   :  { %5491 = vmatprep.mubr.msk.bf16.mxu1 %vm6049_vm0, %v6048_v0 }
0x1c28   :  { %3584 = vadd.xlane.f32.xlu0 %v3583_v63 }
0x1c2a   :  { %5492 = vmatmul.mubr.msk.bf16.gmra.mrb[152].mxu1 %vm346_vm4, %v7548_v50 }
0x1c2b   :  { %5519 = vmatprep.mubr.msk.bf16.mxu1 %vm6049_vm0, %v6048_v0 }
0x1c3e   :  { %3761 = vrot.lane.b32.xlu0 %v7548_v50, %s6056_s24 }
0x1c42   :  { %3982 = vrot.lane.b32.xlu0 %v7538_v60, %s6058_s27 }
0x1c46   :  { %3984 = vrot.lane.b32.xlu0 %v7542_v45, %s6058_s27 }
0x1c4a   :  { %3986 = vrot.lane.b32.xlu0 %v7548_v50, %s6058_s27 }
0x1c74   :  { %v3573_v44 = vpop.xlane.xlu0 %3572 }
0x1c76   :  { %v3576_v58 = vpop.xlane.xlu1 %3575 }
0x1c77   :  { %5939 = vrcp.f32 %v3576_v58 }
0x1c78   :  { %5941 = vrcp.f32 %v3573_v44 }
0x1c7a   :  { %v3604_v40 = vpop.permute.xlu1 %3603 }
0x1c7b   :  { %v3617_v38 = vsel %vm642_vm7, %v3604_v40, 0 }
0x1c7c   :  { %v3579_v36 = vpop.xlane.xlu0 %3578 }
0x1c7e   :  { %v3758_v49 = vpop.permute.xlu1 %3757 }
0x1c7f   :  { %v3773_v32 = vsel %vm346_vm4, %v3758_v49, 0 }
0x1c80   :  { %v3582_v46 = vpop.xlane.xlu0 %3581 }
0x1c81   :  { %5943 = vrcp.f32 %v3582_v46  ;;  %v5940_v8 = vpop.eup %5939 }
0x1c82   :  { %5945 = vrcp.f32 %v3579_v36  ;;  %v5942_v62 = vpop.eup %5941  ;;  %v3592_v43 = vmul.f32 %v5940_v8, %v7618_v61  ;;  %v3760_v12 = vpop.permute.xlu1 %3759 }
0x1c83   :  { %v3591_v26 = vmul.f32 %v5942_v62, %v7614_v51  ;;  %v3776_v14 = vsel %vm346_vm4, %v3760_v12, 0 }
0x1c84   :  { %v3602_v27 = vpop.permute.xlu0 %3601 }
0x1c85   :  { %5516 = vmatpush3.bf16.msra.mxu1 %v3602_v27  ;;  %v3596_v25 = vpack.c.bf16 %v3592_v43, %v3591_v26 }
0x1c86   :  { %5517 = vmatprep.subr.bf16.mxu1 %v6048_v0  ;;  %v3752_v61 = vpop.permute.xlu1 %3751 }
0x1c89   :  { %5518 = vmatpush3.bf16.msra.mxu1 %v3617_v38 }
0x1c8a   :  { %5549 = vmatprep.subr.bf16.mxu1 %v6048_v0  ;;  %v3754_v13 = vpop.permute.xlu1 %3753 }
0x1c8b   :  { %v5944_v30 = vpop.eup %5943 }
0x1c8c   :  { %5520 = vmatmul.mubr.msk.bf16.vlgmr.msra.gmra.mrb[156].mxu1 %vm421_vm5, %v3596_v25  ;;  %v5946_v17 = vpop.eup %5945  ;;  %v3594_v48 = vmul.f32 %v5944_v30, %v5936_v55 }
0x1c8d   :  { %5523 = vmatprep.mubr.msk.bf16.mxu1 %vm6049_vm0, %v6048_v0  ;;  %v3593_v7 = vmul.f32 %v5946_v17, %v7624_v57 }
0x1c8e   :  { %v3756_v29 = vpop.permute.xlu1 %3755 }
0x1c8f   :  { %v3597_v42 = vpack.c.bf16 %v3594_v48, %v3593_v7 }
0x1c92   :  { %5550 = vmatpush3.bf16.xpose.msra.mxu1 %v3773_v32  ;;  %v3977_v39 = vpop.permute.xlu1 %3976 }
0x1c93   :  { %5551 = vmatprep.subr.bf16.mxu1 %v6048_v0 }
0x1c94   :  { %5524 = vmatmul.mubr.msk.bf16.gmra.mrb[160].mxu1 %vm421_vm5, %v3597_v42 }
0x1c95   :  { %5527 = vmatprep.mubr.msk.bf16.mxu1 %vm6049_vm0, %v6048_v0 }
0x1c9a   :  { %5552 = vmatpush3.bf16.xpose.msra.mxu1 %v3776_v14 }
0x1c9b   :  { %5553 = vmatprep.subr.bf16.mxu1 %v6048_v0 }
0x1cb5   :  { %v3585_v35 = vpop.xlane.xlu0 %3584 }
0x1cb6   :  { %5947 = vrcp.f32 %v3585_v35 }
0x1cb9   :  { %v3762_v24 = vpop.permute.xlu0 %3761 }
0x1cba   :  { %v3779_v9 = vsel %vm346_vm4, %v3762_v24, 0 }
0x1cbb   :  { %5554 = vmatpush3.bf16.xpose.msra.mxu1 %v3779_v9 }
0x1cbc   :  { %5585 = vmatprep.subr.bf16.mxu1 %v6048_v0 }
0x1cbd   :  { %v3983_v20 = vpop.permute.xlu0 %3982 }
0x1cbe   :  { %v3998_v18 = vsel %vm346_vm4, %v3983_v20, 0 }
0x1cc0   :  { %v5948_v51 = vpop.eup %5947 }
0x1cc1   :  { %v3595_v16 = vmul.f32 %v5948_v51, %v5938_v10  ;;  %v3985_v52 = vpop.permute.xlu0 %3984 }
0x1cc2   :  { %v4001_v57 = vsel %vm346_vm4, %v3985_v52, 0 }
0x1cc3   :  { %v3598_v28 = vpack.c.bf16 %v3595_v16, %v3595_v16 }
0x1cc5   :  { %5528 = vmatmul.mubr.msk.bf16.gmra.mrb[164].mxu1 %vm421_vm5, %v3598_v28  ;;  %v3987_v34 = vpop.permute.xlu0 %3986 }
0x1cc6   :  { %5555 = vmatprep.mubr.msk.bf16.mxu1 %vm6049_vm0, %v6048_v0  ;;  %v4004_v55 = vsel %vm346_vm4, %v3987_v34, 0 }
0x1ccd   :  { %5556 = vmatmul.mubr.msk.bf16.vlgmr.msra.gmra.mrb[168].mxu1 %vm346_vm4, %v3752_v61 }
0x1cce   :  { %5586 = vmatpush3.bf16.xpose.msra.mxu1 %v3998_v18  ;;  %5559 = vmatprep.mubr.msk.bf16.mxu1 %vm6049_vm0, %v6048_v0 }
0x1ccf   :  { %5587 = vmatprep.subr.bf16.mxu1 %v6048_v0 }
0x1cd5   :  { %5560 = vmatmul.mubr.msk.bf16.gmra.mrb[172].mxu1 %vm346_vm4, %v3754_v13 }
0x1cd6   :  { %5588 = vmatpush3.bf16.xpose.msra.mxu1 %v4001_v57  ;;  %5563 = vmatprep.mubr.msk.bf16.mxu1 %vm6049_vm0, %v6048_v0 }
0x1cd7   :  { %5589 = vmatprep.subr.bf16.mxu1 %v6048_v0 }
0x1cdd   :  { %5564 = vmatmul.mubr.msk.bf16.gmra.mrb[176].mxu1 %vm346_vm4, %v3756_v29 }
0x1cde   :  { %5590 = vmatpush3.bf16.xpose.msra.mxu1 %v4004_v55  ;;  %5591 = vmatprep.mubr.msk.bf16.mxu1 %vm6049_vm0, %v6048_v0 }
0x1cdf   :  { %5621 = vmatprep.subr.bf16.mxu1 %v6048_v0 }
0x1ce5   :  { %5592 = vmatmul.mubr.msk.bf16.vlgmr.msra.gmra.mrb[180].mxu1 %vm346_vm4, %v3977_v39 }
0x1ce6   :  { %5595 = vmatprep.mubr.msk.bf16.mxu1 %vm6049_vm0, %v6048_v0 }
0x1ced   :  { %v3375_v5 = vpop.f32.mrb[144].mxu1 }
0x1cee   :  { %v3376_v22 = vadd.f32 %v7574_v3, %v3375_v5  ;;  %v5485_v37 = vpop.f32.mrb[145].mxu1 }
0x1cef   :  { %v3378_v21 = vpop.f32.mrb[146].mxu1 }
0x1cf0   :  { %v3379_v53 = vadd.f32 %v7580_v41, %v3378_v21  ;;  %v5486_v6 = vpop.f32.mrb[147].mxu1  ;;  %v3397_v10 = vsel %vm421_vm5, %v3376_v22, -inf }
0x1cf1   :  { %3398 = vmax.xlane.f32.xlu0 %v3397_v10 }
0x1cf2   :  { %v3400_v63 = vsel %vm421_vm5, %v3379_v53, -inf }
0x1cf3   :  { %3401 = vmax.xlane.f32.xlu1 %v3400_v63 }
0x1cf5   :  { %v3383_v58 = vpop.f32.mrb[148].mxu1 }
0x1cf6   :  { %v3384_v44 = vadd.f32 %v7588_v11, %v3383_v58  ;;  %v5489_v36 = vpop.f32.mrb[149].mxu1 }
0x1cf7   :  { %v3386_v46 = vpop.f32.mrb[150].mxu1 }
0x1cf8   :  { %v3387_v8 = vadd.f32 %v7594_v47, %v3386_v46  ;;  %v5490_v27 = vpop.f32.mrb[151].mxu1  ;;  %v3403_v62 = vsel %vm421_vm5, %v3384_v44, -inf }
0x1cf9   :  { %3404 = vmax.xlane.f32.xlu0 %v3403_v62 }
0x1cfa   :  { %v3406_v40 = vsel %vm421_vm5, %v3387_v8, -inf }
0x1cfd   :  { %3407 = vmax.xlane.f32.xlu0 %v3406_v40  ;;  %v3391_v43 = vpop.f32.mrb[152].mxu1 }
0x1cfe   :  { %v3392_v26 = vadd.f32 %v7606_v31, %v3391_v43  ;;  %v5493_v38 = vpop.f32.mrb[153].mxu1 }
0x1cff   :  { %v3394_v25 = vpop.f32.mrb[154].mxu1 }
0x1d00   :  { %v5494_v30 = vpop.f32.mrb[155].mxu1  ;;  %v3409_v17 = vsel %vm434_vm6, %v3392_v26, -inf }
0x1d01   :  { %3410 = vmax.xlane.f32.xlu1 %v3409_v17 }
0x1d5f   :  { %v7720_v49 = vpop.f32.mrb[156].mxu1 }
0x1d60   :  { %v5521_v48 = vpop.f32.mrb[157].mxu1 }
0x1d61   :  { %v7722_v7 = vpop.f32.mrb[158].mxu1 }
0x1d62   :  { %v5522_v32 = vpop.f32.mrb[159].mxu1 }
0x1d67   :  { %v7724_v42 = vpop.f32.mrb[160].mxu1 }
0x1d68   :  { %v5525_v12 = vpop.f32.mrb[161].mxu1 }
0x1d69   :  { %v7726_v14 = vpop.f32.mrb[162].mxu1 }
0x1d6a   :  { %v5526_v35 = vpop.f32.mrb[163].mxu1 }
0x1d7e   :  { %v3399_v24 = vpop.xlane.xlu0 %3398 }
0x1d7f   :  { %v3412_v13 = vsub.f32 %v3376_v22, %v3399_v24 }
0x1d80   :  { %v3402_v51 = vpop.xlane.xlu1 %3401 }
0x1d81   :  { %v3413_v20 = vsub.f32 %v3379_v53, %v3402_v51  ;;  %v3417_v29 = vmul.f32 1.442695, %v3412_v13 }
0x1d83   :  { %v3419_v57 = vmul.f32 1.442695, %v3413_v20 }
0x1d85   :  { %5949 = vpow2.f32 %v3419_v57 }
0x1d86   :  { %v3405_v9 = vpop.xlane.xlu0 %3404  ;;  %5951 = vpow2.f32 %v3417_v29 }
0x1d87   :  { %v3414_v55 = vsub.f32 %v3384_v44, %v3405_v9 }
0x1d89   :  { %v3421_v58 = vmul.f32 1.442695, %v3414_v55 }
0x1d8a   :  { %v3408_v18 = vpop.xlane.xlu0 %3407 }
0x1d8b   :  { %v3415_v34 = vsub.f32 %v3387_v8, %v3408_v18 }
0x1d8d   :  { %v3423_v6 = vmul.f32 1.442695, %v3415_v34 }
0x1d8e   :  { %v3411_v5 = vpop.xlane.xlu1 %3410 }
0x1d8f   :  { %v3416_v36 = vsub.f32 %v3392_v26, %v3411_v5  ;;  %5953 = vpow2.f32 %v3423_v6  ;;  %v7743_v30 = vpop.eup %5949 }
0x1d90   :  { %5955 = vpow2.f32 %v3421_v58  ;;  %v7746_v17 = vpop.eup %5951  ;;  %v3430_v48 = vsel %vm421_vm5, %v7743_v30, 0.0 }
0x1d91   :  { %v3425_v46 = vmul.f32 1.442695, %v3416_v36  ;;  %v3427_v24 = vsel %vm421_vm5, %v7746_v17, 0.0 }
0x1d93   :  { %5957 = vpow2.f32 %v3425_v46 }
0x1d98   :  { %v7728_v16 = vpop.f32.mrb[164].mxu1 }
0x1d99   :  { %v5529_v28 = vpop.f32.mrb[165].mxu1  ;;  %v7750_v32 = vpop.eup %5953 }
0x1d9a   :  { %v3672_v61 = vpop.f32.mrb[166].mxu1  ;;  %v7754_v9 = vpop.eup %5955  ;;  %v3436_v20 = vsel %vm421_vm5, %v7750_v32, 0.0 }
0x1d9b   :  { %v5530_v52 = vpop.f32.mrb[167].mxu1  ;;  %v3433_v61 = vsel %vm421_vm5, %v7754_v9, 0.0 }
0x1d9d   :  { %v7760_v18 = vpop.eup %5957 }
0x1d9e   :  { %v3439_v34 = vsel %vm434_vm6, %v7760_v18, 0.0 }
0x1da0   :  { %v3815_v39 = vpop.f32.mrb[168].mxu1 }
0x1da1   :  { %v7731_v37 = vadd.f32 %v7574_v3, %v3815_v39  ;;  %v5557_v21 = vpop.f32.mrb[169].mxu1 }
0x1da2   :  { %v3818_v10 = vpop.f32.mrb[170].mxu1 }
0x1da3   :  { %v7734_v63 = vadd.f32 %v7580_v41, %v3818_v10  ;;  %v5558_v53 = vpop.f32.mrb[171].mxu1  ;;  %v3837_v22 = vsel %vm421_vm5, %v7731_v37, -inf }
0x1da4   :  { %3838 = vmax.xlane.f32.xlu0 %v3837_v22 }
0x1da5   :  { %v3840_v44 = vsel %vm421_vm5, %v7734_v63, -inf }
0x1da6   :  { %3841 = vmax.xlane.f32.xlu1 %v3840_v44 }
0x1da8   :  { %v3823_v8 = vpop.f32.mrb[172].mxu1 }
0x1da9   :  { %v3824_v27 = vadd.f32 %v7588_v11, %v3823_v8  ;;  %v5561_v62 = vpop.f32.mrb[173].mxu1 }
0x1daa   :  { %v3826_v40 = vpop.f32.mrb[174].mxu1 }
0x1dab   :  { %v3827_v43 = vadd.f32 %v7594_v47, %v3826_v40  ;;  %v5562_v38 = vpop.f32.mrb[175].mxu1  ;;  %v3843_v25 = vsel %vm421_vm5, %v3824_v27, -inf }
0x1dac   :  { %3844 = vmax.xlane.f32.xlu0 %v3843_v25 }
0x1dad   :  { %v3846_v26 = vsel %vm421_vm5, %v3827_v43, -inf }
0x1dae   :  { %3847 = vmax.xlane.f32.xlu1 %v3846_v26 }
0x1db0   :  { %v3831_v12 = vpop.f32.mrb[176].mxu1  ;;  %3431 = vadd.xlane.f32.xlu0 %v3430_v48 }
0x1db1   :  { %v5565_v35 = vpop.f32.mrb[177].mxu1 }
0x1db2   :  { %3428 = vadd.xlane.f32.xlu1 %v3427_v24  ;;  %v3834_v51 = vpop.f32.mrb[178].mxu1 }
0x1db3   :  { %v5566_v28 = vpop.f32.mrb[179].mxu1 }
0x1db4   :  { %3437 = vadd.xlane.f32.xlu0 %v3436_v20 }
0x1db6   :  { %3434 = vadd.xlane.f32.xlu1 %v3433_v61 }
0x1db8   :  { %v4040_v52 = vpop.f32.mrb[180].mxu1 }
0x1db9   :  { %v7763_v13 = vadd.f32 %v7574_v3, %v4040_v52  ;;  %v5593_v57 = vpop.f32.mrb[181].mxu1  ;;  %v3832_v3 = vadd.f32 %v7606_v31, %v3831_v12 }
0x1dba   :  { %v4043_v29 = vpop.f32.mrb[182].mxu1  ;;  %3440 = vadd.xlane.f32.xlu1 %v3439_v34 }
0x1dbb   :  { %v5594_v55 = vpop.f32.mrb[183].mxu1  ;;  %v4062_v39 = vsel %vm421_vm5, %v7763_v13, -inf  ;;  %v3849_v5 = vsel %vm434_vm6, %v3832_v3, -inf  ;;  %v7784_v21 = vadd.f32 %v7580_v41, %v4043_v29 }
0x1dbd   :  { %v4065_v6 = vsel %vm421_vm5, %v7784_v21, -inf }
0x1dbe   :  { %4063 = vmax.xlane.f32.xlu1 %v4062_v39 }
0x1dca   :  { %3675 = vrot.lane.b32.xlu0 %v7538_v60, %s6050_s26 }
0x1dcf   :  { %3677 = vrot.lane.b32.xlu1 %v7542_v45, %s6050_s26 }
0x1dd3   :  { %3895 = vrot.lane.b32.xlu1 %v7538_v60, %s6059_s13 }
0x1dd7   :  { %4120 = vrot.lane.b32.xlu1 %v7538_v60, %s6060_s14 }
0x1de9   :  { %3850 = vmax.xlane.f32.xlu0 %v3849_v5 }
0x1dff   :  { %3679 = vrot.lane.b32.xlu0 %v7548_v50, %s6050_s26 }
0x1e03   :  { %3897 = vrot.lane.b32.xlu0 %v7542_v45, %s6059_s13 }
0x1e22   :  { %4066 = vmax.xlane.f32.xlu0 %v4065_v6 }
0x1e31   :  { %v3839_v10 = vpop.xlane.xlu0 %3838 }
0x1e32   :  { %v3852_v60 = vsub.f32 %v7731_v37, %v3839_v10 }
0x1e33   :  { %v3842_v22 = vpop.xlane.xlu1 %3841 }
0x1e34   :  { %v3857_v53 = vmul.f32 1.442695, %v3852_v60  ;;  %v3853_v37 = vsub.f32 %v7734_v63, %v3842_v22 }
0x1e36   :  { %5959 = vpow2.f32 %v3857_v53  ;;  %v3859_v12 = vmul.f32 1.442695, %v3853_v37 }
0x1e38   :  { %3899 = vrot.lane.b32.xlu0 %v7548_v50, %s6059_s13 }
0x1e39   :  { %v3845_v58 = vpop.xlane.xlu0 %3844 }
0x1e3a   :  { %v3854_v36 = vsub.f32 %v3824_v27, %v3845_v58 }
0x1e3b   :  { %v3848_v44 = vpop.xlane.xlu1 %3847 }
0x1e3c   :  { %v3861_v46 = vmul.f32 1.442695, %v3854_v36  ;;  %v3855_v8 = vsub.f32 %v3827_v43, %v3848_v44 }
0x1e3d   :  { %v3432_v41 = vpop.xlane.xlu0 %3431 }
0x1e3e   :  { %5961 = vpow2.f32 %v3861_v46  ;;  %v3863_v62 = vmul.f32 1.442695, %v3855_v8 }
0x1e3f   :  { %v3429_v40 = vpop.xlane.xlu1 %3428 }
0x1e40   :  { %v7791_v38 = vpop.eup %5959  ;;  %5963 = vpow2.f32 %v3863_v62 }
0x1e41   :  { %v3438_v25 = vpop.xlane.xlu0 %3437  ;;  %v3867_v26 = vsel %vm421_vm5, %v7791_v38, 0.0  ;;  %5965 = vpow2.f32 %v3859_v12 }
0x1e42   :  { %3868 = vadd.xlane.f32.xlu1 %v3867_v26  ;;  %5967 = vrcp.f32 %v3429_v40 }
0x1e43   :  { %v3435_v48 = vpop.xlane.xlu1 %3434  ;;  %5969 = vrcp.f32 %v3432_v41 }
0x1e44   :  { %5971 = vrcp.f32 %v3435_v48 }
0x1e45   :  { %v3676_v27 = vpop.permute.xlu0 %3675  ;;  %5973 = vrcp.f32 %v3438_v25 }
0x1e46   :  { %5532 = vmatpush3.bf16.msra.mxu0 %v3676_v27 }
0x1e47   :  { %v3441_v35 = vpop.xlane.xlu1 %3440  ;;  %5533 = vmatprep.subr.bf16.mxu0 %v6048_v0 }
0x1e48   :  { %v7797_v43 = vpop.eup %5961 }
0x1e49   :  { %v3873_v24 = vsel %vm421_vm5, %v7797_v43, 0.0 }
0x1e4a   :  { %v7801_v51 = vpop.eup %5963  ;;  %3874 = vadd.xlane.f32.xlu1 %v3873_v24 }
0x1e4b   :  { %v4064_v63 = vpop.xlane.xlu1 %4063  ;;  %v3876_v28 = vsel %vm421_vm5, %v7801_v51, 0.0  ;;  %v7806_v61 = vpop.eup %5965 }
0x1e4c   :  { %v3870_v52 = vsel %vm421_vm5, %v7806_v61, 0.0  ;;  %v5968_v57 = vpop.eup %5967  ;;  %v4077_v34 = vsub.f32 %v7763_v13, %v4064_v63 }
0x1e4d   :  { %v5970_v39 = vpop.eup %5969  ;;  %v3447_v5 = vmul.f32 %v5968_v57, %v7746_v17 }
0x1e4e   :  { %3877 = vadd.xlane.f32.xlu1 %v3876_v28  ;;  %v4082_v10 = vmul.f32 1.442695, %v4077_v34  ;;  %v3448_v53 = vmul.f32 %v5970_v39, %v7743_v30  ;;  %v5972_v36 = vpop.eup %5971 }
0x1e4f   :  { %v3678_v20 = vpop.permute.xlu1 %3677  ;;  %v3449_v30 = vmul.f32 %v5972_v36, %v7754_v9 }
0x1e50   :  { %5534 = vmatpush3.bf16.msra.mxu0 %v3678_v20  ;;  %v3452_v58 = vpack.c.bf16 %v3448_v53, %v3447_v5 }
0x1e51   :  { %5535 = vmatprep.subr.bf16.mxu0 %v6048_v0 }
0x1e53   :  { %v3896_v13 = vpop.permute.xlu1 %3895 }
0x1e57   :  { %3871 = vadd.xlane.f32.xlu0 %v3870_v52 }
0x1e6d   :  { %3978 = vrot.lane.b32.xlu0 %v7542_v45, %s6057_s25 }
0x1e76   :  { %v3851_v29 = vpop.xlane.xlu0 %3850 }
0x1e77   :  { %v3856_v55 = vsub.f32 %v3832_v3, %v3851_v29  ;;  %v5974_v3 = vpop.eup %5973 }
0x1e78   :  { %v3450_v44 = vmul.f32 %v5974_v3, %v7750_v32 }
0x1e79   :  { %v3865_v6 = vmul.f32 1.442695, %v3856_v55 }
0x1e7a   :  { %v3680_v60 = vpop.permute.xlu0 %3679  ;;  %v3453_v8 = vpack.c.bf16 %v3450_v44, %v3449_v30 }
0x1e7b   :  { %5975 = vpow2.f32 %v3865_v6  ;;  %v3693_v22 = vsel %vm642_vm7, %v3680_v60, 0 }
0x1e7c   :  { %5977 = vrcp.f32 %v3441_v35  ;;  %5536 = vmatpush3.bf16.msra.mxu0 %v3693_v22 }
0x1e7d   :  { %5567 = vmatprep.subr.bf16.mxu0 %v6048_v0  ;;  %5979 = vpow2.f32 %v4082_v10 }
0x1e7e   :  { %v3898_v17 = vpop.permute.xlu0 %3897 }
0x1e7f   :  { %5538 = vmatmul.mubr.msk.bf16.vlgmr.msra.gmra.mrb[156].mxu0 %vm421_vm5, %v3452_v58 }
0x1e80   :  { %5568 = vmatpush3.bf16.msra.mxu0 %v3896_v13  ;;  %5541 = vmatprep.mubr.msk.bf16.mxu0 %vm6049_vm0, %v6048_v0 }
0x1e81   :  { %5569 = vmatprep.subr.bf16.mxu0 %v6048_v0 }
0x1e84   :  { %5570 = vmatpush3.bf16.msra.mxu0 %v3898_v17 }
0x1e85   :  { %v7823_v46 = vpop.eup %5975  ;;  %5571 = vmatprep.subr.bf16.mxu0 %v6048_v0 }
0x1e86   :  { %v5978_v41 = vpop.eup %5977  ;;  %v3879_v62 = vsel %vm434_vm6, %v7823_v46, 0.0 }
0x1e87   :  { %3880 = vadd.xlane.f32.xlu1 %v3879_v62  ;;  %5542 = vmatmul.mubr.msk.bf16.gmra.mrb[160].mxu0 %vm421_vm5, %v3453_v8  ;;  %v7829_v40 = vpop.eup %5979  ;;  %v3451_v32 = vmul.f32 %v5978_v41, %v7760_v18 }
0x1e88   :  { %5545 = vmatprep.mubr.msk.bf16.mxu0 %vm6049_vm0, %v6048_v0  ;;  %v4092_v9 = vsel %vm421_vm5, %v7829_v40, 0.0 }
0x1e89   :  { %v3454_v37 = vpack.c.bf16 %v3451_v32, %v3451_v32 }
0x1e8c   :  { %4093 = vadd.xlane.f32.xlu0 %v4092_v9 }
0x1e8f   :  { %5546 = vmatmul.mubr.msk.bf16.gmra.mrb[164].mxu0 %vm421_vm5, %v3454_v37 }
0x1e90   :  { %5573 = vmatprep.mubr.msk.bf16.mxu0 %vm6049_vm0, %v6048_v0 }
0x1ea2   :  { %4122 = vrot.lane.b32.xlu0 %v7542_v45, %s6060_s14  ;;  %v4121_v45 = vpop.permute.xlu1 %4120 }
0x1ea6   :  { %3980 = vrot.lane.b32.xlu0 %v7548_v50, %s6057_s25 }
0x1eaf   :  { %v4067_v25 = vpop.xlane.xlu0 %4066 }
0x1eb0   :  { %v4078_v26 = vsub.f32 %v7784_v21, %v4067_v25 }
0x1eb2   :  { %v4084_v18 = vmul.f32 1.442695, %v4078_v26 }
0x1eb3   :  { %v3900_v48 = vpop.permute.xlu0 %3899 }
0x1eb4   :  { %5981 = vpow2.f32 %v4084_v18  ;;  %v3913_v12 = vsel %vm642_vm7, %v3900_v48, 0 }
0x1eb5   :  { %5572 = vmatpush3.bf16.msra.mxu0 %v3913_v12 }
0x1eb6   :  { %5603 = vmatprep.subr.bf16.mxu0 %v6048_v0 }
0x1ebe   :  { %v7846_v27 = vpop.eup %5981 }
0x1ebf   :  { %v4095_v35 = vsel %vm421_vm5, %v7846_v27, 0.0 }
0x1ec0   :  { %4096 = vadd.xlane.f32.xlu1 %v4095_v35 }
0x1ecf   :  { %v3869_v21 = vpop.xlane.xlu1 %3868 }
0x1ed0   :  { %5983 = vrcp.f32 %v3869_v21 }
0x1ed1   :  { %4124 = vrot.lane.b32.xlu1 %v7548_v50, %s6060_s14 }
0x1ed5   :  { %4206 = vrot.lane.b32.xlu1 %v7518_v15, %s6050_s26 }
0x1ed7   :  { %v3875_v24 = vpop.xlane.xlu1 %3874 }
0x1eda   :  { %v5984_v52 = vpop.eup %5983 }
0x1edb   :  { %v3878_v28 = vpop.xlane.xlu1 %3877  ;;  %v3887_v57 = vmul.f32 %v5984_v52, %v7791_v38 }
0x1ee4   :  { %v3872_v63 = vpop.xlane.xlu0 %3871 }
0x1ee5   :  { %5985 = vrcp.f32 %v3872_v63 }
0x1ee6   :  { %5987 = vrcp.f32 %v3878_v28 }
0x1ee7   :  { %5989 = vrcp.f32 %v3875_v24 }
0x1ee8   :  { %v3979_v20 = vpop.permute.xlu0 %3978 }
0x1ee9   :  { %5596 = vmatmul.mubr.msk.bf16.gmra.mrb[184].mxu1 %vm346_vm4, %v3979_v20 }
0x1eea   :  { %5599 = vmatprep.mubr.msk.bf16.mxu1 %vm6049_vm0, %v6048_v0 }
0x1eef   :  { %v5986_v50 = vpop.eup %5985 }
0x1ef0   :  { %v3888_v34 = vmul.f32 %v5986_v50, %v7806_v61  ;;  %v5988_v55 = vpop.eup %5987 }
0x1ef1   :  { %v5990_v39 = vpop.eup %5989  ;;  %v3890_v5 = vmul.f32 %v5988_v55, %v7801_v51 }
0x1ef2   :  { %v3892_v29 = vpack.c.bf16 %v3888_v34, %v3887_v57  ;;  %v3889_v6 = vmul.f32 %v5990_v39, %v7797_v43 }
0x1ef4   :  { %5574 = vmatmul.mubr.msk.bf16.vlgmr.msra.gmra.mrb[168].mxu0 %vm421_vm5, %v3892_v29  ;;  %v3893_v10 = vpack.c.bf16 %v3890_v5, %v3889_v6 }
0x1ef5   :  { %5604 = vmatpush3.bf16.msra.mxu0 %v4121_v45  ;;  %5577 = vmatprep.mubr.msk.bf16.mxu0 %vm6049_vm0, %v6048_v0 }
0x1ef6   :  { %5605 = vmatprep.subr.bf16.mxu0 %v6048_v0 }
0x1efc   :  { %5578 = vmatmul.mubr.msk.bf16.gmra.mrb[172].mxu0 %vm421_vm5, %v3893_v10 }
0x1efd   :  { %5581 = vmatprep.mubr.msk.bf16.mxu0 %vm6049_vm0, %v6048_v0 }
0x1f14   :  { %v3881_v38 = vpop.xlane.xlu1 %3880 }
0x1f15   :  { %5991 = vrcp.f32 %v3881_v38 }
0x1f19   :  { %v4094_v61 = vpop.xlane.xlu0 %4093 }
0x1f1a   :  { %5993 = vrcp.f32 %v4094_v61 }
0x1f1d   :  { %v4123_v60 = vpop.permute.xlu0 %4122 }
0x1f1e   :  { %5606 = vmatpush3.bf16.msra.mxu0 %v4123_v60 }
0x1f1f   :  { %v5992_v53 = vpop.eup %5991  ;;  %5607 = vmatprep.subr.bf16.mxu0 %v6048_v0 }
0x1f20   :  { %v3891_v51 = vmul.f32 %v5992_v53, %v7823_v46 }
0x1f21   :  { %v3981_v22 = vpop.permute.xlu0 %3980 }
0x1f22   :  { %5600 = vmatmul.mubr.msk.bf16.gmra.mrb[188].mxu1 %vm346_vm4, %v3981_v22  ;;  %v3894_v43 = vpack.c.bf16 %v3891_v51, %v3891_v51 }
0x1f23   :  { %5623 = vmatprep.mubr.msk.bf16.mxu1 %vm6049_vm0, %v6048_v0 }
0x1f24   :  { %5582 = vmatmul.mubr.msk.bf16.gmra.mrb[176].mxu0 %vm421_vm5, %v3894_v43  ;;  %v5994_v41 = vpop.eup %5993 }
0x1f25   :  { %5609 = vmatprep.mubr.msk.bf16.mxu0 %vm6049_vm0, %v6048_v0  ;;  %v4112_v32 = vmul.f32 %v5994_v41, %v7829_v40 }
0x1f4d   :  { %v4097_v58 = vpop.xlane.xlu1 %4096 }
0x1f4e   :  { %5995 = vrcp.f32 %v4097_v58 }
0x1f51   :  { %v4125_v36 = vpop.permute.xlu1 %4124 }
0x1f52   :  { %v4138_v13 = vsel %vm642_vm7, %v4125_v36, 0  ;;  %v3729_v3 = vpop.f32.mrb[156].mxu0 }
0x1f53   :  { %v3730_v30 = vadd.f32 %v3729_v3, %v7720_v49  ;;  %v5539_v17 = vpop.f32.mrb[157].mxu0  ;;  %5608 = vmatpush3.bf16.msra.mxu0 %v4138_v13 }
0x1f54   :  { %v3732_v44 = vpop.f32.mrb[158].mxu0  ;;  %5635 = vmatprep.subr.bf16.mxu0 %v6048_v0 }
0x1f55   :  { %v3733_v46 = vadd.f32 %v3732_v44, %v7722_v7  ;;  %v5540_v8 = vpop.f32.mrb[159].mxu0 }
0x1f56   :  { %v7900_v8 = vpop.permute.xlu1 %4206 }
0x1f58   :  { %v5996_v62 = vpop.eup %5995 }
0x1f59   :  { %v4113_v9 = vmul.f32 %v5996_v62, %v7846_v27 }
0x1f5a   :  { %v3737_v37 = vpop.f32.mrb[160].mxu0 }
0x1f5b   :  { %v4117_v25 = vpack.c.bf16 %v4113_v9, %v4112_v32  ;;  %v3738_v26 = vadd.f32 %v3737_v37, %v7724_v42  ;;  %v5543_v18 = vpop.f32.mrb[161].mxu0 }
0x1f5c   :  { %v3740_v49 = vpop.f32.mrb[162].mxu0 }
0x1f5d   :  { %v3741_v48 = vadd.f32 %v3740_v49, %v7726_v14  ;;  %v5544_v12 = vpop.f32.mrb[163].mxu0  ;;  %5610 = vmatmul.mubr.msk.bf16.vlgmr.msra.gmra.mrb[180].mxu0 %vm421_vm5, %v4117_v25 }
0x1f5e   :  { %5613 = vmatprep.mubr.msk.bf16.mxu0 %vm6049_vm0, %v6048_v0 }
0x1f62   :  { %v3745_v7 = vpop.f32.mrb[164].mxu0 }
0x1f63   :  { %v3746_v35 = vadd.f32 %v3745_v7, %v7728_v16  ;;  %v5547_v40 = vpop.f32.mrb[165].mxu0 }
0x1f64   :  { %v3748_v45 = vpop.f32.mrb[166].mxu0 }
0x1f65   :  { %v5548_v27 = vpop.f32.mrb[167].mxu0 }
0x1fbc   :  { %v4048_v21 = vpop.f32.mrb[184].mxu1 }
0x1fbd   :  { %v4049_v24 = vadd.f32 %v7588_v11, %v4048_v21  ;;  %v5597_v42 = vpop.f32.mrb[185].mxu1 }
0x1fbe   :  { %v4051_v63 = vpop.f32.mrb[186].mxu1 }
0x1fbf   :  { %v4052_v28 = vadd.f32 %v7594_v47, %v4051_v63  ;;  %v5598_v14 = vpop.f32.mrb[187].mxu1  ;;  %v4068_v20 = vsel %vm421_vm5, %v4049_v24, -inf }
0x1fc0   :  { %4069 = vmax.xlane.f32.xlu0 %v4068_v20 }
0x1fc1   :  { %v4071_v52 = vsel %vm421_vm5, %v4052_v28, -inf }
0x1fc2   :  { %4072 = vmax.xlane.f32.xlu1 %v4071_v52 }
0x1fc7   :  { %v3949_v50 = vpop.f32.mrb[168].mxu0 }
0x1fc8   :  { %v3971_v57 = vadd.f32 %v3949_v50, %v3730_v30  ;;  %v5575_v16 = vpop.f32.mrb[169].mxu0 }
0x1fc9   :  { %v3952_v34 = vpop.f32.mrb[170].mxu0 }
0x1fca   :  { %v3972_v29 = vadd.f32 %v3952_v34, %v3733_v46  ;;  %v5576_v55 = vpop.f32.mrb[171].mxu0 }
0x1fcf   :  { %v3957_v39 = vpop.f32.mrb[172].mxu0 }
0x1fd0   :  { %v7892_v5 = vadd.f32 %v3957_v39, %v3738_v26  ;;  %v5579_v11 = vpop.f32.mrb[173].mxu0  ;;  %v5693_v39 = vld [vmem:[%s8062_s3 + $0x68] sm:$0xff]  }
0x1fd1   :  { %v3960_v6 = vpop.f32.mrb[174].mxu0  ;;  %5622 = vmatpush3.bf16.msra.mxu1 %v5693_v39 }
0x1fd2   :  { %v7894_v10 = vadd.f32 %v3960_v6, %v3741_v48  ;;  %v5580_v47 = vpop.f32.mrb[175].mxu0  ;;  %5655 = vmatprep.subr.bf16.mxu1 %v6048_v0 }
0x1ff5   :  { %v4056_v38 = vpop.f32.mrb[188].mxu1 }
0x1ff6   :  { %v4057_v61 = vadd.f32 %v7606_v31, %v4056_v38  ;;  %v5601_v60 = vpop.f32.mrb[189].mxu1 }
0x1ff7   :  { %v3965_v53 = vpop.f32.mrb[176].mxu0  ;;  %v4059_v51 = vpop.f32.mrb[190].mxu1 }
0x1ff8   :  { %v7897_v22 = vadd.f32 %v3965_v53, %v3746_v35  ;;  %v5583_v43 = vpop.f32.mrb[177].mxu0  ;;  %v5602_v58 = vpop.f32.mrb[191].mxu1  ;;  %v4074_v36 = vsel %vm434_vm6, %v4057_v61, -inf }
0x1ff9   :  { %4075 = vmax.xlane.f32.xlu0 %v4074_v36  ;;  %v3968_v13 = vpop.f32.mrb[178].mxu0 }
0x1ffa   :  { %v5584_v3 = vpop.f32.mrb[179].mxu0 }
0x2030   :  { %v4174_v30 = vpop.f32.mrb[180].mxu0 }
0x2031   :  { %v4196_v17 = vadd.f32 %v4174_v30, %v3971_v57  ;;  %v5611_v44 = vpop.f32.mrb[181].mxu0 }
0x2032   :  { %v4177_v46 = vpop.f32.mrb[182].mxu0 }
0x2033   :  { %v4201_v31 = vadd.f32 %v4196_v17, %v7478_v33  ;;  %v4197_v41 = vadd.f32 %v4177_v46, %v3972_v29  ;;  %v5612_v62 = vpop.f32.mrb[183].mxu0 }
0x2035   :  { %v4202_v32 = vadd.f32 %v4197_v41, %v7481_v54  ;;  %v7905_v9 = vadd.f32 %v7900_v8, %v4201_v31 }
0x2037   :  { %v4214_v37 = vsel %vm170_vm2, %v7905_v9, 0.0  ;;  %v4210_v25 = vadd.f32 %v7900_v8, %v4202_v32 }
0x2038   :  { %4215 = vadd.xlane.f32.xlu0 %v4214_v37 }
0x2039   :  { %v4217_v26 = vsel %vm170_vm2, %v4210_v25, 0.0 }
0x203a   :  { %4218 = vadd.xlane.f32.xlu1 %v4217_v26 }
0x204d   :  { %v4070_v18 = vpop.xlane.xlu0 %4069 }
0x204e   :  { %v4079_v49 = vsub.f32 %v4049_v24, %v4070_v18 }
0x204f   :  { %v4073_v48 = vpop.xlane.xlu1 %4072 }
0x2050   :  { %v4086_v33 = vmul.f32 1.442695, %v4079_v49  ;;  %v4080_v12 = vsub.f32 %v4052_v28, %v4073_v48 }
0x2052   :  { %5997 = vpow2.f32 %v4086_v33  ;;  %v4088_v7 = vmul.f32 1.442695, %v4080_v12 }
0x2054   :  { %5999 = vpow2.f32 %v4088_v7 }
0x205c   :  { %v5998_v54 = vpop.eup %5997 }
0x205d   :  { %v4098_v35 = vsel %vm421_vm5, %v5998_v54, 0.0 }
0x205e   :  { %v6000_v40 = vpop.eup %5999  ;;  %4099 = vadd.xlane.f32.xlu0 %v4098_v35 }
0x205f   :  { %v4101_v45 = vsel %vm421_vm5, %v6000_v40, 0.0 }
0x2060   :  { %4102 = vadd.xlane.f32.xlu1 %v4101_v45 }
0x2086   :  { %v4076_v27 = vpop.xlane.xlu0 %4075 }
0x2087   :  { %v4081_v21 = vsub.f32 %v4057_v61, %v4076_v27 }
0x2089   :  { %v4090_v42 = vmul.f32 1.442695, %v4081_v21 }
0x208b   :  { %6001 = vpow2.f32 %v4090_v42 }
0x2095   :  { %v6002_v34 = vpop.eup %6001 }
0x2096   :  { %v4104_v55 = vsel %vm434_vm6, %v6002_v34, 0.0 }
0x20c5   :  { %v4216_v63 = vpop.xlane.xlu0 %4215 }
0x20c6   :  { %v4229_v24 = vmul.f32 0.0625, %v4216_v63 }
0x20c7   :  { %v4219_v14 = vpop.xlane.xlu1 %4218 }
0x20c8   :  { %v4234_v28 = vsub.f32 %v7905_v9, %v4229_v24  ;;  %v4230_v20 = vmul.f32 0.0625, %v4219_v14  ;;  %v5697_v14 = vld [vmem:[%s8062_s3 + $0x88] sm:$0xff]  }
0x20ca   :  { %v4235_v52 = vsub.f32 %v4210_v25, %v4230_v20  ;;  %v4239_v50 = vmul.f32 %v4234_v28, %v4234_v28 }
0x20cc   :  { %v4244_v57 = vsel %vm170_vm2, %v4239_v50, 0.0  ;;  %v4240_v16 = vmul.f32 %v4235_v52, %v4235_v52 }
0x20cd   :  { %4245 = vadd.xlane.f32.xlu0 %v4244_v57 }
0x20ce   :  { %v4247_v29 = vsel %vm170_vm2, %v4240_v16, 0.0 }
0x20cf   :  { %4248 = vadd.xlane.f32.xlu1 %v4247_v29 }
0x20d1   :  { %4105 = vadd.xlane.f32.xlu0 %v4104_v55 }
0x20e0   :  { %4279 = vrot.lane.b32.xlu1 %v7518_v15, %s6054_s22 }
0x20e7   :  { %4287 = vrot.lane.b32.xlu0 %v7518_v15, %s6056_s24 }
0x20eb   :  { %v4100_v11 = vpop.xlane.xlu0 %4099 }
0x20ec   :  { %6003 = vrcp.f32 %v4100_v11 }
0x20ed   :  { %v4103_v6 = vpop.xlane.xlu1 %4102 }
0x20ee   :  { %6005 = vrcp.f32 %v4103_v6 }
0x20f6   :  { %v6004_v47 = vpop.eup %6003 }
0x20f7   :  { %v4114_v61 = vmul.f32 %v6004_v47, %v5998_v54 }
0x20f8   :  { %v6006_v38 = vpop.eup %6005 }
0x20f9   :  { %v4115_v60 = vmul.f32 %v6006_v38, %v6000_v40 }
0x20fb   :  { %v4118_v53 = vpack.c.bf16 %v4115_v60, %v4114_v61 }
0x20fd   :  { %5614 = vmatmul.mubr.msk.bf16.gmra.mrb[184].mxu0 %vm421_vm5, %v4118_v53 }
0x20fe   :  { %5617 = vmatprep.mubr.msk.bf16.mxu0 %vm6049_vm0, %v6048_v0 }
0x215a   :  { %v4246_v51 = vpop.xlane.xlu0 %4245 }
0x215b   :  { %v4259_v43 = vmul.f32 0.0625, %v4246_v51 }
0x215c   :  { %v4249_v58 = vpop.xlane.xlu1 %4248 }
0x215d   :  { %v4264_v36 = vadd.f32 1e-06, %v4259_v43  ;;  %v4260_v13 = vmul.f32 0.0625, %v4249_v58 }
0x215e   :  { %v4106_v3 = vpop.xlane.xlu0 %4105 }
0x215f   :  { %6007 = vrsqrt.f32 %v4264_v36  ;;  %v4265_v30 = vadd.f32 1e-06, %v4260_v13 }
0x2160   :  { %6009 = vrcp.f32 %v4106_v3  ;;  %v7928_v44 = vpop.permute.xlu1 %4279 }
0x2161   :  { %6011 = vrsqrt.f32 %v4265_v30 }
0x2162   :  { %v7931_v25 = vpop.permute.xlu0 %4287 }
0x2169   :  { %v6008_v17 = vpop.eup %6007 }
0x216a   :  { %v6010_v46 = vpop.eup %6009  ;;  %v4274_v31 = vmul.f32 %v6008_v17, %v4234_v28  ;;  %v7974_v28 = vld [vmem:[%s8061_s4 + $0x8] sm:$0x7] }
0x216b   :  { %v6012_v41 = vpop.eup %6011  ;;  %v4116_v62 = vmul.f32 %v6010_v46, %v6002_v34  ;;  %v7980_v16 = vrot.slane %v7974_v28, %v261_v56 }
0x216c   :  { %v4275_v32 = vmul.f32 %v6012_v41, %v4235_v52  ;;  %v4282_v37 = vmul.f32 %v7928_v44, %v4274_v31 }
0x216d   :  { %v4119_v26 = vpack.c.bf16 %v4116_v62, %v4116_v62 }
0x216e   :  { %v4283_v18 = vmul.f32 %v7928_v44, %v4275_v32  ;;  %v4290_v49 = vadd.f32 %v7931_v25, %v4282_v37 }
0x216f   :  { %5618 = vmatmul.mubr.msk.bf16.gmra.mrb[188].mxu0 %vm421_vm5, %v4119_v26 }
0x2170   :  { %v4291_v48 = vadd.f32 %v7931_v25, %v4283_v18  ;;  %5643 = vmatprep.mubr.msk.bf16.mxu0 %vm6049_vm0, %v6048_v0 }
0x2172   :  { %v4295_v33 = vpack.c.bf16 %v4291_v48, %v4290_v49 }
0x2174   :  { %5624 = vmatmul.mubr.msk.bf16.vlgmr.msra.gmra.mrb[192].mxu1 %vm170_vm2, %v4295_v33 }
0x2175   :  { %5627 = vmatprep.mubr.msk.bf16.mxu1 %vm6049_vm0, %v6048_v0 }
0x21d0   :  { %v4182_v12 = vpop.f32.mrb[184].mxu0 }
0x21d1   :  { %v4198_v7 = vadd.f32 %v4182_v12, %v7892_v5  ;;  %v5615_v54 = vpop.f32.mrb[185].mxu0 }
0x21d2   :  { %v4185_v35 = vpop.f32.mrb[186].mxu0 }
0x21d3   :  { %v4203_v40 = vadd.f32 %v4198_v7, %v7488_v19  ;;  %v4199_v45 = vadd.f32 %v4185_v35, %v7894_v10  ;;  %v5616_v27 = vpop.f32.mrb[187].mxu0  ;;  %v5694_v19 = vld [vmem:[%s8062_s3 + $0x70] sm:$0xff]   ;;  %v5696_v10 = vld [vmem:[%s8062_s3 + $0x80] sm:$0xff]  }
0x21d4   :  { %5636 = vmatpush3.bf16.msra.mxu0 %v5694_v19 }
0x21d5   :  { %v4204_v21 = vadd.f32 %v4199_v45, %v7491_v1  ;;  %v7947_v42 = vadd.f32 %v7900_v8, %v4203_v40  ;;  %5637 = vmatprep.subr.bf16.mxu0 %v6048_v0  ;;  %v5695_v1 = vld [vmem:[%s8062_s3 + $0x78] sm:$0xff]  }
0x21d7   :  { %v4220_v63 = vsel %vm170_vm2, %v7947_v42, 0.0  ;;  %v7952_v24 = vadd.f32 %v7900_v8, %v4204_v21 }
0x21d8   :  { %4221 = vadd.xlane.f32.xlu1 %v4220_v63  ;;  %5638 = vmatpush3.bf16.msra.mxu0 %v5695_v1 }
0x21d9   :  { %v4223_v5 = vsel %vm170_vm2, %v7952_v24, 0.0  ;;  %5639 = vmatprep.subr.bf16.mxu0 %v6048_v0 }
0x21da   :  { %4224 = vadd.xlane.f32.xlu0 %v4223_v5 }
0x21dc   :  { %5640 = vmatpush3.bf16.msra.mxu0 %v5696_v10 }
0x21dd   :  { %5641 = vmatprep.subr.bf16.mxu0 %v6048_v0 }
0x21e0   :  { %5642 = vmatpush3.bf16.msra.mxu0 %v5697_v14 }
0x2242   :  { %v4190_v20 = vpop.f32.mrb[188].mxu0 }
0x2243   :  { %v4200_v52 = vadd.f32 %v4190_v20, %v7897_v22  ;;  %v5619_v50 = vpop.f32.mrb[189].mxu0 }
0x2244   :  { %v4193_v57 = vpop.f32.mrb[190].mxu0 }
0x2245   :  { %v4205_v34 = vadd.f32 %v4200_v52, %v7498_v59  ;;  %v5620_v29 = vpop.f32.mrb[191].mxu0 }
0x2247   :  { %v4351_v55 = vpop.f32.mrb[192].mxu1  ;;  %v7984_v39 = vadd.f32 %v7900_v8, %v4205_v34 }
0x2248   :  { %v7987_v11 = vadd.f32 %v4351_v55, %v7980_v16  ;;  %v5625_v6 = vpop.f32.mrb[193].mxu1 }
0x2249   :  { %v4354_v47 = vpop.f32.mrb[194].mxu1  ;;  %v4226_v22 = vsel %vm183_vm3, %v7984_v39, 0.0 }
0x224a   :  { %v4378_v38 = vmul.f32 0.70710677, %v7987_v11  ;;  %v7993_v56 = vadd.f32 %v4354_v47, %v7980_v16  ;;  %4227 = vadd.xlane.f32.xlu1 %v4226_v22  ;;  %v5626_v59 = vpop.f32.mrb[195].mxu1 }
0x224c   :  { %v4850_v61 = vclamps-f32 %v4378_v38, 4.0  ;;  %v4379_v60 = vmul.f32 0.70710677, %v7993_v56 }
0x224e   :  { %v4393_v8 = vmul.f32 %v4850_v61, %v4850_v61  ;;  %v4851_v53 = vclamps-f32 %v4379_v60, 4.0 }
0x2250   :  { %v4398_v51 = vmul.f32 -2.7261424e-10, %v4393_v8  ;;  %v4458_v43 = vmul.f32 -1.45660715e-05, %v4393_v8  ;;  %v4394_v58 = vmul.f32 %v4851_v53, %v4851_v53 }
0x2252   :  { %v4403_v36 = vadd.f32 2.7706815e-08, %v4398_v51  ;;  %v4463_v13 = vadd.f32 -0.00021337405, %v4458_v43  ;;  %v4399_v3 = vmul.f32 -2.7261424e-10, %v4394_v58 }
0x2253   :  { %v4459_v30 = vmul.f32 -1.45660715e-05, %v4394_v58 }
0x2254   :  { %v4408_v17 = vmul.f32 %v4403_v36, %v4393_v8  ;;  %v4468_v46 = vmul.f32 %v4463_v13, %v4393_v8  ;;  %v4404_v31 = vadd.f32 2.7706815e-08, %v4399_v3 }
0x2255   :  { %v4464_v41 = vadd.f32 -0.00021337405, %v4459_v30 }
0x2256   :  { %v4413_v62 = vadd.f32 -2.101024e-06, %v4408_v17  ;;  %v4473_v32 = vadd.f32 -0.001682827, %v4468_v46  ;;  %v4409_v37 = vmul.f32 %v4404_v31, %v4394_v58 }
0x2257   :  { %v4469_v26 = vmul.f32 %v4464_v41, %v4394_v58 }
0x2258   :  { %v4418_v18 = vmul.f32 %v4413_v62, %v4393_v8  ;;  %v4478_v49 = vmul.f32 %v4473_v32, %v4393_v8  ;;  %v4414_v48 = vadd.f32 -2.101024e-06, %v4409_v37 }
0x2259   :  { %v4474_v33 = vadd.f32 -0.001682827, %v4469_v26 }
0x225a   :  { %v4423_v12 = vadd.f32 -5.6925062e-05, %v4418_v18  ;;  %v4483_v7 = vadd.f32 -0.0073733293, %v4478_v49  ;;  %v4419_v54 = vmul.f32 %v4414_v48, %v4394_v58 }
0x225b   :  { %v4479_v35 = vmul.f32 %v4474_v33, %v4394_v58 }
0x225c   :  { %v4428_v40 = vmul.f32 %v4423_v12, %v4393_v8  ;;  %v4488_v45 = vmul.f32 %v4483_v7, %v4393_v8  ;;  %v4424_v27 = vadd.f32 -5.6925062e-05, %v4419_v54 }
0x225d   :  { %v4484_v21 = vadd.f32 -0.0073733293, %v4479_v35 }
0x225e   :  { %v4433_v63 = vadd.f32 -0.00073499064, %v4428_v40  ;;  %v4493_v5 = vadd.f32 -0.014264739, %v4488_v45  ;;  %v4429_v19 = vmul.f32 %v4424_v27, %v4394_v58 }
0x225f   :  { %v4489_v1 = vmul.f32 %v4484_v21, %v4394_v58 }
0x2260   :  { %v4438_v10 = vmul.f32 %v4433_v63, %v4393_v8  ;;  %6013 = vrcp.f32 %v4493_v5  ;;  %v4434_v14 = vadd.f32 -0.00073499064, %v4429_v19 }
0x2261   :  { %v4494_v20 = vadd.f32 -0.014264739, %v4489_v1 }
0x2262   :  { %v4443_v52 = vadd.f32 -0.0029546, %v4438_v10  ;;  %v4439_v50 = vmul.f32 %v4434_v14, %v4394_v58 }
0x2263   :  { %6015 = vrcp.f32 %v4494_v20 }
0x2264   :  { %v4448_v57 = vmul.f32 %v4443_v52, %v4393_v8  ;;  %v4444_v34 = vadd.f32 -0.0029546, %v4439_v50 }
0x2265   :  { %v4222_v29 = vpop.xlane.xlu1 %4221 }
0x2266   :  { %v4453_v55 = vadd.f32 -0.016096033, %v4448_v57  ;;  %v4449_v6 = vmul.f32 %v4444_v34, %v4394_v58  ;;  %v4231_v47 = vmul.f32 0.0625, %v4222_v29 }
0x2267   :  { %v4225_v22 = vpop.xlane.xlu0 %4224 }
0x2268   :  { %v4498_v38 = vmul.f32 %v4850_v61, %v4453_v55  ;;  %v4454_v59 = vadd.f32 -0.016096033, %v4449_v6  ;;  %v4236_v60 = vsub.f32 %v7947_v42, %v4231_v47  ;;  %v4232_v51 = vmul.f32 0.0625, %v4225_v22 }
0x2269   :  { %v4373_v61 = vmul.f32 0.5, %v7987_v11  ;;  %v4374_v42 = vmul.f32 0.5, %v7993_v56 }
0x226a   :  { %v6014_v43 = vpop.eup %6013  ;;  %v4499_v36 = vmul.f32 %v4851_v53, %v4454_v59  ;;  %v4237_v13 = vsub.f32 %v7952_v24, %v4232_v51  ;;  %v4241_v3 = vmul.f32 %v4236_v60, %v4236_v60 }
0x226b   :  { %v4504_v30 = vmul.f32 %v6014_v43, %v4498_v38 }
0x226c   :  { %v4250_v17 = vsel %vm170_vm2, %v4241_v3, 0.0  ;;  %v4242_v8 = vmul.f32 %v4237_v13, %v4237_v13 }
0x226d   :  { %v6016_v46 = vpop.eup %6015  ;;  %4251 = vadd.xlane.f32.xlu0 %v4250_v17  ;;  %v4513_v31 = vadd.f32 1.0, %v4504_v30 }
0x226e   :  { %v4506_v58 = vmul.f32 %v6016_v46, %v4499_v36  ;;  %v4253_v41 = vsel %vm170_vm2, %v4242_v8, 0.0 }
0x226f   :  { %4254 = vadd.xlane.f32.xlu1 %v4253_v41  ;;  %v4518_v53 = vmul.f32 %v4513_v31, %v4373_v61 }
0x2270   :  { %v4514_v62 = vadd.f32 1.0, %v4506_v58 }
0x2272   :  { %v4519_v32 = vmul.f32 %v4514_v62, %v4374_v42 }
0x2274   :  { %v4523_v24 = vpack.c.bf16 %v4519_v32, %v4518_v53 }
0x2276   :  { %5644 = vmatmul.mubr.msk.bf16.vlgmr.msra.gmra.mrb[192].mxu0 %vm1580_vm8, %v4523_v24 }
0x2277   :  { %5647 = vmatprep.mubr.msk.bf16.mxu0 %vm6049_vm0, %v6048_v0 }
0x2280   :  { %4550 = vrot.lane.b32.xlu1 %v7518_v15, %s6055_s23 }
0x22d7   :  { %v4228_v37 = vpop.xlane.xlu1 %4227 }
0x22d8   :  { %v4233_v26 = vmul.f32 0.0625, %v4228_v37 }
0x22da   :  { %v4238_v18 = vsub.f32 %v7984_v39, %v4233_v26 }
0x22dc   :  { %v4243_v49 = vmul.f32 %v4238_v18, %v4238_v18 }
0x22de   :  { %v4256_v11 = vsel %vm183_vm3, %v4243_v49, 0.0 }
0x22df   :  { %4257 = vadd.xlane.f32.xlu0 %v4256_v11 }
0x22fa   :  { %v4252_v56 = vpop.xlane.xlu0 %4251 }
0x22fb   :  { %v4261_v48 = vmul.f32 0.0625, %v4252_v56 }
0x22fc   :  { %v4255_v33 = vpop.xlane.xlu1 %4254 }
0x22fd   :  { %v4266_v12 = vadd.f32 1e-06, %v4261_v48  ;;  %v4262_v7 = vmul.f32 0.0625, %v4255_v33 }
0x22ff   :  { %6017 = vrsqrt.f32 %v4266_v12  ;;  %v4267_v54 = vadd.f32 1e-06, %v4262_v7  ;;  %v8036_v12 = vrot.slane %v7974_v28, %v240_v4 }
0x2300   :  { %v4551_v19 = vpop.permute.xlu1 %4550 }
0x2301   :  { %6019 = vrsqrt.f32 %v4267_v54 }
0x2309   :  { %v6018_v35 = vpop.eup %6017 }
0x230a   :  { %v4276_v40 = vmul.f32 %v6018_v35, %v4236_v60 }
0x230b   :  { %v6020_v45 = vpop.eup %6019 }
0x230c   :  { %v4277_v15 = vmul.f32 %v6020_v45, %v4237_v13  ;;  %v4284_v27 = vmul.f32 %v7928_v44, %v4276_v40 }
0x230e   :  { %v4285_v39 = vmul.f32 %v7928_v44, %v4277_v15  ;;  %v4292_v21 = vadd.f32 %v7931_v25, %v4284_v27 }
0x2310   :  { %v4293_v63 = vadd.f32 %v7931_v25, %v4285_v39 }
0x2312   :  { %v4296_v5 = vpack.c.bf16 %v4293_v63, %v4292_v21 }
0x2314   :  { %5628 = vmatmul.mubr.msk.bf16.gmra.mrb[196].mxu1 %vm170_vm2, %v4296_v5 }
0x2315   :  { %5631 = vmatprep.mubr.msk.bf16.mxu1 %vm6049_vm0, %v6048_v0 }
0x2349   :  { %v4596_v1 = vpop.f32.mrb[192].mxu0 }
0x234a   :  { %v4597_v10 = vadd.f32 %v4596_v1, %v4551_v19  ;;  %v5645_v14 = vpop.f32.mrb[193].mxu0 }
0x234b   :  { %v4599_v20 = vpop.f32.mrb[194].mxu0 }
0x234c   :  { %v4614_v52 = vadd.f32 %v4597_v10, %v7905_v9  ;;  %v5646_v50 = vpop.f32.mrb[195].mxu0 }
0x234e   :  { %v4615_v57 = vsel %vm170_vm2, %v4614_v52, 0.0 }
0x234f   :  { %4616 = vadd.xlane.f32.xlu0 %v4615_v57 }
0x236c   :  { %v4258_v34 = vpop.xlane.xlu0 %4257 }
0x236d   :  { %v4263_v29 = vmul.f32 0.0625, %v4258_v34  ;;  %v5698_v34 = vld [vmem:[%s8058_s2 + $0x18] sm:$0xff]  }
0x236e   :  { %5656 = vmatpush3.bf16.msra.mxu1 %v5698_v34 }
0x236f   :  { %v4268_v55 = vadd.f32 1e-06, %v4263_v29 }
0x2371   :  { %6021 = vrsqrt.f32 %v4268_v55 }
0x237b   :  { %v6022_v6 = vpop.eup %6021 }
0x237c   :  { %v4278_v47 = vmul.f32 %v6022_v6, %v4238_v18 }
0x237e   :  { %v4286_v22 = vmul.f32 %v7928_v44, %v4278_v47 }
0x2380   :  { %v4294_v38 = vadd.f32 %v7931_v25, %v4286_v22 }
0x2382   :  { %v4297_v59 = vpack.c.bf16 %v4294_v38, %v4294_v38 }
0x2384   :  { %5632 = vmatmul.mubr.msk.bf16.gmra.mrb[200].mxu1 %vm170_vm2, %v4297_v59 }
0x2385   :  { %5657 = vmatprep.mubr.msk.bf16.mxu1 %vm6049_vm0, %v6048_v0 }
0x23dc   :  { %v4617_v9 = vpop.xlane.xlu0 %4616 }
0x23dd   :  { %v4618_v60 = vmul.f32 0.0625, %v4617_v9 }
0x23df   :  { %v8023_v51 = vsub.f32 %v4614_v52, %v4618_v60 }
0x23e1   :  { %v4620_v43 = vmul.f32 %v8023_v51, %v8023_v51 }
0x23e3   :  { %v4621_v36 = vsel %vm170_vm2, %v4620_v43, 0.0 }
0x23e4   :  { %4622 = vadd.xlane.f32.xlu0 %v4621_v36 }
0x23e7   :  { %v4359_v13 = vpop.f32.mrb[196].mxu1 }
0x23e8   :  { %v8029_v44 = vadd.f32 %v4359_v13, %v7980_v16  ;;  %v5629_v25 = vpop.f32.mrb[197].mxu1 }
0x23e9   :  { %v4362_v3 = vpop.f32.mrb[198].mxu1 }
0x23ea   :  { %v4380_v30 = vmul.f32 0.70710677, %v8029_v44  ;;  %v4363_v17 = vadd.f32 %v4362_v3, %v7980_v16  ;;  %v5630_v8 = vpop.f32.mrb[199].mxu1 }
0x23ec   :  { %v4852_v46 = vclamps-f32 %v4380_v30, 4.0  ;;  %v4381_v31 = vmul.f32 0.70710677, %v4363_v17  ;;  %v4375_v30 = vmul.f32 0.5, %v8029_v44  ;;  %v4376_v8 = vmul.f32 0.5, %v4363_v17 }
0x23ee   :  { %v4395_v58 = vmul.f32 %v4852_v46, %v4852_v46  ;;  %v4853_v41 = vclamps-f32 %v4381_v31, 4.0 }
0x23f0   :  { %v4400_v61 = vmul.f32 -2.7261424e-10, %v4395_v58  ;;  %v4460_v42 = vmul.f32 -1.45660715e-05, %v4395_v58  ;;  %v4396_v62 = vmul.f32 %v4853_v41, %v4853_v41 }
0x23f2   :  { %v4405_v53 = vadd.f32 2.7706815e-08, %v4400_v61  ;;  %v4465_v32 = vadd.f32 -0.00021337405, %v4460_v42  ;;  %v4401_v24 = vmul.f32 -2.7261424e-10, %v4396_v62 }
0x23f3   :  { %v4461_v37 = vmul.f32 -1.45660715e-05, %v4396_v62 }
0x23f4   :  { %v4410_v26 = vmul.f32 %v4405_v53, %v4395_v58  ;;  %v4470_v18 = vmul.f32 %v4465_v32, %v4395_v58  ;;  %v4406_v49 = vadd.f32 2.7706815e-08, %v4401_v24 }
0x23f5   :  { %v4466_v11 = vadd.f32 -0.00021337405, %v4461_v37 }
0x23f6   :  { %v4415_v56 = vadd.f32 -2.101024e-06, %v4410_v26  ;;  %v4475_v48 = vadd.f32 -0.001682827, %v4470_v18  ;;  %v4411_v33 = vmul.f32 %v4406_v49, %v4396_v62 }
0x23f7   :  { %v4471_v7 = vmul.f32 %v4466_v11, %v4396_v62 }
0x23f8   :  { %v4420_v54 = vmul.f32 %v4415_v56, %v4395_v58  ;;  %v4480_v35 = vmul.f32 %v4475_v48, %v4395_v58  ;;  %v4416_v40 = vadd.f32 -2.101024e-06, %v4411_v33 }
0x23f9   :  { %v4476_v45 = vadd.f32 -0.001682827, %v4471_v7 }
0x23fa   :  { %v4425_v15 = vadd.f32 -5.6925062e-05, %v4420_v54  ;;  %v4485_v27 = vadd.f32 -0.0073733293, %v4480_v35  ;;  %v4421_v39 = vmul.f32 %v4416_v40, %v4396_v62  ;;  %4634 = vrot.lane.b32.xlu0 %v8036_v12, %s6051_s17 }
0x23fb   :  { %v4481_v21 = vmul.f32 %v4476_v45, %v4396_v62 }
0x23fc   :  { %v4430_v63 = vmul.f32 %v4425_v15, %v4395_v58  ;;  %v4490_v5 = vmul.f32 %v4485_v27, %v4395_v58  ;;  %v4426_v19 = vadd.f32 -5.6925062e-05, %v4421_v39 }
0x23fd   :  { %v4486_v1 = vadd.f32 -0.0073733293, %v4481_v21 }
0x23fe   :  { %v4435_v10 = vadd.f32 -0.00073499064, %v4430_v63  ;;  %v4495_v14 = vadd.f32 -0.014264739, %v4490_v5  ;;  %v4431_v4 = vmul.f32 %v4426_v19, %v4396_v62 }
0x23ff   :  { %v4491_v20 = vmul.f32 %v4486_v1, %v4396_v62 }
0x2400   :  { %v4440_v52 = vmul.f32 %v4435_v10, %v4395_v58  ;;  %6023 = vrcp.f32 %v4495_v14  ;;  %v4436_v50 = vadd.f32 -0.00073499064, %v4431_v4 }
0x2401   :  { %v4496_v57 = vadd.f32 -0.014264739, %v4491_v20 }
0x2402   :  { %v4445_v29 = vadd.f32 -0.0029546, %v4440_v52  ;;  %v4441_v55 = vmul.f32 %v4436_v50, %v4396_v62 }
0x2403   :  { %6025 = vrcp.f32 %v4496_v57 }
0x2404   :  { %v4450_v6 = vmul.f32 %v4445_v29, %v4395_v58  ;;  %v4446_v47 = vadd.f32 -0.0029546, %v4441_v55 }
0x2406   :  { %v4455_v22 = vadd.f32 -0.016096033, %v4450_v6  ;;  %v4451_v38 = vmul.f32 %v4446_v47, %v4396_v62 }
0x2408   :  { %v4500_v59 = vmul.f32 %v4852_v46, %v4455_v22  ;;  %v4456_v9 = vadd.f32 -0.016096033, %v4451_v38 }
0x240a   :  { %v6024_v60 = vpop.eup %6023  ;;  %v4501_v43 = vmul.f32 %v4853_v41, %v4456_v9 }
0x240b   :  { %v4508_v36 = vmul.f32 %v6024_v60, %v4500_v59 }
0x240d   :  { %v6026_v13 = vpop.eup %6025  ;;  %v4515_v25 = vadd.f32 1.0, %v4508_v36 }
0x240e   :  { %v4510_v3 = vmul.f32 %v6026_v13, %v4501_v43 }
0x240f   :  { %v4520_v61 = vmul.f32 %v4515_v25, %v4375_v30 }
0x2410   :  { %v4516_v31 = vadd.f32 1.0, %v4510_v3 }
0x2412   :  { %v4521_v42 = vmul.f32 %v4516_v31, %v4376_v8 }
0x2414   :  { %v4524_v53 = vpack.c.bf16 %v4521_v42, %v4520_v61 }
0x2416   :  { %5648 = vmatmul.mubr.msk.bf16.gmra.mrb[196].mxu0 %vm1580_vm8, %v4524_v53 }
0x2417   :  { %5651 = vmatprep.mubr.msk.bf16.mxu0 %vm6049_vm0, %v6048_v0 }
0x2457   :  { %v4367_v46 = vpop.f32.mrb[200].mxu1 }
0x2458   :  { %v4368_v58 = vadd.f32 %v4367_v46, %v7980_v16  ;;  %v5633_v41 = vpop.f32.mrb[201].mxu1 }
0x2459   :  { %v4370_v62 = vpop.f32.mrb[202].mxu1 }
0x245a   :  { %v4382_v32 = vmul.f32 0.70710677, %v4368_v58  ;;  %v5634_v24 = vpop.f32.mrb[203].mxu1  ;;  %v4377_v20 = vmul.f32 0.5, %v4368_v58 }
0x245c   :  { %v4854_v37 = vclamps-f32 %v4382_v32, 4.0 }
0x245e   :  { %v4397_v26 = vmul.f32 %v4854_v37, %v4854_v37 }
0x2460   :  { %v4402_v44 = vmul.f32 -2.7261424e-10, %v4397_v26  ;;  %v4462_v17 = vmul.f32 -1.45660715e-05, %v4397_v26 }
0x2462   :  { %v4407_v18 = vadd.f32 2.7706815e-08, %v4402_v44  ;;  %v4467_v49 = vadd.f32 -0.00021337405, %v4462_v17 }
0x2464   :  { %v4412_v11 = vmul.f32 %v4407_v18, %v4397_v26  ;;  %v4472_v56 = vmul.f32 %v4467_v49, %v4397_v26 }
0x2466   :  { %v4417_v48 = vadd.f32 -2.101024e-06, %v4412_v11  ;;  %v4477_v33 = vadd.f32 -0.001682827, %v4472_v56 }
0x2468   :  { %v4422_v7 = vmul.f32 %v4417_v48, %v4397_v26  ;;  %v4482_v54 = vmul.f32 %v4477_v33, %v4397_v26 }
0x246a   :  { %v4427_v0 = vadd.f32 -5.6925062e-05, %v4422_v7  ;;  %v4487_v35 = vadd.f32 -0.0073733293, %v4482_v54 }
0x246c   :  { %v4432_v40 = vmul.f32 %v4427_v0, %v4397_v26  ;;  %v4492_v16 = vmul.f32 %v4487_v35, %v4397_v26 }
0x246e   :  { %v4437_v45 = vadd.f32 -0.00073499064, %v4432_v40  ;;  %v4497_v15 = vadd.f32 -0.014264739, %v4492_v16 }
0x2470   :  { %v4442_v27 = vmul.f32 %v4437_v45, %v4397_v26  ;;  %6027 = vrcp.f32 %v4497_v15 }
0x2471   :  { %v4623_v39 = vpop.xlane.xlu0 %4622 }
0x2472   :  { %v4447_v21 = vadd.f32 -0.0029546, %v4442_v27  ;;  %v4624_v63 = vmul.f32 0.0625, %v4623_v39 }
0x2474   :  { %v4452_v5 = vmul.f32 %v4447_v21, %v4397_v26  ;;  %v4625_v19 = vadd.f32 1e-06, %v4624_v63 }
0x2475   :  { %v4635_v55 = vpop.permute.xlu0 %4634 }
0x2476   :  { %v4457_v1 = vadd.f32 -0.016096033, %v4452_v5  ;;  %6029 = vrsqrt.f32 %v4625_v19 }
0x2478   :  { %v4502_v10 = vmul.f32 %v4854_v37, %v4457_v1 }
0x247a   :  { %v6028_v14 = vpop.eup %6027 }
0x247b   :  { %v4512_v4 = vmul.f32 %v6028_v14, %v4502_v10 }
0x247d   :  { %v4517_v52 = vadd.f32 1.0, %v4512_v4 }
0x247f   :  { %v4522_v50 = vmul.f32 %v4517_v52, %v4377_v20 }
0x2480   :  { %v6030_v57 = vpop.eup %6029 }
0x2481   :  { %v4525_v34 = vpack.c.bf16 %v4522_v50, %v4522_v50  ;;  %v4627_v29 = vmul.f32 %v6030_v57, %v8023_v51  ;;  %v4642_v51 = vrot.slane %v7974_v28, %v1327_v23 }
0x2483   :  { %5652 = vmatmul.mubr.msk.bf16.gmra.mrb[200].mxu0 %vm1580_vm8, %v4525_v34  ;;  %v4632_v6 = vmul.f32 %v8036_v12, %v4627_v29 }
0x2485   :  { %v4637_v47 = vadd.f32 %v4635_v55, %v4632_v6 }
0x2487   :  { %v4638_v22 = vpack.c.bf16 %v4637_v47, %v4637_v47 }
0x2489   :  { %5658 = vmatmul.mubr.msk.bf16.vlgmr.msra.gmra.mrb[204].mxu1 %vm170_vm2, %v4638_v22 }
0x24e9   :  { %v4603_v38 = vpop.f32.mrb[196].mxu0 }
0x24ea   :  { %v5649_v59 = vpop.f32.mrb[197].mxu0 }
0x24eb   :  { %v4605_v9 = vpop.f32.mrb[198].mxu0 }
0x24ec   :  { %v5650_v60 = vpop.f32.mrb[199].mxu0 }
0x2556   :  { %v4609_v43 = vpop.f32.mrb[200].mxu0 }
0x2557   :  { %v5653_v36 = vpop.f32.mrb[201].mxu0 }
0x2558   :  { %v4611_v13 = vpop.f32.mrb[202].mxu0 }
0x2559   :  { %v5654_v25 = vpop.f32.mrb[203].mxu0 }
0x255c   :  { %v4686_v3 = vpop.f32.mrb[204].mxu1 }
0x255d   :  { %v4687_v30 = vadd.f32 %v4686_v3, %v4642_v51  ;;  %v5659_v8 = vpop.f32.mrb[205].mxu1 }
0x255e   :  { %v4689_v12 = vpop.f32.mrb[206].mxu1 }
0x255f   :  { %4692 = vst [vmem:[%s8063_s5] sm:$0xff] %v4687_v30  ;;  %v5660_v31 = vpop.f32.mrb[207].mxu1 }

</bundles_post_ra>
